<compile_context>
chip_gen: v6e
topology: v6e:2x2x1
jax: 0.10.0
libtpu: 0.0.40
codegen_flags: <defaults>
</compile_context>

<pallas_src>
import jax
import jax.numpy as jnp
from jax import lax
from jax.experimental import pallas as pl
from jax.experimental.pallas import tpu as pltpu

KH = KW = 5
PAD = 2


def shared_conv_kernel(x_ref, w_ref, o_ref, xp_ref, patch_ref):
    # x_ref     : (1, H, W, C)      unpadded NHWC image for this batch element
    # w_ref     : (OC, KH*KW*C)     combined weight (W + W^T_spatial), im2col order
    # o_ref     : (1, OC, H*W)      output, pixel index lane-dense (256 lanes)
    # xp_ref    : (Hp, Wp, C)       VMEM scratch: zero-padded image
    # patch_ref : (H, W, KH*KW*C)   VMEM scratch: im2col patch matrix
    _, H, W, C = x_ref.shape
    Hp = H + 2 * PAD
    Wp = W + 2 * PAD
    K = KH * KW * C

    # Zero-pad inside the kernel (no separate XLA pad / extra HBM round trip).
    xp_ref[...] = jnp.zeros((Hp, Wp, C), xp_ref.dtype)
    xp_ref[PAD:PAD + H, PAD:PAD + W, :] = x_ref[0]

    # im2col: copy each of the 25 shifted windows into contiguous K-columns so a
    # single K=75 matmul replaces 50 tiny K=3 matmuls.
    for kh in range(KH):
        for kw in range(KW):
            t = kh * KW + kw
            patch_ref[:, :, t * C:(t + 1) * C] = xp_ref[kh:kh + H, kw:kw + W, :]

    lhs = patch_ref[...].reshape(H * W, K)              # (H*W, 75)

    # out_T[oc, p] = sum_k w[oc, k] * lhs[p, k]  ->  (OC, H*W), lane-dense store,
    # and already in NCHW order (batch, OC, pixel) for the wrapper.
    acc = lax.dot_general(
        w_ref[...], lhs,
        dimension_numbers=(((1,), (1,)), ((), ())),
        preferred_element_type=jnp.float32)
    o_ref[0] = acc.astype(o_ref.dtype)


def shared_conv_forward(x_nchw, w_oihw):
    """x_nchw: (N, C, H, W) float32; w_oihw: (OC, C, KH, KW) float32."""
    N, C, H, W = x_nchw.shape
    OC = w_oihw.shape[0]
    Hp, Wp = H + 2 * PAD, W + 2 * PAD
    K = KH * KW * C

    # Conv is linear in the weight: fold the two convolutions into one.
    w_comb = w_oihw + jnp.swapaxes(w_oihw, 2, 3)                 # (OC, C, KH, KW)
    # (OC, C, KH, KW) -> (OC, KH, KW, C) -> (OC, KH*KW*C); column order matches
    # the im2col column order used in the kernel (kh major, kw, c minor).
    w_mat = jnp.transpose(w_comb, (0, 2, 3, 1)).reshape(OC, K)

    # Layout plumbing: NCHW -> NHWC (padding happens inside the kernel).
    x_nhwc = jnp.transpose(x_nchw, (0, 2, 3, 1))                 # (N, H, W, C)

    out = pl.pallas_call(
        shared_conv_kernel,
        out_shape=jax.ShapeDtypeStruct((N, OC, H * W), x_nchw.dtype),
        grid_spec=pltpu.PrefetchScalarGridSpec(
            num_scalar_prefetch=0,
            grid=(N,),
            in_specs=[
                pl.BlockSpec((1, H, W, C), lambda n: (n, 0, 0, 0)),
                pl.BlockSpec((OC, K), lambda n: (0, 0)),
            ],
            out_specs=pl.BlockSpec((1, OC, H * W), lambda n: (n, 0, 0)),
            scratch_shapes=[
                pltpu.VMEM((Hp, Wp, C), jnp.float32),
                pltpu.VMEM((H, W, K), jnp.float32),
            ],
        ),
        compiler_params=pltpu.CompilerParams(
            dimension_semantics=("parallel",)),
    )(x_nhwc, w_mat)

    # (N, OC, H*W) -> (N, OC, H, W): pure metadata reshape, already NCHW.
    return out.reshape(N, OC, H, W)


def reference_forward(x_nchw, w_oihw):
    dn = lax.conv_dimension_numbers(
        x_nchw.shape, w_oihw.shape, ("NCHW", "OIHW", "NCHW"))
    x1 = lax.conv_general_dilated(
        x_nchw, w_oihw, (1, 1), ((PAD, PAD), (PAD, PAD)),
        dimension_numbers=dn)
    x2 = lax.conv_general_dilated(
        x_nchw, jnp.swapaxes(w_oihw, 2, 3), (1, 1),
        ((PAD, PAD), (PAD, PAD)), dimension_numbers=dn)
    return x1 + x2


if __name__ == "__main__":
    key = jax.random.PRNGKey(0)
    kx, kw = jax.random.split(key)

    # Shapes implied by the module: weight (16, 3, 5, 5) -> 3 input channels.
    x = jax.random.normal(kx, (2, 3, 16, 16), dtype=jnp.float32)
    conv_weight = jax.random.normal(kw, (16, 3, 5, 5), dtype=jnp.float32)

    out = jax.block_until_ready(shared_conv_forward(x, conv_weight))
    ref = jax.block_until_ready(reference_forward(x, conv_weight))

    assert out.shape == (2, 16, 16, 16), out.shape
    assert jnp.allclose(out, ref, atol=1e-3, rtol=1e-3), float(
        jnp.max(jnp.abs(out - ref)))
    print("KERNEL_OK")
</pallas_src>

<mosaic_0001>
module attributes {stable_mosaic.version = 11 : i64} {
  func.func @shared_conv_kernel(%arg0: i32, %arg1: memref<1x16x16x3xf32, #tpu.memory_space<vmem>>, %arg2: memref<16x75xf32, #tpu.memory_space<vmem>>, %arg3: memref<1x16x256xf32, #tpu.memory_space<vmem>>, %arg4: memref<20x20x3xf32, #tpu.memory_space<vmem>>, %arg5: memref<16x16x75xf32, #tpu.memory_space<vmem>>) attributes {dimension_semantics = [#tpu.dimension_semantics<parallel>], iteration_bounds = array<i64: 2>, scalar_prefetch = 0 : i64, scratch_operands = 2 : i64, tpu.core_type = #tpu.core_type<tc>, window_params = [{transform_indices = @transform_0, window_bounds = array<i64: 1, 16, 16, 3>}, {pipeline_mode = #tpu.pipeline_mode<synchronous>, transform_indices = @transform_1, window_bounds = array<i64: 16, 75>}, {transform_indices = @transform_2, window_bounds = array<i64: 1, 16, 256>}]} {
    %cst = arith.constant 0.000000e+00 : f32
    %0 = vector.broadcast %cst : f32 to vector<20x20x3xf32>
    %c0 = arith.constant 0 : index
    %c0_0 = arith.constant 0 : index
    %c0_1 = arith.constant 0 : index
    %1 = vector.load %arg4[%c0, %c0_0, %c0_1] : memref<20x20x3xf32, #tpu.memory_space<vmem>>, vector<20x20x3xf32>
    tpu.vector_store %arg4[%c0, %c0_0, %c0_1], %0 {strides = array<i32>} : memref<20x20x3xf32, #tpu.memory_space<vmem>>, vector<20x20x3xf32>,
    %c0_2 = arith.constant 0 : index
    %c0_3 = arith.constant 0 : index
    %c0_4 = arith.constant 0 : index
    %c0_5 = arith.constant 0 : index
    %2 = vector.load %arg1[%c0_2, %c0_3, %c0_4, %c0_5] : memref<1x16x16x3xf32, #tpu.memory_space<vmem>>, vector<1x16x16x3xf32>
    %3 = vector.shape_cast %2 : vector<1x16x16x3xf32> to vector<16x16x3xf32>
    %c2 = arith.constant 2 : index
    %c2_6 = arith.constant 2 : index
    %c0_7 = arith.constant 0 : index
    %4 = vector.load %arg4[%c2, %c2_6, %c0_7] : memref<20x20x3xf32, #tpu.memory_space<vmem>>, vector<16x16x3xf32>
    tpu.vector_store %arg4[%c2, %c2_6, %c0_7], %3 {strides = array<i32>} : memref<20x20x3xf32, #tpu.memory_space<vmem>>, vector<16x16x3xf32>,
    %c0_8 = arith.constant 0 : index
    %c0_9 = arith.constant 0 : index
    %c0_10 = arith.constant 0 : index
    %5 = vector.load %arg4[%c0_8, %c0_9, %c0_10] : memref<20x20x3xf32, #tpu.memory_space<vmem>>, vector<16x16x3xf32>
    %c0_11 = arith.constant 0 : index
    %c0_12 = arith.constant 0 : index
    %c0_13 = arith.constant 0 : index
    %6 = vector.load %arg5[%c0_11, %c0_12, %c0_13] : memref<16x16x75xf32, #tpu.memory_space<vmem>>, vector<16x16x3xf32>
    tpu.vector_store %arg5[%c0_11, %c0_12, %c0_13], %5 {strides = array<i32>} : memref<16x16x75xf32, #tpu.memory_space<vmem>>, vector<16x16x3xf32>,
    %c0_14 = arith.constant 0 : index
    %c1 = arith.constant 1 : index
    %c0_15 = arith.constant 0 : index
    %7 = vector.load %arg4[%c0_14, %c1, %c0_15] : memref<20x20x3xf32, #tpu.memory_space<vmem>>, vector<16x16x3xf32>
    %c0_16 = arith.constant 0 : index
    %c0_17 = arith.constant 0 : index
    %c3 = arith.constant 3 : index
    %8 = vector.load %arg5[%c0_16, %c0_17, %c3] : memref<16x16x75xf32, #tpu.memory_space<vmem>>, vector<16x16x3xf32>
    tpu.vector_store %arg5[%c0_16, %c0_17, %c3], %7 {strides = array<i32>} : memref<16x16x75xf32, #tpu.memory_space<vmem>>, vector<16x16x3xf32>,
    %c0_18 = arith.constant 0 : index
    %c2_19 = arith.constant 2 : index
    %c0_20 = arith.constant 0 : index
    %9 = vector.load %arg4[%c0_18, %c2_19, %c0_20] : memref<20x20x3xf32, #tpu.memory_space<vmem>>, vector<16x16x3xf32>
    %c0_21 = arith.constant 0 : index
    %c0_22 = arith.constant 0 : index
    %c6 = arith.constant 6 : index
    %10 = vector.load %arg5[%c0_21, %c0_22, %c6] : memref<16x16x75xf32, #tpu.memory_space<vmem>>, vector<16x16x3xf32>
    tpu.vector_store %arg5[%c0_21, %c0_22, %c6], %9 {strides = array<i32>} : memref<16x16x75xf32, #tpu.memory_space<vmem>>, vector<16x16x3xf32>,
    %c0_23 = arith.constant 0 : index
    %c3_24 = arith.constant 3 : index
    %c0_25 = arith.constant 0 : index
    %11 = vector.load %arg4[%c0_23, %c3_24, %c0_25] : memref<20x20x3xf32, #tpu.memory_space<vmem>>, vector<16x16x3xf32>
    %c0_26 = arith.constant 0 : index
    %c0_27 = arith.constant 0 : index
    %c9 = arith.constant 9 : index
    %12 = vector.load %arg5[%c0_26, %c0_27, %c9] : memref<16x16x75xf32, #tpu.memory_space<vmem>>, vector<16x16x3xf32>
    tpu.vector_store %arg5[%c0_26, %c0_27, %c9], %11 {strides = array<i32>} : memref<16x16x75xf32, #tpu.memory_space<vmem>>, vector<16x16x3xf32>,
    %c0_28 = arith.constant 0 : index
    %c4 = arith.constant 4 : index
    %c0_29 = arith.constant 0 : index
    %13 = vector.load %arg4[%c0_28, %c4, %c0_29] : memref<20x20x3xf32, #tpu.memory_space<vmem>>, vector<16x16x3xf32>
    %c0_30 = arith.constant 0 : index
    %c0_31 = arith.constant 0 : index
    %c12 = arith.constant 12 : index
    %14 = vector.load %arg5[%c0_30, %c0_31, %c12] : memref<16x16x75xf32, #tpu.memory_space<vmem>>, vector<16x16x3xf32>
    tpu.vector_store %arg5[%c0_30, %c0_31, %c12], %13 {strides = array<i32>} : memref<16x16x75xf32, #tpu.memory_space<vmem>>, vector<16x16x3xf32>,
    %c1_32 = arith.constant 1 : index
    %c0_33 = arith.constant 0 : index
    %c0_34 = arith.constant 0 : index
    %15 = vector.load %arg4[%c1_32, %c0_33, %c0_34] : memref<20x20x3xf32, #tpu.memory_space<vmem>>, vector<16x16x3xf32>
    %c0_35 = arith.constant 0 : index
    %c0_36 = arith.constant 0 : index
    %c15 = arith.constant 15 : index
    %16 = vector.load %arg5[%c0_35, %c0_36, %c15] : memref<16x16x75xf32, #tpu.memory_space<vmem>>, vector<16x16x3xf32>
    tpu.vector_store %arg5[%c0_35, %c0_36, %c15], %15 {strides = array<i32>} : memref<16x16x75xf32, #tpu.memory_space<vmem>>, vector<16x16x3xf32>,
    %c1_37 = arith.constant 1 : index
    %c1_38 = arith.constant 1 : index
    %c0_39 = arith.constant 0 : index
    %17 = vector.load %arg4[%c1_37, %c1_38, %c0_39] : memref<20x20x3xf32, #tpu.memory_space<vmem>>, vector<16x16x3xf32>
    %c0_40 = arith.constant 0 : index
    %c0_41 = arith.constant 0 : index
    %c18 = arith.constant 18 : index
    %18 = vector.load %arg5[%c0_40, %c0_41, %c18] : memref<16x16x75xf32, #tpu.memory_space<vmem>>, vector<16x16x3xf32>
    tpu.vector_store %arg5[%c0_40, %c0_41, %c18], %17 {strides = array<i32>} : memref<16x16x75xf32, #tpu.memory_space<vmem>>, vector<16x16x3xf32>,
    %c1_42 = arith.constant 1 : index
    %c2_43 = arith.constant 2 : index
    %c0_44 = arith.constant 0 : index
    %19 = vector.load %arg4[%c1_42, %c2_43, %c0_44] : memref<20x20x3xf32, #tpu.memory_space<vmem>>, vector<16x16x3xf32>
    %c0_45 = arith.constant 0 : index
    %c0_46 = arith.constant 0 : index
    %c21 = arith.constant 21 : index
    %20 = vector.load %arg5[%c0_45, %c0_46, %c21] : memref<16x16x75xf32, #tpu.memory_space<vmem>>, vector<16x16x3xf32>
    tpu.vector_store %arg5[%c0_45, %c0_46, %c21], %19 {strides = array<i32>} : memref<16x16x75xf32, #tpu.memory_space<vmem>>, vector<16x16x3xf32>,
    %c1_47 = arith.constant 1 : index
    %c3_48 = arith.constant 3 : index
    %c0_49 = arith.constant 0 : index
    %21 = vector.load %arg4[%c1_47, %c3_48, %c0_49] : memref<20x20x3xf32, #tpu.memory_space<vmem>>, vector<16x16x3xf32>
    %c0_50 = arith.constant 0 : index
    %c0_51 = arith.constant 0 : index
    %c24 = arith.constant 24 : index
    %22 = vector.load %arg5[%c0_50, %c0_51, %c24] : memref<16x16x75xf32, #tpu.memory_space<vmem>>, vector<16x16x3xf32>
    tpu.vector_store %arg5[%c0_50, %c0_51, %c24], %21 {strides = array<i32>} : memref<16x16x75xf32, #tpu.memory_space<vmem>>, vector<16x16x3xf32>,
    %c1_52 = arith.constant 1 : index
    %c4_53 = arith.constant 4 : index
    %c0_54 = arith.constant 0 : index
    %23 = vector.load %arg4[%c1_52, %c4_53, %c0_54] : memref<20x20x3xf32, #tpu.memory_space<vmem>>, vector<16x16x3xf32>
    %c0_55 = arith.constant 0 : index
    %c0_56 = arith.constant 0 : index
    %c27 = arith.constant 27 : index
    %24 = vector.load %arg5[%c0_55, %c0_56, %c27] : memref<16x16x75xf32, #tpu.memory_space<vmem>>, vector<16x16x3xf32>
    tpu.vector_store %arg5[%c0_55, %c0_56, %c27], %23 {strides = array<i32>} : memref<16x16x75xf32, #tpu.memory_space<vmem>>, vector<16x16x3xf32>,
    %c2_57 = arith.constant 2 : index
    %c0_58 = arith.constant 0 : index
    %c0_59 = arith.constant 0 : index
    %25 = vector.load %arg4[%c2_57, %c0_58, %c0_59] : memref<20x20x3xf32, #tpu.memory_space<vmem>>, vector<16x16x3xf32>
    %c0_60 = arith.constant 0 : index
    %c0_61 = arith.constant 0 : index
    %c30 = arith.constant 30 : index
    %26 = vector.load %arg5[%c0_60, %c0_61, %c30] : memref<16x16x75xf32, #tpu.memory_space<vmem>>, vector<16x16x3xf32>
    tpu.vector_store %arg5[%c0_60, %c0_61, %c30], %25 {strides = array<i32>} : memref<16x16x75xf32, #tpu.memory_space<vmem>>, vector<16x16x3xf32>,
    %c2_62 = arith.constant 2 : index
    %c1_63 = arith.constant 1 : index
    %c0_64 = arith.constant 0 : index
    %27 = vector.load %arg4[%c2_62, %c1_63, %c0_64] : memref<20x20x3xf32, #tpu.memory_space<vmem>>, vector<16x16x3xf32>
    %c0_65 = arith.constant 0 : index
    %c0_66 = arith.constant 0 : index
    %c33 = arith.constant 33 : index
    %28 = vector.load %arg5[%c0_65, %c0_66, %c33] : memref<16x16x75xf32, #tpu.memory_space<vmem>>, vector<16x16x3xf32>
    tpu.vector_store %arg5[%c0_65, %c0_66, %c33], %27 {strides = array<i32>} : memref<16x16x75xf32, #tpu.memory_space<vmem>>, vector<16x16x3xf32>,
    %c2_67 = arith.constant 2 : index
    %c2_68 = arith.constant 2 : index
    %c0_69 = arith.constant 0 : index
    %29 = vector.load %arg4[%c2_67, %c2_68, %c0_69] : memref<20x20x3xf32, #tpu.memory_space<vmem>>, vector<16x16x3xf32>
    %c0_70 = arith.constant 0 : index
    %c0_71 = arith.constant 0 : index
    %c36 = arith.constant 36 : index
    %30 = vector.load %arg5[%c0_70, %c0_71, %c36] : memref<16x16x75xf32, #tpu.memory_space<vmem>>, vector<16x16x3xf32>
    tpu.vector_store %arg5[%c0_70, %c0_71, %c36], %29 {strides = array<i32>} : memref<16x16x75xf32, #tpu.memory_space<vmem>>, vector<16x16x3xf32>,
    %c2_72 = arith.constant 2 : index
    %c3_73 = arith.constant 3 : index
    %c0_74 = arith.constant 0 : index
    %31 = vector.load %arg4[%c2_72, %c3_73, %c0_74] : memref<20x20x3xf32, #tpu.memory_space<vmem>>, vector<16x16x3xf32>
    %c0_75 = arith.constant 0 : index
    %c0_76 = arith.constant 0 : index
    %c39 = arith.constant 39 : index
    %32 = vector.load %arg5[%c0_75, %c0_76, %c39] : memref<16x16x75xf32, #tpu.memory_space<vmem>>, vector<16x16x3xf32>
    tpu.vector_store %arg5[%c0_75, %c0_76, %c39], %31 {strides = array<i32>} : memref<16x16x75xf32, #tpu.memory_space<vmem>>, vector<16x16x3xf32>,
    %c2_77 = arith.constant 2 : index
    %c4_78 = arith.constant 4 : index
    %c0_79 = arith.constant 0 : index
    %33 = vector.load %arg4[%c2_77, %c4_78, %c0_79] : memref<20x20x3xf32, #tpu.memory_space<vmem>>, vector<16x16x3xf32>
    %c0_80 = arith.constant 0 : index
    %c0_81 = arith.constant 0 : index
    %c42 = arith.constant 42 : index
    %34 = vector.load %arg5[%c0_80, %c0_81, %c42] : memref<16x16x75xf32, #tpu.memory_space<vmem>>, vector<16x16x3xf32>
    tpu.vector_store %arg5[%c0_80, %c0_81, %c42], %33 {strides = array<i32>} : memref<16x16x75xf32, #tpu.memory_space<vmem>>, vector<16x16x3xf32>,
    %c3_82 = arith.constant 3 : index
    %c0_83 = arith.constant 0 : index
    %c0_84 = arith.constant 0 : index
    %35 = vector.load %arg4[%c3_82, %c0_83, %c0_84] : memref<20x20x3xf32, #tpu.memory_space<vmem>>, vector<16x16x3xf32>
    %c0_85 = arith.constant 0 : index
    %c0_86 = arith.constant 0 : index
    %c45 = arith.constant 45 : index
    %36 = vector.load %arg5[%c0_85, %c0_86, %c45] : memref<16x16x75xf32, #tpu.memory_space<vmem>>, vector<16x16x3xf32>
    tpu.vector_store %arg5[%c0_85, %c0_86, %c45], %35 {strides = array<i32>} : memref<16x16x75xf32, #tpu.memory_space<vmem>>, vector<16x16x3xf32>,
    %c3_87 = arith.constant 3 : index
    %c1_88 = arith.constant 1 : index
    %c0_89 = arith.constant 0 : index
    %37 = vector.load %arg4[%c3_87, %c1_88, %c0_89] : memref<20x20x3xf32, #tpu.memory_space<vmem>>, vector<16x16x3xf32>
    %c0_90 = arith.constant 0 : index
    %c0_91 = arith.constant 0 : index
    %c48 = arith.constant 48 : index
    %38 = vector.load %arg5[%c0_90, %c0_91, %c48] : memref<16x16x75xf32, #tpu.memory_space<vmem>>, vector<16x16x3xf32>
    tpu.vector_store %arg5[%c0_90, %c0_91, %c48], %37 {strides = array<i32>} : memref<16x16x75xf32, #tpu.memory_space<vmem>>, vector<16x16x3xf32>,
    %c3_92 = arith.constant 3 : index
    %c2_93 = arith.constant 2 : index
    %c0_94 = arith.constant 0 : index
    %39 = vector.load %arg4[%c3_92, %c2_93, %c0_94] : memref<20x20x3xf32, #tpu.memory_space<vmem>>, vector<16x16x3xf32>
    %c0_95 = arith.constant 0 : index
    %c0_96 = arith.constant 0 : index
    %c51 = arith.constant 51 : index
    %40 = vector.load %arg5[%c0_95, %c0_96, %c51] : memref<16x16x75xf32, #tpu.memory_space<vmem>>, vector<16x16x3xf32>
    tpu.vector_store %arg5[%c0_95, %c0_96, %c51], %39 {strides = array<i32>} : memref<16x16x75xf32, #tpu.memory_space<vmem>>, vector<16x16x3xf32>,
    %c3_97 = arith.constant 3 : index
    %c3_98 = arith.constant 3 : index
    %c0_99 = arith.constant 0 : index
    %41 = vector.load %arg4[%c3_97, %c3_98, %c0_99] : memref<20x20x3xf32, #tpu.memory_space<vmem>>, vector<16x16x3xf32>
    %c0_100 = arith.constant 0 : index
    %c0_101 = arith.constant 0 : index
    %c54 = arith.constant 54 : index
    %42 = vector.load %arg5[%c0_100, %c0_101, %c54] : memref<16x16x75xf32, #tpu.memory_space<vmem>>, vector<16x16x3xf32>
    tpu.vector_store %arg5[%c0_100, %c0_101, %c54], %41 {strides = array<i32>} : memref<16x16x75xf32, #tpu.memory_space<vmem>>, vector<16x16x3xf32>,
    %c3_102 = arith.constant 3 : index
    %c4_103 = arith.constant 4 : index
    %c0_104 = arith.constant 0 : index
    %43 = vector.load %arg4[%c3_102, %c4_103, %c0_104] : memref<20x20x3xf32, #tpu.memory_space<vmem>>, vector<16x16x3xf32>
    %c0_105 = arith.constant 0 : index
    %c0_106 = arith.constant 0 : index
    %c57 = arith.constant 57 : index
    %44 = vector.load %arg5[%c0_105, %c0_106, %c57] : memref<16x16x75xf32, #tpu.memory_space<vmem>>, vector<16x16x3xf32>
    tpu.vector_store %arg5[%c0_105, %c0_106, %c57], %43 {strides = array<i32>} : memref<16x16x75xf32, #tpu.memory_space<vmem>>, vector<16x16x3xf32>,
    %c4_107 = arith.constant 4 : index
    %c0_108 = arith.constant 0 : index
    %c0_109 = arith.constant 0 : index
    %45 = vector.load %arg4[%c4_107, %c0_108, %c0_109] : memref<20x20x3xf32, #tpu.memory_space<vmem>>, vector<16x16x3xf32>
    %c0_110 = arith.constant 0 : index
    %c0_111 = arith.constant 0 : index
    %c60 = arith.constant 60 : index
    %46 = vector.load %arg5[%c0_110, %c0_111, %c60] : memref<16x16x75xf32, #tpu.memory_space<vmem>>, vector<16x16x3xf32>
    tpu.vector_store %arg5[%c0_110, %c0_111, %c60], %45 {strides = array<i32>} : memref<16x16x75xf32, #tpu.memory_space<vmem>>, vector<16x16x3xf32>,
    %c4_112 = arith.constant 4 : index
    %c1_113 = arith.constant 1 : index
    %c0_114 = arith.constant 0 : index
    %47 = vector.load %arg4[%c4_112, %c1_113, %c0_114] : memref<20x20x3xf32, #tpu.memory_space<vmem>>, vector<16x16x3xf32>
    %c0_115 = arith.constant 0 : index
    %c0_116 = arith.constant 0 : index
    %c63 = arith.constant 63 : index
    %48 = vector.load %arg5[%c0_115, %c0_116, %c63] : memref<16x16x75xf32, #tpu.memory_space<vmem>>, vector<16x16x3xf32>
    tpu.vector_store %arg5[%c0_115, %c0_116, %c63], %47 {strides = array<i32>} : memref<16x16x75xf32, #tpu.memory_space<vmem>>, vector<16x16x3xf32>,
    %c4_117 = arith.constant 4 : index
    %c2_118 = arith.constant 2 : index
    %c0_119 = arith.constant 0 : index
    %49 = vector.load %arg4[%c4_117, %c2_118, %c0_119] : memref<20x20x3xf32, #tpu.memory_space<vmem>>, vector<16x16x3xf32>
    %c0_120 = arith.constant 0 : index
    %c0_121 = arith.constant 0 : index
    %c66 = arith.constant 66 : index
    %50 = vector.load %arg5[%c0_120, %c0_121, %c66] : memref<16x16x75xf32, #tpu.memory_space<vmem>>, vector<16x16x3xf32>
    tpu.vector_store %arg5[%c0_120, %c0_121, %c66], %49 {strides = array<i32>} : memref<16x16x75xf32, #tpu.memory_space<vmem>>, vector<16x16x3xf32>,
    %c4_122 = arith.constant 4 : index
    %c3_123 = arith.constant 3 : index
    %c0_124 = arith.constant 0 : index
    %51 = vector.load %arg4[%c4_122, %c3_123, %c0_124] : memref<20x20x3xf32, #tpu.memory_space<vmem>>, vector<16x16x3xf32>
    %c0_125 = arith.constant 0 : index
    %c0_126 = arith.constant 0 : index
    %c69 = arith.constant 69 : index
    %52 = vector.load %arg5[%c0_125, %c0_126, %c69] : memref<16x16x75xf32, #tpu.memory_space<vmem>>, vector<16x16x3xf32>
    tpu.vector_store %arg5[%c0_125, %c0_126, %c69], %51 {strides = array<i32>} : memref<16x16x75xf32, #tpu.memory_space<vmem>>, vector<16x16x3xf32>,
    %c4_127 = arith.constant 4 : index
    %c4_128 = arith.constant 4 : index
    %c0_129 = arith.constant 0 : index
    %53 = vector.load %arg4[%c4_127, %c4_128, %c0_129] : memref<20x20x3xf32, #tpu.memory_space<vmem>>, vector<16x16x3xf32>
    %c0_130 = arith.constant 0 : index
    %c0_131 = arith.constant 0 : index
    %c72 = arith.constant 72 : index
    %54 = vector.load %arg5[%c0_130, %c0_131, %c72] : memref<16x16x75xf32, #tpu.memory_space<vmem>>, vector<16x16x3xf32>
    tpu.vector_store %arg5[%c0_130, %c0_131, %c72], %53 {strides = array<i32>} : memref<16x16x75xf32, #tpu.memory_space<vmem>>, vector<16x16x3xf32>,
    %c0_132 = arith.constant 0 : index
    %c0_133 = arith.constant 0 : index
    %c0_134 = arith.constant 0 : index
    %55 = vector.load %arg5[%c0_132, %c0_133, %c0_134] : memref<16x16x75xf32, #tpu.memory_space<vmem>>, vector<16x16x75xf32>
    %56 = vector.shape_cast %55 : vector<16x16x75xf32> to vector<256x75xf32>
    %c0_135 = arith.constant 0 : index
    %c0_136 = arith.constant 0 : index
    %57 = vector.load %arg2[%c0_135, %c0_136] : memref<16x75xf32, #tpu.memory_space<vmem>>, vector<16x75xf32>
    %cst_137 = arith.constant dense<0.000000e+00> : vector<16x256xf32>
    %58 = tpu.matmul %57, %56, %cst_137 {dimension_numbers = #tpu.dot_dimension_numbers<[1], [1], [0], [0], [0, 0, 1, 0], [], []>} : vector<16x75xf32>, vector<256x75xf32>, vector<16x256xf32> -> vector<16x256xf32>
    %c0_138 = arith.constant 0 : index
    %c0_139 = arith.constant 0 : index
    %c0_140 = arith.constant 0 : index
    %59 = vector.load %arg3[%c0_138, %c0_139, %c0_140] : memref<1x16x256xf32, #tpu.memory_space<vmem>>, vector<1x16x256xf32>
    %60 = vector.shape_cast %59 : vector<1x16x256xf32> to vector<16x256xf32>
    %61 = vector.shape_cast %58 : vector<16x256xf32> to vector<1x16x256xf32>
    tpu.vector_store %arg3[%c0_138, %c0_139, %c0_140], %61 {strides = array<i32>} : memref<1x16x256xf32, #tpu.memory_space<vmem>>, vector<1x16x256xf32>,
    return
  }
  func.func @transform_0(%arg0: i32) -> (i32, i32, i32, i32) {
    %c0_i32 = arith.constant 0 : i32
    %c0_i32_0 = arith.constant 0 : i32
    %c0_i32_1 = arith.constant 0 : i32
    %c0_i32_2 = arith.constant 0 : i32
    return %arg0, %c0_i32, %c0_i32_0, %c0_i32_1 : i32, i32, i32, i32
  }
  func.func @transform_1(%arg0: i32) -> (i32, i32) {
    %c0_i32 = arith.constant 0 : i32
    %c0_i32_0 = arith.constant 0 : i32
    %c0_i32_1 = arith.constant 0 : i32
    return %c0_i32, %c0_i32_0 : i32, i32
  }
  func.func @transform_2(%arg0: i32) -> (i32, i32, i32) {
    %c0_i32 = arith.constant 0 : i32
    %c0_i32_0 = arith.constant 0 : i32
    %c0_i32_1 = arith.constant 0 : i32
    return %arg0, %c0_i32, %c0_i32_0 : i32, i32, i32
  }
}

</mosaic_0001>

<bundles_post_ra>
// kernel: tpu_custom_call.1
= control target key start
LH: loop header
LB: loop body
LE: loop exit
PB: predicated region body
PF: predicated region fallthrough
CT: control target
= control target key end

     0   :  { %7 = vsyncpa [#allocation5], 0  ;;  %s7717_s0 = inlined_call_operand.vmem [shape: f32[2,16,16,3], index: 0, kind: input, shape index: {}]   ;;  %s7718_s1 = inlined_call_operand.vmem [shape: f32[16,75], index: 1, kind: input, shape index: {}]   ;;  %s7719_s2 = inlined_call_operand.hbm [shape: f32[2,16,256], index: 2, kind: output, shape index: {}]  }
   0x1   :  { %9 = vsyncpa [#allocation5 + $0x1], 0  ;;  %s5549_s9 = smov 0   ;;  %s5551_s10 = smov 0  }
   0x2   :  { %s5553_s11 = smov 0   ;;  %s5555_s12 = smov 0  }
   0x3 LB: > { %s5570_s13 = sadd.s32 4294967295, %s5504_s12   ;;  %s5262_s14 = sadd.s32 4294967294, %s5504_s12   ;;  %s5504_s12 = sphi %s5555_s12, %s7725_s12   ;;  %s5500_s11 = sphi %s5553_s11, %s7724_s11   ;;  %s5496_s10 = sphi %s5551_s10, %s7723_s10   ;;  %s5492_s9 = sphi %s5549_s9, %s7722_s9  }
   0x4   : > { %s5574_s15 = sadd.s32 1, %s5504_s12   ;;  %s69_s16 = sadd.s32 1, %s5500_s11 }
   0x5   : > { %s66_s17 = ssub.s32 %s5504_s12, %s5574_s15  ;;  %p79_p0 = scmp.ne.s32.totalorder %s5500_s11, %s5496_s10 }
   0x6   : > { %p67_p1 = scmp.eq.s32.totalorder %s66_s17, 0  ;;  %p80_p2 = scmp.eq.s32.totalorder %s5570_s13, 1 }
   0x7   : > { %p85_p3 = scmp.ne.s32.totalorder %s5496_s10, %s5492_s9  ;;  %p86_p4 = scmp.eq.s32.totalorder %s5262_s14, 1 }
   0x8   : > { %s5585_s18 = scalar_select %p67_p1, %s5500_s11, %s69_s16  }
   0x9   : > { %p5587_p5 = por %p80_p2, %p79_p0  ;;  %p5591_p6 = por %p86_p4, %p85_p3 }
   0xa   : > { %p5265_p7 = scmp.ge.s32.totalorder %s5504_s12, 1  ;;  %p115_p8 = scmp.lt.s32.totalorder %s5504_s12, 3 }
   0xc   : > { %p116_p9 = pnand %p5265_p7, %p115_p8 }
   0xd   : > { %p137_p10 = scmp.lt.s32.totalorder (!%p116_p9), %s5570_s13, 1  ;;  %s5507_s26 = smov (!%p116_p9), 3  }
   0xe   : > { %119 = sbr.rel (%p116_p9) target bundleno = 1920 (0x780), region = 28  ;;  %s5508_s27 = smov (!%p116_p9), 6  }
   0xf   : > { %s5509_s28 = smov (!%p116_p9), 9   ;;  %s5510_s29 = smov (!%p116_p9), 12  }
  0x10   : > { %s5511_s30 = smov (!%p116_p9), 15   ;;  %s5512_s3 = smov (!%p116_p9), 18  }
  0x11   : > { %s5513_s4 = smov (!%p116_p9), 21   ;;  %s5514_s5 = smov (!%p116_p9), 24  }
  0x12   : > { %s5515_s6 = smov (!%p116_p9), 27   ;;  %s5516_s7 = smov (!%p116_p9), 30  }
  0x13   : > { %vm142_vm0 = vcmask 23552   ;;  %vm145_vm1 = vcmask 19456   ;;  %v5506_v0 = vmov 0.0   ;;  %s138_s21 = scalar_select %p137_p10, %s5570_s13, 1  ;;  %vm493_vm2 = vcmask 48152  }
  0x14   : > { %143 = vst.msk [vmem:[#allocation2] sm:$0xff] %vm142_vm0, %v5506_v0  ;;  %144 = vst.msk [vmem:[#allocation2 + $0x8] sm:$0xff] %vm142_vm0, %v5506_v0  ;;  %vm686_vm3 = vcmask 72752   ;;  %vm879_vm4 = vcmask 97352   ;;  %vm1072_vm5 = vcmask 121952   ;;  %vm1266_vm6 = vcmask 146552  }
  0x15   : > { %147 = vst.msk [vmem:[#allocation2 + $0x18] sm:$0xff] %vm142_vm0, %v5506_v0  ;;  %148 = vst.msk [vmem:[#allocation2 + $0x20] sm:$0xff] %vm142_vm0, %v5506_v0  ;;  %s5308_s22 = sshll.u32 %s138_s21, 8  ;;  %vm1459_vm7 = vcmask 171152   ;;  %vm1652_vm8 = vcmask 195752   ;;  %vm1845_vm9 = vcmask 220352  }
  0x16   : > { %150 = vst.msk [vmem:[#allocation2 + $0x30] sm:$0xff] %vm142_vm0, %v5506_v0  ;;  %151 = vst.msk [vmem:[#allocation2 + $0x38] sm:$0xff] %vm142_vm0, %v5506_v0  ;;  %s5664_s25 = scalar_lea.vmem %s7717_s0, %s5308_s22  ;;  %vm2038_vm10 = vcmask 244952   ;;  %s5517_s8 = smov 33   ;;  %vm2231_vm11 = vcmask 269552   ;;  %vm2424_vm12 = vcmask 294152  }
  0x17   : > { %153 = vst.msk [vmem:[#allocation2 + $0x48] sm:$0xff] %vm142_vm0, %v5506_v0  ;;  %154 = vst.msk [vmem:[#allocation2 + $0x50] sm:$0xff] %vm142_vm0, %v5506_v0  ;;  %v204_v1 = vld [vmem:[%s5664_s25] sm:$0xff]  ;;  %v205_v2 = vld [vmem:[%s5664_s25 + $0x8] sm:$0xff]  ;;  %s5518_s14 = smov 36   ;;  %s5519_s16 = smov 39  }
  0x18   : > { %156 = vst.msk [vmem:[#allocation2 + $0x60] sm:$0xff] %vm142_vm0, %v5506_v0  ;;  %157 = vst.msk [vmem:[#allocation2 + $0x68] sm:$0xff] %vm142_vm0, %v5506_v0  ;;  %v206_v3 = vld [vmem:[%s5664_s25 + $0x10] sm:$0xff]  ;;  %v207_v4 = vld [vmem:[%s5664_s25 + $0x18] sm:$0xff]  ;;  %vm2617_vm13 = vcmask 318752   ;;  %s5520_s17 = smov 42  }
  0x19   : > { %159 = vst.msk [vmem:[#allocation2 + $0x78] sm:$0xff] %vm142_vm0, %v5506_v0  ;;  %160 = vst.msk [vmem:[#allocation2 + $0x80] sm:$0xff] %vm142_vm0, %v5506_v0  ;;  %v208_v5 = vld [vmem:[%s5664_s25 + $0x20] sm:$0xff]  ;;  %v209_v6 = vld [vmem:[%s5664_s25 + $0x28] sm:$0xff]  ;;  %vm2810_vm14 = vcmask 343352   ;;  %s5521_s21 = smov 45  }
  0x1a   : > { %162 = vst.msk [vmem:[#allocation2 + $0x90] sm:$0xff] %vm142_vm0, %v5506_v0  ;;  %163 = vst.msk [vmem:[#allocation2 + $0x98] sm:$0xff] %vm142_vm0, %v5506_v0  ;;  %v210_v11 = vld [vmem:[%s5664_s25 + $0x30] sm:$0xff]  ;;  %v211_v12 = vld [vmem:[%s5664_s25 + $0x38] sm:$0xff]  ;;  %vm3003_vm15 = vcmask 367952   ;;  %s5522_s22 = smov 48  }
  0x1b   : > { %165 = vst.msk [vmem:[#allocation2 + $0xa8] sm:$0xff] %vm142_vm0, %v5506_v0  ;;  %166 = vst.msk [vmem:[#allocation2 + $0xb0] sm:$0xff] %vm142_vm0, %v5506_v0  ;;  %v333_v7 = vld [vmem:[#allocation2 + $0x1] sm:$0xff]  ;;  %v214_v15 = vld [vmem:[%s5664_s25 + $0x50] sm:$0xff]  ;;  %s5523_s23 = smov 51   ;;  %s5524_s24 = smov 54  }
  0x1c   : > { %168 = vst.msk [vmem:[#allocation2 + $0xc0] sm:$0xff] %vm142_vm0, %v5506_v0  ;;  %169 = vst.msk [vmem:[#allocation2 + $0xc8] sm:$0xff] %vm142_vm0, %v5506_v0  ;;  %v335_v8 = vld [vmem:[#allocation2 + $0x19] sm:$0xff]  ;;  %397 = vrot.lane.b32.xlu0 %v333_v7, %s5507_s26  ;;  %v213_v14 = vld [vmem:[%s5664_s25 + $0x48] sm:$0xff] }
  0x1d   : > { %171 = vst.msk [vmem:[#allocation2 + $0xd8] sm:$0xff] %vm142_vm0, %v5506_v0  ;;  %172 = vst.msk [vmem:[#allocation2 + $0xe0] sm:$0xff] %vm142_vm0, %v5506_v0  ;;  %401 = vrot.lane.b32.xlu1 %v335_v8, %s5507_s26  ;;  %v212_v13 = vld [vmem:[%s5664_s25 + $0x40] sm:$0xff]  ;;  %v215_v16 = vld [vmem:[%s5664_s25 + $0x58] sm:$0xff] }
  0x1e   : > { %174 = vst.msk [vmem:[#allocation2 + $0xf0] sm:$0xff] %vm142_vm0, %v5506_v0  ;;  %175 = vst.msk [vmem:[#allocation2 + $0xf8] sm:$0xff] %vm142_vm0, %v5506_v0  ;;  %v216_v17 = vld [vmem:[%s5664_s25 + $0x60] sm:$0xff]  ;;  %v217_v18 = vld [vmem:[%s5664_s25 + $0x68] sm:$0xff] }
  0x1f   : > { %177 = vst.msk [vmem:[#allocation2 + $0x108] sm:$0xff] %vm142_vm0, %v5506_v0  ;;  %178 = vst.msk [vmem:[#allocation2 + $0x110] sm:$0xff] %vm142_vm0, %v5506_v0  ;;  %v218_v19 = vld [vmem:[%s5664_s25 + $0x70] sm:$0xff]  ;;  %v219_v20 = vld [vmem:[%s5664_s25 + $0x78] sm:$0xff] }
  0x20   : > { %180 = vst.msk [vmem:[#allocation2 + $0x120] sm:$0xff] %vm142_vm0, %v5506_v0  ;;  %181 = vst.msk [vmem:[#allocation2 + $0x128] sm:$0xff] %vm142_vm0, %v5506_v0  ;;  %v220_v21 = vld [vmem:[%s5664_s25 + $0x80] sm:$0xff]  ;;  %v221_v22 = vld [vmem:[%s5664_s25 + $0x88] sm:$0xff] }
  0x21   : > { %183 = vst.msk [vmem:[#allocation2 + $0x138] sm:$0xff] %vm142_vm0, %v5506_v0  ;;  %184 = vst.msk [vmem:[#allocation2 + $0x140] sm:$0xff] %vm142_vm0, %v5506_v0  ;;  %v222_v23 = vld [vmem:[%s5664_s25 + $0x90] sm:$0xff]  ;;  %v223_v26 = vld [vmem:[%s5664_s25 + $0x98] sm:$0xff] }
  0x22   : > { %186 = vst.msk [vmem:[#allocation2 + $0x150] sm:$0xff] %vm142_vm0, %v5506_v0  ;;  %187 = vst.msk [vmem:[#allocation2 + $0x158] sm:$0xff] %vm142_vm0, %v5506_v0  ;;  %v224_v27 = vld [vmem:[%s5664_s25 + $0xa0] sm:$0xff]  ;;  %v225_v28 = vld [vmem:[%s5664_s25 + $0xa8] sm:$0xff] }
  0x23   : > { %189 = vst.msk [vmem:[#allocation2 + $0x168] sm:$0xff] %vm142_vm0, %v5506_v0  ;;  %190 = vst.msk [vmem:[#allocation2 + $0x170] sm:$0xff] %vm142_vm0, %v5506_v0  ;;  %v226_v29 = vld [vmem:[%s5664_s25 + $0xb0] sm:$0xff]  ;;  %v227_v34 = vld [vmem:[%s5664_s25 + $0xb8] sm:$0xff] }
  0x24   : > { %192 = vst.msk [vmem:[#allocation2 + $0x180] sm:$0xff] %vm142_vm0, %v5506_v0  ;;  %193 = vst.msk [vmem:[#allocation2 + $0x188] sm:$0xff] %vm142_vm0, %v5506_v0  ;;  %v228_v35 = vld [vmem:[%s5664_s25 + $0xc0] sm:$0xff]  ;;  %v229_v36 = vld [vmem:[%s5664_s25 + $0xc8] sm:$0xff] }
  0x25   : > { %195 = vst.msk [vmem:[#allocation2 + $0x198] sm:$0xff] %vm142_vm0, %v5506_v0  ;;  %196 = vst.msk [vmem:[#allocation2 + $0x1a0] sm:$0xff] %vm142_vm0, %v5506_v0  ;;  %v230_v37 = vld [vmem:[%s5664_s25 + $0xd0] sm:$0xff]  ;;  %v231_v38 = vld [vmem:[%s5664_s25 + $0xd8] sm:$0xff] }
  0x26   : > { %198 = vst.msk [vmem:[#allocation2 + $0x1b0] sm:$0xff] %vm142_vm0, %v5506_v0  ;;  %199 = vst.msk [vmem:[#allocation2 + $0x1b8] sm:$0xff] %vm142_vm0, %v5506_v0  ;;  %v269_v45 = vld [vmem:[#allocation2] sm:$0xff]  ;;  %v5737_v46 = vld [vmem:[#allocation2 + $0x18] sm:$0xff] }
  0x27   : > { %201 = vst.msk [vmem:[#allocation2 + $0x1c8] sm:$0xff] %vm142_vm0, %v5506_v0  ;;  %202 = vst.msk [vmem:[#allocation2 + $0x1d0] sm:$0xff] %vm142_vm0, %v5506_v0  ;;  %v270_v47 = vld [vmem:[#allocation2 + $0x8] sm:$0xff]  ;;  %v5741_v48 = vld [vmem:[#allocation2 + $0x20] sm:$0xff] }
  0x28   : > { %146 = vst.msk [vmem:[#allocation2 + $0x10] sm:$0xf] %vm145_vm1, %v5506_v0  ;;  %149 = vst.msk [vmem:[#allocation2 + $0x28] sm:$0xf] %vm145_vm1, %v5506_v0 }
  0x29   : > { %152 = vst.msk [vmem:[#allocation2 + $0x40] sm:$0xf] %vm145_vm1, %v5506_v0  ;;  %155 = vst.msk [vmem:[#allocation2 + $0x58] sm:$0xf] %vm145_vm1, %v5506_v0 }
  0x2a   : > { %158 = vst.msk [vmem:[#allocation2 + $0x70] sm:$0xf] %vm145_vm1, %v5506_v0  ;;  %161 = vst.msk [vmem:[#allocation2 + $0x88] sm:$0xf] %vm145_vm1, %v5506_v0 }
  0x2b   : > { %164 = vst.msk [vmem:[#allocation2 + $0xa0] sm:$0xf] %vm145_vm1, %v5506_v0  ;;  %167 = vst.msk [vmem:[#allocation2 + $0xb8] sm:$0xf] %vm145_vm1, %v5506_v0 }
  0x2c   : > { %170 = vst.msk [vmem:[#allocation2 + $0xd0] sm:$0xf] %vm145_vm1, %v5506_v0  ;;  %173 = vst.msk [vmem:[#allocation2 + $0xe8] sm:$0xf] %vm145_vm1, %v5506_v0 }
  0x2d   : > { %176 = vst.msk [vmem:[#allocation2 + $0x100] sm:$0xf] %vm145_vm1, %v5506_v0  ;;  %179 = vst.msk [vmem:[#allocation2 + $0x118] sm:$0xf] %vm145_vm1, %v5506_v0 }
  0x2e   : > { %182 = vst.msk [vmem:[#allocation2 + $0x130] sm:$0xf] %vm145_vm1, %v5506_v0  ;;  %185 = vst.msk [vmem:[#allocation2 + $0x148] sm:$0xf] %vm145_vm1, %v5506_v0 }
  0x2f   : > { %188 = vst.msk [vmem:[#allocation2 + $0x160] sm:$0xf] %vm145_vm1, %v5506_v0  ;;  %191 = vst.msk [vmem:[#allocation2 + $0x178] sm:$0xf] %vm145_vm1, %v5506_v0  ;;  %v334_v9 = vld [vmem:[#allocation2 + $0x9] sm:$0xff]  ;;  %v336_v10 = vld [vmem:[#allocation2 + $0x21] sm:$0xff] }
  0x30   : > { %194 = vst.msk [vmem:[#allocation2 + $0x190] sm:$0xf] %vm145_vm1, %v5506_v0  ;;  %197 = vst.msk [vmem:[#allocation2 + $0x1a8] sm:$0xf] %vm145_vm1, %v5506_v0  ;;  %399 = vrot.lane.b32.xlu0 %v334_v9, %s5507_s26  ;;  %403 = vrot.lane.b32.xlu1 %v336_v10, %s5507_s26 }
  0x31   : > { %200 = vst.msk [vmem:[#allocation2 + $0x1c0] sm:$0xf] %vm145_vm1, %v5506_v0  ;;  %203 = vst.msk [vmem:[#allocation2 + $0x1d8] sm:$0xf] %vm145_vm1, %v5506_v0  ;;  %vm3390_vm1 = vcmask 417152  }
  0x32   : > { %237 = vst.msk [vmem:[#allocation2 + $0x32] sm:$0xff] %vm142_vm0, %v204_v1  ;;  %238 = vst.msk [vmem:[#allocation2 + $0x3a] sm:$0xff] %vm142_vm0, %v205_v2 }
  0x33   : > { %239 = vst.msk [vmem:[#allocation2 + $0x4a] sm:$0xff] %vm142_vm0, %v206_v3  ;;  %240 = vst.msk [vmem:[#allocation2 + $0x52] sm:$0xff] %vm142_vm0, %v207_v4 }
  0x34   : > { %241 = vst.msk [vmem:[#allocation2 + $0x62] sm:$0xff] %vm142_vm0, %v208_v5  ;;  %242 = vst.msk [vmem:[#allocation2 + $0x6a] sm:$0xff] %vm142_vm0, %v209_v6 }
  0x35   : > { %243 = vst.msk [vmem:[#allocation2 + $0x7a] sm:$0xff] %vm142_vm0, %v210_v11  ;;  %244 = vst.msk [vmem:[#allocation2 + $0x82] sm:$0xff] %vm142_vm0, %v211_v12 }
  0x36   : > { %245 = vst.msk [vmem:[#allocation2 + $0x92] sm:$0xff] %vm142_vm0, %v212_v13  ;;  %246 = vst.msk [vmem:[#allocation2 + $0x9a] sm:$0xff] %vm142_vm0, %v213_v14 }
  0x37   : > { %247 = vst.msk [vmem:[#allocation2 + $0xaa] sm:$0xff] %vm142_vm0, %v214_v15  ;;  %248 = vst.msk [vmem:[#allocation2 + $0xb2] sm:$0xff] %vm142_vm0, %v215_v16 }
  0x38   : > { %249 = vst.msk [vmem:[#allocation2 + $0xc2] sm:$0xff] %vm142_vm0, %v216_v17  ;;  %250 = vst.msk [vmem:[#allocation2 + $0xca] sm:$0xff] %vm142_vm0, %v217_v18 }
  0x39   : > { %251 = vst.msk [vmem:[#allocation2 + $0xda] sm:$0xff] %vm142_vm0, %v218_v19  ;;  %252 = vst.msk [vmem:[#allocation2 + $0xe2] sm:$0xff] %vm142_vm0, %v219_v20  ;;  %v337_v24 = vld [vmem:[#allocation2 + $0x31] sm:$0xff]  ;;  %v338_v25 = vld [vmem:[#allocation2 + $0x39] sm:$0xff] }
  0x3a   : > { %253 = vst.msk [vmem:[#allocation2 + $0xf2] sm:$0xff] %vm142_vm0, %v220_v21  ;;  %254 = vst.msk [vmem:[#allocation2 + $0xfa] sm:$0xff] %vm142_vm0, %v221_v22  ;;  %405 = vrot.lane.b32.xlu0 %v337_v24, %s5507_s26  ;;  %407 = vrot.lane.b32.xlu1 %v338_v25, %s5507_s26  ;;  %v339_v30 = vld [vmem:[#allocation2 + $0x49] sm:$0xff]  ;;  %v340_v31 = vld [vmem:[#allocation2 + $0x51] sm:$0xff] }
  0x3b   : > { %255 = vst.msk [vmem:[#allocation2 + $0x10a] sm:$0xff] %vm142_vm0, %v222_v23  ;;  %256 = vst.msk [vmem:[#allocation2 + $0x112] sm:$0xff] %vm142_vm0, %v223_v26  ;;  %v341_v32 = vld [vmem:[#allocation2 + $0x61] sm:$0xff]  ;;  %v342_v33 = vld [vmem:[#allocation2 + $0x69] sm:$0xff] }
  0x3c   : > { %257 = vst.msk [vmem:[#allocation2 + $0x122] sm:$0xff] %vm142_vm0, %v224_v27  ;;  %258 = vst.msk [vmem:[#allocation2 + $0x12a] sm:$0xff] %vm142_vm0, %v225_v28  ;;  %v343_v39 = vld [vmem:[#allocation2 + $0x79] sm:$0xff]  ;;  %v344_v40 = vld [vmem:[#allocation2 + $0x81] sm:$0xff] }
  0x3d   : > { %259 = vst.msk [vmem:[#allocation2 + $0x13a] sm:$0xff] %vm142_vm0, %v226_v29  ;;  %260 = vst.msk [vmem:[#allocation2 + $0x142] sm:$0xff] %vm142_vm0, %v227_v34  ;;  %v345_v41 = vld [vmem:[#allocation2 + $0x91] sm:$0xff]  ;;  %v346_v42 = vld [vmem:[#allocation2 + $0x99] sm:$0xff] }
  0x3e   : > { %409 = vrot.lane.b32.xlu0 %v339_v30, %s5507_s26  ;;  %411 = vrot.lane.b32.xlu1 %v340_v31, %s5507_s26  ;;  %261 = vst.msk [vmem:[#allocation2 + $0x152] sm:$0xff] %vm142_vm0, %v228_v35  ;;  %262 = vst.msk [vmem:[#allocation2 + $0x15a] sm:$0xff] %vm142_vm0, %v229_v36  ;;  %v347_v43 = vld [vmem:[#allocation2 + $0xa9] sm:$0xff]  ;;  %v348_v44 = vld [vmem:[#allocation2 + $0xb1] sm:$0xff] }
  0x3f   : > { %263 = vst.msk [vmem:[#allocation2 + $0x16a] sm:$0xff] %vm142_vm0, %v230_v37  ;;  %264 = vst.msk [vmem:[#allocation2 + $0x172] sm:$0xff] %vm142_vm0, %v231_v38  ;;  %v5748_v49 = vld [vmem:[#allocation2 + $0x30] sm:$0xff]  ;;  %v5750_v50 = vld [vmem:[#allocation2 + $0x38] sm:$0xff] }
  0x40   : > { %301 = vst.msk [vmem:[#allocation3] sm:$0xff] %vm142_vm0, %v269_v45  ;;  %303 = vst.msk [vmem:[#allocation3 + $0x10] sm:$0xff] %vm142_vm0, %v5737_v46  ;;  %v349_v51 = vld [vmem:[#allocation2 + $0xc1] sm:$0xff]  ;;  %v350_v52 = vld [vmem:[#allocation2 + $0xc9] sm:$0xff] }
  0x41   : > { %302 = vst.msk [vmem:[#allocation3 + $0x8] sm:$0xff] %vm142_vm0, %v270_v47  ;;  %304 = vst.msk [vmem:[#allocation3 + $0x18] sm:$0xff] %vm142_vm0, %v5741_v48  ;;  %v5756_v53 = vld [vmem:[#allocation2 + $0x48] sm:$0xff]  ;;  %v5760_v54 = vld [vmem:[#allocation2 + $0x50] sm:$0xff] }
  0x42   : > { %413 = vrot.lane.b32.xlu0 %v341_v32, %s5507_s26  ;;  %415 = vrot.lane.b32.xlu1 %v342_v33, %s5507_s26  ;;  %305 = vst.msk [vmem:[#allocation3 + $0x20] sm:$0xff] %vm142_vm0, %v5748_v49  ;;  %306 = vst.msk [vmem:[#allocation3 + $0x28] sm:$0xff] %vm142_vm0, %v5750_v50  ;;  %v5764_v55 = vld [vmem:[#allocation2 + $0x60] sm:$0xff]  ;;  %v5766_v56 = vld [vmem:[#allocation2 + $0x68] sm:$0xff] }
  0x43   : > { %307 = vst.msk [vmem:[#allocation3 + $0x30] sm:$0xff] %vm142_vm0, %v5756_v53  ;;  %308 = vst.msk [vmem:[#allocation3 + $0x38] sm:$0xff] %vm142_vm0, %v5760_v54  ;;  %v5774_v57 = vld [vmem:[#allocation2 + $0x78] sm:$0xff]  ;;  %v5776_v58 = vld [vmem:[#allocation2 + $0x80] sm:$0xff] }
  0x44   : > { %309 = vst.msk [vmem:[#allocation3 + $0x40] sm:$0xff] %vm142_vm0, %v5764_v55  ;;  %310 = vst.msk [vmem:[#allocation3 + $0x48] sm:$0xff] %vm142_vm0, %v5766_v56  ;;  %v351_v59 = vld [vmem:[#allocation2 + $0xd9] sm:$0xff]  ;;  %v352_v60 = vld [vmem:[#allocation2 + $0xe1] sm:$0xff] }
  0x45   : > { %311 = vst.msk [vmem:[#allocation3 + $0x50] sm:$0xff] %vm142_vm0, %v5774_v57  ;;  %312 = vst.msk [vmem:[#allocation3 + $0x58] sm:$0xff] %vm142_vm0, %v5776_v58  ;;  %v5782_v61 = vld [vmem:[#allocation2 + $0x90] sm:$0xff]  ;;  %v5786_v62 = vld [vmem:[#allocation2 + $0x98] sm:$0xff] }
  0x46   : > { %417 = vrot.lane.b32.xlu0 %v343_v39, %s5507_s26  ;;  %419 = vrot.lane.b32.xlu1 %v344_v40, %s5507_s26  ;;  %313 = vst.msk [vmem:[#allocation3 + $0x60] sm:$0xff] %vm142_vm0, %v5782_v61  ;;  %314 = vst.msk [vmem:[#allocation3 + $0x68] sm:$0xff] %vm142_vm0, %v5786_v62  ;;  %v5790_v63 = vld [vmem:[#allocation2 + $0xa8] sm:$0xff]  ;;  %v5792_v0 = vld [vmem:[#allocation2 + $0xb0] sm:$0xff] }
  0x47   : > { %315 = vst.msk [vmem:[#allocation3 + $0x70] sm:$0xff] %vm142_vm0, %v5790_v63  ;;  %316 = vst.msk [vmem:[#allocation3 + $0x78] sm:$0xff] %vm142_vm0, %v5792_v0  ;;  %v5800_v1 = vld [vmem:[#allocation2 + $0xc0] sm:$0xff]  ;;  %v5802_v2 = vld [vmem:[#allocation2 + $0xc8] sm:$0xff] }
  0x48   : > { %v353_v3 = vld [vmem:[#allocation2 + $0xf1] sm:$0xff]  ;;  %v354_v4 = vld [vmem:[#allocation2 + $0xf9] sm:$0xff]  ;;  %317 = vst.msk [vmem:[#allocation3 + $0x80] sm:$0xff] %vm142_vm0, %v5800_v1  ;;  %318 = vst.msk [vmem:[#allocation3 + $0x88] sm:$0xff] %vm142_vm0, %v5802_v2 }
  0x49   : > { %v5808_v5 = vld [vmem:[#allocation2 + $0xd8] sm:$0xff]  ;;  %v5812_v6 = vld [vmem:[#allocation2 + $0xe0] sm:$0xff]  ;;  %v5816_v7 = vld [vmem:[#allocation2 + $0xf0] sm:$0xff] }
  0x4a   : > { %421 = vrot.lane.b32.xlu0 %v345_v41, %s5507_s26  ;;  %423 = vrot.lane.b32.xlu1 %v346_v42, %s5507_s26  ;;  %319 = vst.msk [vmem:[#allocation3 + $0x90] sm:$0xff] %vm142_vm0, %v5808_v5  ;;  %320 = vst.msk [vmem:[#allocation3 + $0x98] sm:$0xff] %vm142_vm0, %v5812_v6  ;;  %v5818_v8 = vld [vmem:[#allocation2 + $0xf8] sm:$0xff]  ;;  %v5826_v9 = vld [vmem:[#allocation2 + $0x108] sm:$0xff] }
  0x4b   : > { %321 = vst.msk [vmem:[#allocation3 + $0xa0] sm:$0xff] %vm142_vm0, %v5816_v7  ;;  %322 = vst.msk [vmem:[#allocation3 + $0xa8] sm:$0xff] %vm142_vm0, %v5818_v8  ;;  %v5828_v10 = vld [vmem:[#allocation2 + $0x110] sm:$0xff]  ;;  %v5834_v13 = vld [vmem:[#allocation2 + $0x120] sm:$0xff] }
  0x4c   : > { %v355_v11 = vld [vmem:[#allocation2 + $0x109] sm:$0xff]  ;;  %v356_v12 = vld [vmem:[#allocation2 + $0x111] sm:$0xff]  ;;  %323 = vst.msk [vmem:[#allocation3 + $0xb0] sm:$0xff] %vm142_vm0, %v5826_v9  ;;  %324 = vst.msk [vmem:[#allocation3 + $0xb8] sm:$0xff] %vm142_vm0, %v5828_v10 }
  0x4d   : > { %325 = vst.msk [vmem:[#allocation3 + $0xc0] sm:$0xff] %vm142_vm0, %v5834_v13  ;;  %v5838_v14 = vld [vmem:[#allocation2 + $0x128] sm:$0xff]  ;;  %v5842_v15 = vld [vmem:[#allocation2 + $0x138] sm:$0xff]  ;;  %v5844_v16 = vld [vmem:[#allocation2 + $0x140] sm:$0xff] }
  0x4e   : > { %425 = vrot.lane.b32.xlu0 %v347_v43, %s5507_s26  ;;  %427 = vrot.lane.b32.xlu1 %v348_v44, %s5507_s26  ;;  %326 = vst.msk [vmem:[#allocation3 + $0xc8] sm:$0xff] %vm142_vm0, %v5838_v14  ;;  %327 = vst.msk [vmem:[#allocation3 + $0xd0] sm:$0xff] %vm142_vm0, %v5842_v15  ;;  %v5852_v17 = vld [vmem:[#allocation2 + $0x150] sm:$0xff]  ;;  %v5854_v18 = vld [vmem:[#allocation2 + $0x158] sm:$0xff] }
  0x4f   : > { %328 = vst.msk [vmem:[#allocation3 + $0xd8] sm:$0xff] %vm142_vm0, %v5844_v16  ;;  %v357_v19 = vld [vmem:[#allocation2 + $0x121] sm:$0xff]  ;;  %v358_v20 = vld [vmem:[#allocation2 + $0x129] sm:$0xff]  ;;  %329 = vst.msk [vmem:[#allocation3 + $0xe0] sm:$0xff] %vm142_vm0, %v5852_v17 }
  0x50   : > { %330 = vst.msk [vmem:[#allocation3 + $0xe8] sm:$0xff] %vm142_vm0, %v5854_v18  ;;  %v5860_v21 = vld [vmem:[#allocation2 + $0x168] sm:$0xff]  ;;  %v5864_v22 = vld [vmem:[#allocation2 + $0x170] sm:$0xff]  ;;  %v359_v23 = vld [vmem:[#allocation2 + $0x139] sm:$0xff] }
  0x51   : > { %331 = vst.msk [vmem:[#allocation3 + $0xf0] sm:$0xff] %vm142_vm0, %v5860_v21  ;;  %332 = vst.msk [vmem:[#allocation3 + $0xf8] sm:$0xff] %vm142_vm0, %v5864_v22  ;;  %v360_v24 = vld [vmem:[#allocation2 + $0x141] sm:$0xff]  ;;  %v361_v25 = vld [vmem:[#allocation2 + $0x151] sm:$0xff] }
  0x52   : > { %429 = vrot.lane.b32.xlu0 %v349_v51, %s5507_s26  ;;  %431 = vrot.lane.b32.xlu1 %v350_v52, %s5507_s26  ;;  %v362_v26 = vld [vmem:[#allocation2 + $0x159] sm:$0xff]  ;;  %v363_v27 = vld [vmem:[#allocation2 + $0x169] sm:$0xff]  ;;  %v364_v28 = vld [vmem:[#allocation2 + $0x171] sm:$0xff] }
  0x53   : > { %v526_v29 = vld [vmem:[#allocation2 + $0x2] sm:$0xff]  ;;  %v527_v30 = vld [vmem:[#allocation2 + $0xa] sm:$0xff]  ;;  %v528_v31 = vld [vmem:[#allocation2 + $0x1a] sm:$0xff] }
  0x54   : > { %v529_v32 = vld [vmem:[#allocation2 + $0x22] sm:$0xff]  ;;  %v530_v33 = vld [vmem:[#allocation2 + $0x32] sm:$0xff]  ;;  %v531_v34 = vld [vmem:[#allocation2 + $0x3a] sm:$0xff] }
  0x55   : > { %v532_v35 = vld [vmem:[#allocation2 + $0x4a] sm:$0xff]  ;;  %v533_v36 = vld [vmem:[#allocation2 + $0x52] sm:$0xff]  ;;  %v534_v37 = vld [vmem:[#allocation2 + $0x62] sm:$0xff] }
  0x56   : > { %433 = vrot.lane.b32.xlu0 %v351_v59, %s5507_s26  ;;  %435 = vrot.lane.b32.xlu1 %v352_v60, %s5507_s26  ;;  %v535_v38 = vld [vmem:[#allocation2 + $0x6a] sm:$0xff]  ;;  %v536_v39 = vld [vmem:[#allocation2 + $0x7a] sm:$0xff]  ;;  %v537_v40 = vld [vmem:[#allocation2 + $0x82] sm:$0xff] }
  0x57   : > { %v538_v41 = vld [vmem:[#allocation2 + $0x92] sm:$0xff]  ;;  %v539_v42 = vld [vmem:[#allocation2 + $0x9a] sm:$0xff]  ;;  %v540_v43 = vld [vmem:[#allocation2 + $0xaa] sm:$0xff] }
  0x58   : > { %v541_v44 = vld [vmem:[#allocation2 + $0xb2] sm:$0xff]  ;;  %v542_v45 = vld [vmem:[#allocation2 + $0xc2] sm:$0xff]  ;;  %v543_v47 = vld [vmem:[#allocation2 + $0xca] sm:$0xff] }
  0x59   : > { %v544_v51 = vld [vmem:[#allocation2 + $0xda] sm:$0xff]  ;;  %v545_v52 = vld [vmem:[#allocation2 + $0xe2] sm:$0xff]  ;;  %v546_v59 = vld [vmem:[#allocation2 + $0xf2] sm:$0xff] }
  0x5a   : > { %437 = vrot.lane.b32.xlu0 %v353_v3, %s5507_s26  ;;  %439 = vrot.lane.b32.xlu1 %v354_v4, %s5507_s26  ;;  %v547_v60 = vld [vmem:[#allocation2 + $0xfa] sm:$0xff]  ;;  %v548_v3 = vld [vmem:[#allocation2 + $0x10a] sm:$0xff]  ;;  %v549_v4 = vld [vmem:[#allocation2 + $0x112] sm:$0xff] }
  0x5e   : > { %441 = vrot.lane.b32.xlu0 %v355_v11, %s5507_s26  ;;  %443 = vrot.lane.b32.xlu1 %v356_v12, %s5507_s26  ;;  %v550_v11 = vld [vmem:[#allocation2 + $0x122] sm:$0xff]  ;;  %v551_v12 = vld [vmem:[#allocation2 + $0x12a] sm:$0xff] }
  0x62   : > { %445 = vrot.lane.b32.xlu0 %v357_v19, %s5507_s26  ;;  %447 = vrot.lane.b32.xlu1 %v358_v20, %s5507_s26  ;;  %v552_v19 = vld [vmem:[#allocation2 + $0x13a] sm:$0xff]  ;;  %v553_v20 = vld [vmem:[#allocation2 + $0x142] sm:$0xff] }
  0x66   : > { %449 = vrot.lane.b32.xlu0 %v359_v23, %s5507_s26  ;;  %451 = vrot.lane.b32.xlu1 %v360_v24, %s5507_s26 }
  0x6a   : > { %453 = vrot.lane.b32.xlu0 %v361_v25, %s5507_s26  ;;  %455 = vrot.lane.b32.xlu1 %v362_v26, %s5507_s26  ;;  %v554_v25 = vld [vmem:[#allocation2 + $0x152] sm:$0xff]  ;;  %v555_v26 = vld [vmem:[#allocation2 + $0x15a] sm:$0xff] }
  0x6e   : > { %457 = vrot.lane.b32.xlu0 %v363_v27, %s5507_s26  ;;  %459 = vrot.lane.b32.xlu1 %v364_v28, %s5507_s26  ;;  %s5526_s26 = smov 60  }
  0x72   : > { %590 = vrot.lane.b32.xlu0 %v526_v29, %s5508_s27  ;;  %592 = vrot.lane.b32.xlu1 %v527_v30, %s5508_s27  ;;  %v556_v29 = vld [vmem:[#allocation2 + $0x16a] sm:$0xff]  ;;  %v557_v30 = vld [vmem:[#allocation2 + $0x172] sm:$0xff] }
  0x76   : > { %594 = vrot.lane.b32.xlu0 %v528_v31, %s5508_s27  ;;  %596 = vrot.lane.b32.xlu1 %v529_v32, %s5508_s27 }
  0x7a   : > { %598 = vrot.lane.b32.xlu0 %v530_v33, %s5508_s27  ;;  %600 = vrot.lane.b32.xlu1 %v531_v34, %s5508_s27  ;;  %v719_v33 = vld [vmem:[#allocation2 + $0x3] sm:$0xff]  ;;  %v720_v34 = vld [vmem:[#allocation2 + $0xb] sm:$0xff] }
  0x7e   : > { %602 = vrot.lane.b32.xlu0 %v532_v35, %s5508_s27  ;;  %604 = vrot.lane.b32.xlu1 %v533_v36, %s5508_s27 }
  0x82   : > { %606 = vrot.lane.b32.xlu0 %v534_v37, %s5508_s27  ;;  %608 = vrot.lane.b32.xlu1 %v535_v38, %s5508_s27  ;;  %v721_v37 = vld [vmem:[#allocation2 + $0x1b] sm:$0xff]  ;;  %v722_v38 = vld [vmem:[#allocation2 + $0x23] sm:$0xff] }
  0x86   : > { %610 = vrot.lane.b32.xlu0 %v536_v39, %s5508_s27  ;;  %612 = vrot.lane.b32.xlu1 %v537_v40, %s5508_s27 }
  0x8a   : > { %614 = vrot.lane.b32.xlu0 %v538_v41, %s5508_s27  ;;  %616 = vrot.lane.b32.xlu1 %v539_v42, %s5508_s27  ;;  %v723_v41 = vld [vmem:[#allocation2 + $0x33] sm:$0xff]  ;;  %v724_v42 = vld [vmem:[#allocation2 + $0x3b] sm:$0xff] }
  0x8e   : > { %618 = vrot.lane.b32.xlu0 %v540_v43, %s5508_s27  ;;  %620 = vrot.lane.b32.xlu1 %v541_v44, %s5508_s27  ;;  %v398_v23 = vpop.permute.xlu0 %397 }
  0x8f   : > { %v402_v24 = vpop.permute.xlu1 %401  ;;  %494 = vst.msk [vmem:[#allocation3] sm:$0xff] %vm493_vm2, %v398_v23  ;;  %v731_v23 = vld [vmem:[#allocation2 + $0x93] sm:$0xff] }
  0x90   : > { %496 = vst.msk [vmem:[#allocation3 + $0x10] sm:$0xff] %vm493_vm2, %v402_v24  ;;  %v732_v24 = vld [vmem:[#allocation2 + $0x9b] sm:$0xff] }
  0x92   : > { %622 = vrot.lane.b32.xlu0 %v542_v45, %s5508_s27  ;;  %624 = vrot.lane.b32.xlu1 %v543_v47, %s5508_s27  ;;  %v725_v45 = vld [vmem:[#allocation2 + $0x4b] sm:$0xff]  ;;  %v726_v47 = vld [vmem:[#allocation2 + $0x53] sm:$0xff] }
  0x96   : > { %626 = vrot.lane.b32.xlu0 %v544_v51, %s5508_s27  ;;  %628 = vrot.lane.b32.xlu1 %v545_v52, %s5508_s27 }
  0x9a   : > { %630 = vrot.lane.b32.xlu0 %v546_v59, %s5508_s27  ;;  %632 = vrot.lane.b32.xlu1 %v547_v60, %s5508_s27  ;;  %v727_v59 = vld [vmem:[#allocation2 + $0x63] sm:$0xff]  ;;  %v728_v60 = vld [vmem:[#allocation2 + $0x6b] sm:$0xff] }
  0x9e   : > { %634 = vrot.lane.b32.xlu0 %v548_v3, %s5508_s27  ;;  %636 = vrot.lane.b32.xlu1 %v549_v4, %s5508_s27 }
  0xa2   : > { %638 = vrot.lane.b32.xlu0 %v550_v11, %s5508_s27  ;;  %640 = vrot.lane.b32.xlu1 %v551_v12, %s5508_s27  ;;  %v400_v27 = vpop.permute.xlu0 %399  ;;  %v404_v28 = vpop.permute.xlu1 %403  ;;  %v729_v11 = vld [vmem:[#allocation2 + $0x7b] sm:$0xff]  ;;  %v730_v12 = vld [vmem:[#allocation2 + $0x83] sm:$0xff] }
  0xa3   : > { %495 = vst.msk [vmem:[#allocation3 + $0x8] sm:$0xff] %vm493_vm2, %v400_v27  ;;  %497 = vst.msk [vmem:[#allocation3 + $0x18] sm:$0xff] %vm493_vm2, %v404_v28  ;;  %v733_v27 = vld [vmem:[#allocation2 + $0xab] sm:$0xff]  ;;  %v734_v28 = vld [vmem:[#allocation2 + $0xb3] sm:$0xff] }
  0xa6   : > { %642 = vrot.lane.b32.xlu0 %v552_v19, %s5508_s27  ;;  %644 = vrot.lane.b32.xlu1 %v553_v20, %s5508_s27 }
  0xaa   : > { %646 = vrot.lane.b32.xlu0 %v554_v25, %s5508_s27  ;;  %648 = vrot.lane.b32.xlu1 %v555_v26, %s5508_s27 }
  0xac   : > { %v406_v31 = vpop.permute.xlu0 %405  ;;  %v408_v32 = vpop.permute.xlu1 %407 }
  0xad   : > { %498 = vst.msk [vmem:[#allocation3 + $0x20] sm:$0xff] %vm493_vm2, %v406_v31  ;;  %499 = vst.msk [vmem:[#allocation3 + $0x28] sm:$0xff] %vm493_vm2, %v408_v32  ;;  %v735_v31 = vld [vmem:[#allocation2 + $0xc3] sm:$0xff]  ;;  %v736_v32 = vld [vmem:[#allocation2 + $0xcb] sm:$0xff] }
  0xae   : > { %650 = vrot.lane.b32.xlu0 %v556_v29, %s5508_s27  ;;  %652 = vrot.lane.b32.xlu1 %v557_v30, %s5508_s27  ;;  %s5527_s27 = smov 63  }
  0xb0   : > { %v410_v35 = vpop.permute.xlu0 %409  ;;  %v412_v36 = vpop.permute.xlu1 %411 }
  0xb1   : > { %500 = vst.msk [vmem:[#allocation3 + $0x30] sm:$0xff] %vm493_vm2, %v410_v35  ;;  %501 = vst.msk [vmem:[#allocation3 + $0x38] sm:$0xff] %vm493_vm2, %v412_v36  ;;  %v737_v35 = vld [vmem:[#allocation2 + $0xdb] sm:$0xff]  ;;  %v738_v36 = vld [vmem:[#allocation2 + $0xe3] sm:$0xff] }
  0xb2   : > { %783 = vrot.lane.b32.xlu0 %v719_v33, %s5509_s28  ;;  %785 = vrot.lane.b32.xlu1 %v720_v34, %s5509_s28 }
  0xb4   : > { %v414_v39 = vpop.permute.xlu0 %413  ;;  %v416_v40 = vpop.permute.xlu1 %415 }
  0xb5   : > { %502 = vst.msk [vmem:[#allocation3 + $0x40] sm:$0xff] %vm493_vm2, %v414_v39  ;;  %503 = vst.msk [vmem:[#allocation3 + $0x48] sm:$0xff] %vm493_vm2, %v416_v40  ;;  %v739_v39 = vld [vmem:[#allocation2 + $0xf3] sm:$0xff]  ;;  %v740_v40 = vld [vmem:[#allocation2 + $0xfb] sm:$0xff] }
  0xb6   : > { %787 = vrot.lane.b32.xlu0 %v721_v37, %s5509_s28  ;;  %789 = vrot.lane.b32.xlu1 %v722_v38, %s5509_s28 }
  0xb8   : > { %v418_v43 = vpop.permute.xlu0 %417  ;;  %v420_v44 = vpop.permute.xlu1 %419 }
  0xb9   : > { %504 = vst.msk [vmem:[#allocation3 + $0x50] sm:$0xff] %vm493_vm2, %v418_v43  ;;  %505 = vst.msk [vmem:[#allocation3 + $0x58] sm:$0xff] %vm493_vm2, %v420_v44  ;;  %v741_v43 = vld [vmem:[#allocation2 + $0x10b] sm:$0xff]  ;;  %v742_v44 = vld [vmem:[#allocation2 + $0x113] sm:$0xff] }
  0xba   : > { %791 = vrot.lane.b32.xlu0 %v723_v41, %s5509_s28  ;;  %793 = vrot.lane.b32.xlu1 %v724_v42, %s5509_s28 }
  0xbc   : > { %v422_v51 = vpop.permute.xlu0 %421  ;;  %v424_v52 = vpop.permute.xlu1 %423 }
  0xbd   : > { %506 = vst.msk [vmem:[#allocation3 + $0x60] sm:$0xff] %vm493_vm2, %v422_v51  ;;  %507 = vst.msk [vmem:[#allocation3 + $0x68] sm:$0xff] %vm493_vm2, %v424_v52  ;;  %v743_v51 = vld [vmem:[#allocation2 + $0x123] sm:$0xff]  ;;  %v744_v52 = vld [vmem:[#allocation2 + $0x12b] sm:$0xff] }
  0xbe   : > { %795 = vrot.lane.b32.xlu0 %v725_v45, %s5509_s28  ;;  %797 = vrot.lane.b32.xlu1 %v726_v47, %s5509_s28 }
  0xc0   : > { %v426_v3 = vpop.permute.xlu0 %425  ;;  %v428_v4 = vpop.permute.xlu1 %427 }
  0xc1   : > { %508 = vst.msk [vmem:[#allocation3 + $0x70] sm:$0xff] %vm493_vm2, %v426_v3  ;;  %509 = vst.msk [vmem:[#allocation3 + $0x78] sm:$0xff] %vm493_vm2, %v428_v4  ;;  %v745_v3 = vld [vmem:[#allocation2 + $0x13b] sm:$0xff]  ;;  %v746_v4 = vld [vmem:[#allocation2 + $0x143] sm:$0xff] }
  0xc2   : > { %799 = vrot.lane.b32.xlu0 %v727_v59, %s5509_s28  ;;  %801 = vrot.lane.b32.xlu1 %v728_v60, %s5509_s28 }
  0xc4   : > { %v430_v19 = vpop.permute.xlu0 %429  ;;  %v432_v20 = vpop.permute.xlu1 %431 }
  0xc5   : > { %510 = vst.msk [vmem:[#allocation3 + $0x80] sm:$0xff] %vm493_vm2, %v430_v19  ;;  %511 = vst.msk [vmem:[#allocation3 + $0x88] sm:$0xff] %vm493_vm2, %v432_v20  ;;  %v232_v19 = vld [vmem:[%s5664_s25 + $0xe0] sm:$0xff]  ;;  %v233_v20 = vld [vmem:[%s5664_s25 + $0xe8] sm:$0xff] }
  0xc6   : > { %803 = vrot.lane.b32.xlu0 %v729_v11, %s5509_s28  ;;  %805 = vrot.lane.b32.xlu1 %v730_v12, %s5509_s28  ;;  %265 = vst.msk [vmem:[#allocation2 + $0x182] sm:$0xff] %vm142_vm0, %v232_v19  ;;  %266 = vst.msk [vmem:[#allocation2 + $0x18a] sm:$0xff] %vm142_vm0, %v233_v20  ;;  %v924_v19 = vld [vmem:[#allocation2 + $0x94] sm:$0xff]  ;;  %v925_v20 = vld [vmem:[#allocation2 + $0x9c] sm:$0xff] }
  0xc8   : > { %v434_v25 = vpop.permute.xlu0 %433  ;;  %v436_v26 = vpop.permute.xlu1 %435 }
  0xc9   : > { %512 = vst.msk [vmem:[#allocation3 + $0x90] sm:$0xff] %vm493_vm2, %v434_v25  ;;  %513 = vst.msk [vmem:[#allocation3 + $0x98] sm:$0xff] %vm493_vm2, %v436_v26 }
  0xca   : > { %807 = vrot.lane.b32.xlu0 %v731_v23, %s5509_s28  ;;  %809 = vrot.lane.b32.xlu1 %v732_v24, %s5509_s28  ;;  %v747_v23 = vld [vmem:[#allocation2 + $0x153] sm:$0xff]  ;;  %v748_v24 = vld [vmem:[#allocation2 + $0x15b] sm:$0xff] }
  0xcc   : > { %v438_v29 = vpop.permute.xlu0 %437  ;;  %v440_v30 = vpop.permute.xlu1 %439 }
  0xcd   : > { %514 = vst.msk [vmem:[#allocation3 + $0xa0] sm:$0xff] %vm493_vm2, %v438_v29  ;;  %515 = vst.msk [vmem:[#allocation3 + $0xa8] sm:$0xff] %vm493_vm2, %v440_v30 }
  0xce   : > { %811 = vrot.lane.b32.xlu0 %v733_v27, %s5509_s28  ;;  %813 = vrot.lane.b32.xlu1 %v734_v28, %s5509_s28  ;;  %v749_v27 = vld [vmem:[#allocation2 + $0x16b] sm:$0xff]  ;;  %v750_v28 = vld [vmem:[#allocation2 + $0x173] sm:$0xff] }
  0xd0   : > { %v442_v33 = vpop.permute.xlu0 %441  ;;  %v444_v34 = vpop.permute.xlu1 %443 }
  0xd1   : > { %516 = vst.msk [vmem:[#allocation3 + $0xb0] sm:$0xff] %vm493_vm2, %v442_v33  ;;  %517 = vst.msk [vmem:[#allocation3 + $0xb8] sm:$0xff] %vm493_vm2, %v444_v34 }
  0xd2   : > { %815 = vrot.lane.b32.xlu0 %v735_v31, %s5509_s28  ;;  %817 = vrot.lane.b32.xlu1 %v736_v32, %s5509_s28  ;;  %v912_v31 = vld [vmem:[#allocation2 + $0x4] sm:$0xff]  ;;  %v913_v32 = vld [vmem:[#allocation2 + $0xc] sm:$0xff] }
  0xd4   : > { %v446_v37 = vpop.permute.xlu0 %445  ;;  %v448_v38 = vpop.permute.xlu1 %447 }
  0xd5   : > { %518 = vst.msk [vmem:[#allocation3 + $0xc0] sm:$0xff] %vm493_vm2, %v446_v37  ;;  %519 = vst.msk [vmem:[#allocation3 + $0xc8] sm:$0xff] %vm493_vm2, %v448_v38 }
  0xd6   : > { %819 = vrot.lane.b32.xlu0 %v737_v35, %s5509_s28  ;;  %821 = vrot.lane.b32.xlu1 %v738_v36, %s5509_s28  ;;  %v914_v35 = vld [vmem:[#allocation2 + $0x1c] sm:$0xff]  ;;  %v915_v36 = vld [vmem:[#allocation2 + $0x24] sm:$0xff] }
  0xd8   : > { %v450_v41 = vpop.permute.xlu0 %449  ;;  %v452_v42 = vpop.permute.xlu1 %451 }
  0xd9   : > { %520 = vst.msk [vmem:[#allocation3 + $0xd0] sm:$0xff] %vm493_vm2, %v450_v41  ;;  %521 = vst.msk [vmem:[#allocation3 + $0xd8] sm:$0xff] %vm493_vm2, %v452_v42 }
  0xda   : > { %823 = vrot.lane.b32.xlu0 %v739_v39, %s5509_s28  ;;  %825 = vrot.lane.b32.xlu1 %v740_v40, %s5509_s28  ;;  %v916_v39 = vld [vmem:[#allocation2 + $0x34] sm:$0xff]  ;;  %v917_v40 = vld [vmem:[#allocation2 + $0x3c] sm:$0xff] }
  0xdc   : > { %v454_v45 = vpop.permute.xlu0 %453  ;;  %v456_v47 = vpop.permute.xlu1 %455 }
  0xdd   : > { %522 = vst.msk [vmem:[#allocation3 + $0xe0] sm:$0xff] %vm493_vm2, %v454_v45  ;;  %523 = vst.msk [vmem:[#allocation3 + $0xe8] sm:$0xff] %vm493_vm2, %v456_v47 }
  0xde   : > { %827 = vrot.lane.b32.xlu0 %v741_v43, %s5509_s28  ;;  %829 = vrot.lane.b32.xlu1 %v742_v44, %s5509_s28  ;;  %v918_v43 = vld [vmem:[#allocation2 + $0x4c] sm:$0xff]  ;;  %v919_v44 = vld [vmem:[#allocation2 + $0x54] sm:$0xff] }
  0xe0   : > { %v458_v59 = vpop.permute.xlu0 %457  ;;  %v460_v60 = vpop.permute.xlu1 %459 }
  0xe1   : > { %524 = vst.msk [vmem:[#allocation3 + $0xf0] sm:$0xff] %vm493_vm2, %v458_v59  ;;  %525 = vst.msk [vmem:[#allocation3 + $0xf8] sm:$0xff] %vm493_vm2, %v460_v60  ;;  %vm3583_vm2 = vcmask 441752  }
  0xe2   : > { %831 = vrot.lane.b32.xlu0 %v743_v51, %s5509_s28  ;;  %833 = vrot.lane.b32.xlu1 %v744_v52, %s5509_s28  ;;  %v920_v51 = vld [vmem:[#allocation2 + $0x64] sm:$0xff]  ;;  %v921_v52 = vld [vmem:[#allocation2 + $0x6c] sm:$0xff] }
  0xe4   : > { %v591_v11 = vpop.permute.xlu0 %590  ;;  %v593_v12 = vpop.permute.xlu1 %592 }
  0xe5   : > { %687 = vst.msk [vmem:[#allocation3] sm:$0xff] %vm686_vm3, %v591_v11  ;;  %688 = vst.msk [vmem:[#allocation3 + $0x8] sm:$0xff] %vm686_vm3, %v593_v12 }
  0xe6   : > { %835 = vrot.lane.b32.xlu0 %v745_v3, %s5509_s28  ;;  %837 = vrot.lane.b32.xlu1 %v746_v4, %s5509_s28  ;;  %v922_v3 = vld [vmem:[#allocation2 + $0x7c] sm:$0xff]  ;;  %v923_v4 = vld [vmem:[#allocation2 + $0x84] sm:$0xff] }
  0xe8   : > { %v595_v25 = vpop.permute.xlu0 %594  ;;  %v597_v26 = vpop.permute.xlu1 %596 }
  0xe9   : > { %689 = vst.msk [vmem:[#allocation3 + $0x10] sm:$0xff] %vm686_vm3, %v595_v25  ;;  %690 = vst.msk [vmem:[#allocation3 + $0x18] sm:$0xff] %vm686_vm3, %v597_v26  ;;  %v926_v25 = vld [vmem:[#allocation2 + $0xac] sm:$0xff]  ;;  %v927_v26 = vld [vmem:[#allocation2 + $0xb4] sm:$0xff] }
  0xea   : > { %839 = vrot.lane.b32.xlu0 %v747_v23, %s5509_s28  ;;  %841 = vrot.lane.b32.xlu1 %v748_v24, %s5509_s28 }
  0xec   : > { %v599_v29 = vpop.permute.xlu0 %598  ;;  %v601_v30 = vpop.permute.xlu1 %600 }
  0xed   : > { %691 = vst.msk [vmem:[#allocation3 + $0x20] sm:$0xff] %vm686_vm3, %v599_v29  ;;  %692 = vst.msk [vmem:[#allocation3 + $0x28] sm:$0xff] %vm686_vm3, %v601_v30  ;;  %v928_v29 = vld [vmem:[#allocation2 + $0xc4] sm:$0xff]  ;;  %v929_v30 = vld [vmem:[#allocation2 + $0xcc] sm:$0xff] }
  0xee   : > { %843 = vrot.lane.b32.xlu0 %v749_v27, %s5509_s28  ;;  %845 = vrot.lane.b32.xlu1 %v750_v28, %s5509_s28  ;;  %s5528_s28 = smov 66  }
  0xf0   : > { %v603_v33 = vpop.permute.xlu0 %602  ;;  %v605_v34 = vpop.permute.xlu1 %604 }
  0xf1   : > { %693 = vst.msk [vmem:[#allocation3 + $0x30] sm:$0xff] %vm686_vm3, %v603_v33  ;;  %694 = vst.msk [vmem:[#allocation3 + $0x38] sm:$0xff] %vm686_vm3, %v605_v34  ;;  %v930_v33 = vld [vmem:[#allocation2 + $0xdc] sm:$0xff]  ;;  %v931_v34 = vld [vmem:[#allocation2 + $0xe4] sm:$0xff] }
  0xf2   : > { %976 = vrot.lane.b32.xlu0 %v912_v31, %s5510_s29  ;;  %978 = vrot.lane.b32.xlu1 %v913_v32, %s5510_s29 }
  0xf4   : > { %v607_v37 = vpop.permute.xlu0 %606  ;;  %v609_v38 = vpop.permute.xlu1 %608 }
  0xf5   : > { %695 = vst.msk [vmem:[#allocation3 + $0x40] sm:$0xff] %vm686_vm3, %v607_v37  ;;  %696 = vst.msk [vmem:[#allocation3 + $0x48] sm:$0xff] %vm686_vm3, %v609_v38  ;;  %v932_v37 = vld [vmem:[#allocation2 + $0xf4] sm:$0xff]  ;;  %v933_v38 = vld [vmem:[#allocation2 + $0xfc] sm:$0xff] }
  0xf6   : > { %980 = vrot.lane.b32.xlu0 %v914_v35, %s5510_s29  ;;  %982 = vrot.lane.b32.xlu1 %v915_v36, %s5510_s29 }
  0xf8   : > { %v611_v41 = vpop.permute.xlu0 %610  ;;  %v613_v42 = vpop.permute.xlu1 %612 }
  0xf9   : > { %697 = vst.msk [vmem:[#allocation3 + $0x50] sm:$0xff] %vm686_vm3, %v611_v41  ;;  %698 = vst.msk [vmem:[#allocation3 + $0x58] sm:$0xff] %vm686_vm3, %v613_v42  ;;  %v934_v41 = vld [vmem:[#allocation2 + $0x10c] sm:$0xff]  ;;  %v935_v42 = vld [vmem:[#allocation2 + $0x114] sm:$0xff] }
  0xfa   : > { %984 = vrot.lane.b32.xlu0 %v916_v39, %s5510_s29  ;;  %986 = vrot.lane.b32.xlu1 %v917_v40, %s5510_s29 }
  0xfc   : > { %v615_v45 = vpop.permute.xlu0 %614  ;;  %v617_v47 = vpop.permute.xlu1 %616 }
  0xfd   : > { %699 = vst.msk [vmem:[#allocation3 + $0x60] sm:$0xff] %vm686_vm3, %v615_v45  ;;  %700 = vst.msk [vmem:[#allocation3 + $0x68] sm:$0xff] %vm686_vm3, %v617_v47  ;;  %v936_v45 = vld [vmem:[#allocation2 + $0x124] sm:$0xff]  ;;  %v937_v47 = vld [vmem:[#allocation2 + $0x12c] sm:$0xff] }
  0xfe   : > { %988 = vrot.lane.b32.xlu0 %v918_v43, %s5510_s29  ;;  %990 = vrot.lane.b32.xlu1 %v919_v44, %s5510_s29 }
 0x100   : > { %v619_v59 = vpop.permute.xlu0 %618  ;;  %v621_v60 = vpop.permute.xlu1 %620 }
 0x101   : > { %701 = vst.msk [vmem:[#allocation3 + $0x70] sm:$0xff] %vm686_vm3, %v619_v59  ;;  %702 = vst.msk [vmem:[#allocation3 + $0x78] sm:$0xff] %vm686_vm3, %v621_v60  ;;  %v938_v59 = vld [vmem:[#allocation2 + $0x13c] sm:$0xff]  ;;  %v939_v60 = vld [vmem:[#allocation2 + $0x144] sm:$0xff] }
 0x102   : > { %992 = vrot.lane.b32.xlu0 %v920_v51, %s5510_s29  ;;  %994 = vrot.lane.b32.xlu1 %v921_v52, %s5510_s29 }
 0x104   : > { %v623_v11 = vpop.permute.xlu0 %622  ;;  %v625_v12 = vpop.permute.xlu1 %624 }
 0x105   : > { %703 = vst.msk [vmem:[#allocation3 + $0x80] sm:$0xff] %vm686_vm3, %v623_v11  ;;  %704 = vst.msk [vmem:[#allocation3 + $0x88] sm:$0xff] %vm686_vm3, %v625_v12  ;;  %v940_v11 = vld [vmem:[#allocation2 + $0x154] sm:$0xff]  ;;  %v941_v12 = vld [vmem:[#allocation2 + $0x15c] sm:$0xff] }
 0x106   : > { %996 = vrot.lane.b32.xlu0 %v922_v3, %s5510_s29  ;;  %998 = vrot.lane.b32.xlu1 %v923_v4, %s5510_s29 }
 0x108   : > { %v627_v23 = vpop.permute.xlu0 %626  ;;  %v629_v24 = vpop.permute.xlu1 %628 }
 0x109   : > { %705 = vst.msk [vmem:[#allocation3 + $0x90] sm:$0xff] %vm686_vm3, %v627_v23  ;;  %706 = vst.msk [vmem:[#allocation3 + $0x98] sm:$0xff] %vm686_vm3, %v629_v24  ;;  %v942_v23 = vld [vmem:[#allocation2 + $0x16c] sm:$0xff]  ;;  %v943_v24 = vld [vmem:[#allocation2 + $0x174] sm:$0xff] }
 0x10a   : > { %1000 = vrot.lane.b32.xlu0 %v924_v19, %s5510_s29  ;;  %1002 = vrot.lane.b32.xlu1 %v925_v20, %s5510_s29 }
 0x10c   : > { %v631_v27 = vpop.permute.xlu0 %630  ;;  %v633_v28 = vpop.permute.xlu1 %632 }
 0x10d   : > { %707 = vst.msk [vmem:[#allocation3 + $0xa0] sm:$0xff] %vm686_vm3, %v631_v27  ;;  %708 = vst.msk [vmem:[#allocation3 + $0xa8] sm:$0xff] %vm686_vm3, %v633_v28 }
 0x10e   : > { %1004 = vrot.lane.b32.xlu0 %v926_v25, %s5510_s29  ;;  %1006 = vrot.lane.b32.xlu1 %v927_v26, %s5510_s29 }
 0x110   : > { %v635_v31 = vpop.permute.xlu0 %634  ;;  %v637_v32 = vpop.permute.xlu1 %636 }
 0x111   : > { %709 = vst.msk [vmem:[#allocation3 + $0xb0] sm:$0xff] %vm686_vm3, %v635_v31  ;;  %710 = vst.msk [vmem:[#allocation3 + $0xb8] sm:$0xff] %vm686_vm3, %v637_v32 }
 0x112   : > { %1008 = vrot.lane.b32.xlu0 %v928_v29, %s5510_s29  ;;  %1010 = vrot.lane.b32.xlu1 %v929_v30, %s5510_s29 }
 0x114   : > { %v639_v35 = vpop.permute.xlu0 %638  ;;  %v641_v36 = vpop.permute.xlu1 %640 }
 0x115   : > { %711 = vst.msk [vmem:[#allocation3 + $0xc0] sm:$0xff] %vm686_vm3, %v639_v35  ;;  %712 = vst.msk [vmem:[#allocation3 + $0xc8] sm:$0xff] %vm686_vm3, %v641_v36 }
 0x116   : > { %1012 = vrot.lane.b32.xlu0 %v930_v33, %s5510_s29  ;;  %1014 = vrot.lane.b32.xlu1 %v931_v34, %s5510_s29 }
 0x118   : > { %v643_v39 = vpop.permute.xlu0 %642  ;;  %v645_v40 = vpop.permute.xlu1 %644 }
 0x119   : > { %713 = vst.msk [vmem:[#allocation3 + $0xd0] sm:$0xff] %vm686_vm3, %v643_v39  ;;  %714 = vst.msk [vmem:[#allocation3 + $0xd8] sm:$0xff] %vm686_vm3, %v645_v40  ;;  %v1303_v39 = vld [vmem:[#allocation2 + $0x49] sm:$0xff]  ;;  %v1304_v40 = vld [vmem:[#allocation2 + $0x51] sm:$0xff] }
 0x11a   : > { %1016 = vrot.lane.b32.xlu0 %v932_v37, %s5510_s29  ;;  %1018 = vrot.lane.b32.xlu1 %v933_v38, %s5510_s29 }
 0x11c   : > { %v647_v43 = vpop.permute.xlu0 %646  ;;  %v649_v44 = vpop.permute.xlu1 %648 }
 0x11d   : > { %715 = vst.msk [vmem:[#allocation3 + $0xe0] sm:$0xff] %vm686_vm3, %v647_v43  ;;  %716 = vst.msk [vmem:[#allocation3 + $0xe8] sm:$0xff] %vm686_vm3, %v649_v44  ;;  %v1305_v43 = vld [vmem:[#allocation2 + $0x61] sm:$0xff]  ;;  %v1306_v44 = vld [vmem:[#allocation2 + $0x69] sm:$0xff] }
 0x11e   : > { %1020 = vrot.lane.b32.xlu0 %v934_v41, %s5510_s29  ;;  %1022 = vrot.lane.b32.xlu1 %v935_v42, %s5510_s29 }
 0x120   : > { %v651_v51 = vpop.permute.xlu0 %650  ;;  %v653_v52 = vpop.permute.xlu1 %652 }
 0x121   : > { %717 = vst.msk [vmem:[#allocation3 + $0xf0] sm:$0xff] %vm686_vm3, %v651_v51  ;;  %718 = vst.msk [vmem:[#allocation3 + $0xf8] sm:$0xff] %vm686_vm3, %v653_v52  ;;  %v1307_v51 = vld [vmem:[#allocation2 + $0x79] sm:$0xff]  ;;  %v1308_v52 = vld [vmem:[#allocation2 + $0x81] sm:$0xff]  ;;  %vm3776_vm3 = vcmask 466352  }
 0x122   : > { %1024 = vrot.lane.b32.xlu0 %v936_v45, %s5510_s29  ;;  %1026 = vrot.lane.b32.xlu1 %v937_v47, %s5510_s29 }
 0x124   : > { %v784_v3 = vpop.permute.xlu0 %783  ;;  %v786_v4 = vpop.permute.xlu1 %785 }
 0x125   : > { %880 = vst.msk [vmem:[#allocation3] sm:$0xff] %vm879_vm4, %v784_v3  ;;  %881 = vst.msk [vmem:[#allocation3 + $0x8] sm:$0xff] %vm879_vm4, %v786_v4  ;;  %v1309_v3 = vld [vmem:[#allocation2 + $0x91] sm:$0xff]  ;;  %v1310_v4 = vld [vmem:[#allocation2 + $0x99] sm:$0xff] }
 0x126   : > { %1028 = vrot.lane.b32.xlu0 %v938_v59, %s5510_s29  ;;  %1030 = vrot.lane.b32.xlu1 %v939_v60, %s5510_s29 }
 0x128   : > { %v788_v19 = vpop.permute.xlu0 %787  ;;  %v790_v20 = vpop.permute.xlu1 %789 }
 0x129   : > { %882 = vst.msk [vmem:[#allocation3 + $0x10] sm:$0xff] %vm879_vm4, %v788_v19  ;;  %883 = vst.msk [vmem:[#allocation3 + $0x18] sm:$0xff] %vm879_vm4, %v790_v20  ;;  %v1311_v19 = vld [vmem:[#allocation2 + $0xa9] sm:$0xff]  ;;  %v1312_v20 = vld [vmem:[#allocation2 + $0xb1] sm:$0xff] }
 0x12a   : > { %1032 = vrot.lane.b32.xlu0 %v940_v11, %s5510_s29  ;;  %1034 = vrot.lane.b32.xlu1 %v941_v12, %s5510_s29 }
 0x12c   : > { %v792_v25 = vpop.permute.xlu0 %791  ;;  %v794_v26 = vpop.permute.xlu1 %793 }
 0x12d   : > { %884 = vst.msk [vmem:[#allocation3 + $0x20] sm:$0xff] %vm879_vm4, %v792_v25  ;;  %885 = vst.msk [vmem:[#allocation3 + $0x28] sm:$0xff] %vm879_vm4, %v794_v26  ;;  %v1313_v25 = vld [vmem:[#allocation2 + $0xc1] sm:$0xff]  ;;  %v1314_v26 = vld [vmem:[#allocation2 + $0xc9] sm:$0xff] }
 0x12e   : > { %1036 = vrot.lane.b32.xlu0 %v942_v23, %s5510_s29  ;;  %1038 = vrot.lane.b32.xlu1 %v943_v24, %s5510_s29  ;;  %s5529_s29 = smov 69  }
 0x130   : > { %v796_v27 = vpop.permute.xlu0 %795  ;;  %v798_v28 = vpop.permute.xlu1 %797 }
 0x131   : > { %886 = vst.msk [vmem:[#allocation3 + $0x30] sm:$0xff] %vm879_vm4, %v796_v27  ;;  %887 = vst.msk [vmem:[#allocation3 + $0x38] sm:$0xff] %vm879_vm4, %v798_v28 }
 0x132   : > { %1170 = vrot.lane.b32.xlu0 %v5737_v46, %s5511_s30  ;;  %1172 = vrot.lane.b32.xlu1 %v5741_v48, %s5511_s30 }
 0x134   : > { %v800_v29 = vpop.permute.xlu0 %799  ;;  %v802_v30 = vpop.permute.xlu1 %801 }
 0x135   : > { %888 = vst.msk [vmem:[#allocation3 + $0x40] sm:$0xff] %vm879_vm4, %v800_v29  ;;  %889 = vst.msk [vmem:[#allocation3 + $0x48] sm:$0xff] %vm879_vm4, %v802_v30  ;;  %v1315_v29 = vld [vmem:[#allocation2 + $0xd9] sm:$0xff]  ;;  %v1316_v30 = vld [vmem:[#allocation2 + $0xe1] sm:$0xff] }
 0x136   : > { %1174 = vrot.lane.b32.xlu0 %v5748_v49, %s5511_s30  ;;  %1176 = vrot.lane.b32.xlu1 %v5750_v50, %s5511_s30 }
 0x138   : > { %v804_v31 = vpop.permute.xlu0 %803  ;;  %v806_v32 = vpop.permute.xlu1 %805 }
 0x139   : > { %890 = vst.msk [vmem:[#allocation3 + $0x50] sm:$0xff] %vm879_vm4, %v804_v31  ;;  %891 = vst.msk [vmem:[#allocation3 + $0x58] sm:$0xff] %vm879_vm4, %v806_v32 }
 0x13a   : > { %1178 = vrot.lane.b32.xlu0 %v5756_v53, %s5511_s30  ;;  %1180 = vrot.lane.b32.xlu1 %v5760_v54, %s5511_s30 }
 0x13c   : > { %v808_v46 = vpop.permute.xlu0 %807  ;;  %v810_v48 = vpop.permute.xlu1 %809 }
 0x13d   : > { %892 = vst.msk [vmem:[#allocation3 + $0x60] sm:$0xff] %vm879_vm4, %v808_v46  ;;  %893 = vst.msk [vmem:[#allocation3 + $0x68] sm:$0xff] %vm879_vm4, %v810_v48  ;;  %v1317_v46 = vld [vmem:[#allocation2 + $0xf1] sm:$0xff]  ;;  %v1318_v48 = vld [vmem:[#allocation2 + $0xf9] sm:$0xff] }
 0x13e   : > { %1182 = vrot.lane.b32.xlu0 %v5764_v55, %s5511_s30  ;;  %1184 = vrot.lane.b32.xlu1 %v5766_v56, %s5511_s30 }
 0x140   : > { %v812_v49 = vpop.permute.xlu0 %811  ;;  %v814_v50 = vpop.permute.xlu1 %813 }
 0x141   : > { %894 = vst.msk [vmem:[#allocation3 + $0x70] sm:$0xff] %vm879_vm4, %v812_v49  ;;  %895 = vst.msk [vmem:[#allocation3 + $0x78] sm:$0xff] %vm879_vm4, %v814_v50 }
 0x142   : > { %1186 = vrot.lane.b32.xlu0 %v5774_v57, %s5511_s30  ;;  %1188 = vrot.lane.b32.xlu1 %v5776_v58, %s5511_s30 }
 0x144   : > { %v816_v53 = vpop.permute.xlu0 %815  ;;  %v818_v54 = vpop.permute.xlu1 %817 }
 0x145   : > { %896 = vst.msk [vmem:[#allocation3 + $0x80] sm:$0xff] %vm879_vm4, %v816_v53  ;;  %897 = vst.msk [vmem:[#allocation3 + $0x88] sm:$0xff] %vm879_vm4, %v818_v54  ;;  %v1319_v53 = vld [vmem:[#allocation2 + $0x109] sm:$0xff]  ;;  %v1320_v54 = vld [vmem:[#allocation2 + $0x111] sm:$0xff] }
 0x146   : > { %1190 = vrot.lane.b32.xlu0 %v5782_v61, %s5511_s30  ;;  %1192 = vrot.lane.b32.xlu1 %v5786_v62, %s5511_s30 }
 0x148   : > { %v820_v55 = vpop.permute.xlu0 %819  ;;  %v822_v56 = vpop.permute.xlu1 %821 }
 0x149   : > { %898 = vst.msk [vmem:[#allocation3 + $0x90] sm:$0xff] %vm879_vm4, %v820_v55  ;;  %899 = vst.msk [vmem:[#allocation3 + $0x98] sm:$0xff] %vm879_vm4, %v822_v56 }
 0x14a   : > { %1194 = vrot.lane.b32.xlu0 %v5790_v63, %s5511_s30  ;;  %1196 = vrot.lane.b32.xlu1 %v5792_v0, %s5511_s30 }
 0x14c   : > { %v824_v57 = vpop.permute.xlu0 %823  ;;  %v826_v58 = vpop.permute.xlu1 %825 }
 0x14d   : > { %900 = vst.msk [vmem:[#allocation3 + $0xa0] sm:$0xff] %vm879_vm4, %v824_v57  ;;  %901 = vst.msk [vmem:[#allocation3 + $0xa8] sm:$0xff] %vm879_vm4, %v826_v58  ;;  %v1321_v57 = vld [vmem:[#allocation2 + $0x121] sm:$0xff]  ;;  %v1322_v58 = vld [vmem:[#allocation2 + $0x129] sm:$0xff] }
 0x14e   : > { %1198 = vrot.lane.b32.xlu0 %v5800_v1, %s5511_s30  ;;  %1200 = vrot.lane.b32.xlu1 %v5802_v2, %s5511_s30 }
 0x150   : > { %v828_v61 = vpop.permute.xlu0 %827  ;;  %v830_v62 = vpop.permute.xlu1 %829 }
 0x151   : > { %902 = vst.msk [vmem:[#allocation3 + $0xb0] sm:$0xff] %vm879_vm4, %v828_v61  ;;  %903 = vst.msk [vmem:[#allocation3 + $0xb8] sm:$0xff] %vm879_vm4, %v830_v62 }
 0x152   : > { %1202 = vrot.lane.b32.xlu0 %v5808_v5, %s5511_s30  ;;  %1204 = vrot.lane.b32.xlu1 %v5812_v6, %s5511_s30 }
 0x154   : > { %v832_v63 = vpop.permute.xlu0 %831  ;;  %v834_v0 = vpop.permute.xlu1 %833 }
 0x155   : > { %904 = vst.msk [vmem:[#allocation3 + $0xc0] sm:$0xff] %vm879_vm4, %v832_v63  ;;  %905 = vst.msk [vmem:[#allocation3 + $0xc8] sm:$0xff] %vm879_vm4, %v834_v0  ;;  %v1323_v63 = vld [vmem:[#allocation2 + $0x139] sm:$0xff]  ;;  %v1324_v0 = vld [vmem:[#allocation2 + $0x141] sm:$0xff] }
 0x156   : > { %1206 = vrot.lane.b32.xlu0 %v5816_v7, %s5511_s30  ;;  %1208 = vrot.lane.b32.xlu1 %v5818_v8, %s5511_s30 }
 0x158   : > { %v836_v1 = vpop.permute.xlu0 %835  ;;  %v838_v2 = vpop.permute.xlu1 %837 }
 0x159   : > { %906 = vst.msk [vmem:[#allocation3 + $0xd0] sm:$0xff] %vm879_vm4, %v836_v1  ;;  %907 = vst.msk [vmem:[#allocation3 + $0xd8] sm:$0xff] %vm879_vm4, %v838_v2 }
 0x15a   : > { %1210 = vrot.lane.b32.xlu0 %v5826_v9, %s5511_s30  ;;  %1212 = vrot.lane.b32.xlu1 %v5828_v10, %s5511_s30 }
 0x15c   : > { %v840_v5 = vpop.permute.xlu0 %839  ;;  %v842_v6 = vpop.permute.xlu1 %841 }
 0x15d   : > { %908 = vst.msk [vmem:[#allocation3 + $0xe0] sm:$0xff] %vm879_vm4, %v840_v5  ;;  %909 = vst.msk [vmem:[#allocation3 + $0xe8] sm:$0xff] %vm879_vm4, %v842_v6  ;;  %v1325_v5 = vld [vmem:[#allocation2 + $0x151] sm:$0xff]  ;;  %v1326_v6 = vld [vmem:[#allocation2 + $0x159] sm:$0xff] }
 0x15e   : > { %1214 = vrot.lane.b32.xlu0 %v5834_v13, %s5511_s30  ;;  %1216 = vrot.lane.b32.xlu1 %v5838_v14, %s5511_s30 }
 0x160   : > { %v844_v7 = vpop.permute.xlu0 %843  ;;  %v846_v8 = vpop.permute.xlu1 %845 }
 0x161   : > { %910 = vst.msk [vmem:[#allocation3 + $0xf0] sm:$0xff] %vm879_vm4, %v844_v7  ;;  %911 = vst.msk [vmem:[#allocation3 + $0xf8] sm:$0xff] %vm879_vm4, %v846_v8  ;;  %vm3969_vm4 = vcmask 490952  }
 0x162   : > { %1218 = vrot.lane.b32.xlu0 %v5842_v15, %s5511_s30  ;;  %1220 = vrot.lane.b32.xlu1 %v5844_v16, %s5511_s30  ;;  %v1136_v15 = vld [vmem:[#allocation2 + $0x180] sm:$0xff]  ;;  %v1137_v16 = vld [vmem:[#allocation2 + $0x188] sm:$0xff] }
 0x164   : > { %v977_v9 = vpop.permute.xlu0 %976  ;;  %v979_v10 = vpop.permute.xlu1 %978 }
 0x165   : > { %1073 = vst.msk [vmem:[#allocation3] sm:$0xff] %vm1072_vm5, %v977_v9  ;;  %1074 = vst.msk [vmem:[#allocation3 + $0x8] sm:$0xff] %vm1072_vm5, %v979_v10  ;;  %v1327_v9 = vld [vmem:[#allocation2 + $0x169] sm:$0xff]  ;;  %v1328_v10 = vld [vmem:[#allocation2 + $0x171] sm:$0xff] }
 0x166   : > { %1222 = vrot.lane.b32.xlu0 %v5852_v17, %s5511_s30  ;;  %1224 = vrot.lane.b32.xlu1 %v5854_v18, %s5511_s30  ;;  %v1299_v17 = vld [vmem:[#allocation2 + $0x19] sm:$0xff]  ;;  %v1300_v18 = vld [vmem:[#allocation2 + $0x21] sm:$0xff] }
 0x168   : > { %v981_v13 = vpop.permute.xlu0 %980  ;;  %v983_v14 = vpop.permute.xlu1 %982 }
 0x169   : > { %1075 = vst.msk [vmem:[#allocation3 + $0x10] sm:$0xff] %vm1072_vm5, %v981_v13  ;;  %1076 = vst.msk [vmem:[#allocation3 + $0x18] sm:$0xff] %vm1072_vm5, %v983_v14 }
 0x16a   : > { %1226 = vrot.lane.b32.xlu0 %v5860_v21, %s5511_s30  ;;  %1228 = vrot.lane.b32.xlu1 %v5864_v22, %s5511_s30  ;;  %v1301_v21 = vld [vmem:[#allocation2 + $0x31] sm:$0xff]  ;;  %v1302_v22 = vld [vmem:[#allocation2 + $0x39] sm:$0xff] }
 0x16c   : > { %v985_v33 = vpop.permute.xlu0 %984  ;;  %v987_v34 = vpop.permute.xlu1 %986 }
 0x16d   : > { %1077 = vst.msk [vmem:[#allocation3 + $0x20] sm:$0xff] %vm1072_vm5, %v985_v33  ;;  %1078 = vst.msk [vmem:[#allocation3 + $0x28] sm:$0xff] %vm1072_vm5, %v987_v34 }
 0x16e   : > { %1230 = vrot.lane.b32.xlu0 %v1136_v15, %s5511_s30  ;;  %1232 = vrot.lane.b32.xlu1 %v1137_v16, %s5511_s30  ;;  %v1329_v15 = vld [vmem:[#allocation2 + $0x181] sm:$0xff]  ;;  %v1330_v16 = vld [vmem:[#allocation2 + $0x189] sm:$0xff]  ;;  %s5530_s30 = smov 72  }
 0x170   : > { %v989_v35 = vpop.permute.xlu0 %988  ;;  %v991_v36 = vpop.permute.xlu1 %990 }
 0x171   : > { %1079 = vst.msk [vmem:[#allocation3 + $0x30] sm:$0xff] %vm1072_vm5, %v989_v35  ;;  %1080 = vst.msk [vmem:[#allocation3 + $0x38] sm:$0xff] %vm1072_vm5, %v991_v36 }
 0x172   : > { %1363 = vrot.lane.b32.xlu0 %v1299_v17, %s5512_s3  ;;  %1365 = vrot.lane.b32.xlu1 %v1300_v18, %s5512_s3  ;;  %v1492_v17 = vld [vmem:[#allocation2 + $0x1a] sm:$0xff]  ;;  %v1493_v18 = vld [vmem:[#allocation2 + $0x22] sm:$0xff] }
 0x174   : > { %v993_v37 = vpop.permute.xlu0 %992  ;;  %v995_v38 = vpop.permute.xlu1 %994 }
 0x175   : > { %1081 = vst.msk [vmem:[#allocation3 + $0x40] sm:$0xff] %vm1072_vm5, %v993_v37  ;;  %1082 = vst.msk [vmem:[#allocation3 + $0x48] sm:$0xff] %vm1072_vm5, %v995_v38 }
 0x176   : > { %1367 = vrot.lane.b32.xlu0 %v1301_v21, %s5512_s3  ;;  %1369 = vrot.lane.b32.xlu1 %v1302_v22, %s5512_s3  ;;  %v1494_v21 = vld [vmem:[#allocation2 + $0x32] sm:$0xff]  ;;  %v1495_v22 = vld [vmem:[#allocation2 + $0x3a] sm:$0xff] }
 0x178   : > { %v997_v41 = vpop.permute.xlu0 %996  ;;  %v999_v42 = vpop.permute.xlu1 %998 }
 0x179   : > { %1083 = vst.msk [vmem:[#allocation3 + $0x50] sm:$0xff] %vm1072_vm5, %v997_v41  ;;  %1084 = vst.msk [vmem:[#allocation3 + $0x58] sm:$0xff] %vm1072_vm5, %v999_v42 }
 0x17a   : > { %1371 = vrot.lane.b32.xlu0 %v1303_v39, %s5512_s3  ;;  %1373 = vrot.lane.b32.xlu1 %v1304_v40, %s5512_s3  ;;  %v1496_v39 = vld [vmem:[#allocation2 + $0x4a] sm:$0xff]  ;;  %v1497_v40 = vld [vmem:[#allocation2 + $0x52] sm:$0xff] }
 0x17c   : > { %v1001_v45 = vpop.permute.xlu0 %1000  ;;  %v1003_v47 = vpop.permute.xlu1 %1002 }
 0x17d   : > { %1085 = vst.msk [vmem:[#allocation3 + $0x60] sm:$0xff] %vm1072_vm5, %v1001_v45  ;;  %1086 = vst.msk [vmem:[#allocation3 + $0x68] sm:$0xff] %vm1072_vm5, %v1003_v47 }
 0x17e   : > { %1375 = vrot.lane.b32.xlu0 %v1305_v43, %s5512_s3  ;;  %1377 = vrot.lane.b32.xlu1 %v1306_v44, %s5512_s3  ;;  %v1498_v43 = vld [vmem:[#allocation2 + $0x62] sm:$0xff]  ;;  %v1499_v44 = vld [vmem:[#allocation2 + $0x6a] sm:$0xff] }
 0x180   : > { %v1005_v59 = vpop.permute.xlu0 %1004  ;;  %v1007_v60 = vpop.permute.xlu1 %1006 }
 0x181   : > { %1087 = vst.msk [vmem:[#allocation3 + $0x70] sm:$0xff] %vm1072_vm5, %v1005_v59  ;;  %1088 = vst.msk [vmem:[#allocation3 + $0x78] sm:$0xff] %vm1072_vm5, %v1007_v60 }
 0x182   : > { %1379 = vrot.lane.b32.xlu0 %v1307_v51, %s5512_s3  ;;  %1381 = vrot.lane.b32.xlu1 %v1308_v52, %s5512_s3  ;;  %v1500_v51 = vld [vmem:[#allocation2 + $0x7a] sm:$0xff]  ;;  %v1501_v52 = vld [vmem:[#allocation2 + $0x82] sm:$0xff] }
 0x184   : > { %v1009_v11 = vpop.permute.xlu0 %1008  ;;  %v1011_v12 = vpop.permute.xlu1 %1010 }
 0x185   : > { %1089 = vst.msk [vmem:[#allocation3 + $0x80] sm:$0xff] %vm1072_vm5, %v1009_v11  ;;  %1090 = vst.msk [vmem:[#allocation3 + $0x88] sm:$0xff] %vm1072_vm5, %v1011_v12 }
 0x186   : > { %1383 = vrot.lane.b32.xlu0 %v1309_v3, %s5512_s3  ;;  %1385 = vrot.lane.b32.xlu1 %v1310_v4, %s5512_s3  ;;  %v1502_v3 = vld [vmem:[#allocation2 + $0x92] sm:$0xff]  ;;  %v1503_v4 = vld [vmem:[#allocation2 + $0x9a] sm:$0xff] }
 0x188   : > { %v1013_v23 = vpop.permute.xlu0 %1012  ;;  %v1015_v24 = vpop.permute.xlu1 %1014 }
 0x189   : > { %1091 = vst.msk [vmem:[#allocation3 + $0x90] sm:$0xff] %vm1072_vm5, %v1013_v23  ;;  %1092 = vst.msk [vmem:[#allocation3 + $0x98] sm:$0xff] %vm1072_vm5, %v1015_v24 }
 0x18a   : > { %1387 = vrot.lane.b32.xlu0 %v1311_v19, %s5512_s3  ;;  %1389 = vrot.lane.b32.xlu1 %v1312_v20, %s5512_s3  ;;  %v1504_v19 = vld [vmem:[#allocation2 + $0xaa] sm:$0xff]  ;;  %v1505_v20 = vld [vmem:[#allocation2 + $0xb2] sm:$0xff] }
 0x18c   : > { %v1017_v27 = vpop.permute.xlu0 %1016  ;;  %v1019_v28 = vpop.permute.xlu1 %1018 }
 0x18d   : > { %1093 = vst.msk [vmem:[#allocation3 + $0xa0] sm:$0xff] %vm1072_vm5, %v1017_v27  ;;  %1094 = vst.msk [vmem:[#allocation3 + $0xa8] sm:$0xff] %vm1072_vm5, %v1019_v28 }
 0x18e   : > { %1391 = vrot.lane.b32.xlu0 %v1313_v25, %s5512_s3  ;;  %1393 = vrot.lane.b32.xlu1 %v1314_v26, %s5512_s3  ;;  %v1506_v25 = vld [vmem:[#allocation2 + $0xc2] sm:$0xff]  ;;  %v1507_v26 = vld [vmem:[#allocation2 + $0xca] sm:$0xff] }
 0x190   : > { %v1021_v31 = vpop.permute.xlu0 %1020  ;;  %v1023_v32 = vpop.permute.xlu1 %1022 }
 0x191   : > { %1095 = vst.msk [vmem:[#allocation3 + $0xb0] sm:$0xff] %vm1072_vm5, %v1021_v31  ;;  %1096 = vst.msk [vmem:[#allocation3 + $0xb8] sm:$0xff] %vm1072_vm5, %v1023_v32 }
 0x192   : > { %1395 = vrot.lane.b32.xlu0 %v1315_v29, %s5512_s3  ;;  %1397 = vrot.lane.b32.xlu1 %v1316_v30, %s5512_s3  ;;  %v1508_v29 = vld [vmem:[#allocation2 + $0xda] sm:$0xff]  ;;  %v1509_v30 = vld [vmem:[#allocation2 + $0xe2] sm:$0xff] }
 0x194   : > { %v1025_v49 = vpop.permute.xlu0 %1024  ;;  %v1027_v50 = vpop.permute.xlu1 %1026 }
 0x195   : > { %1097 = vst.msk [vmem:[#allocation3 + $0xc0] sm:$0xff] %vm1072_vm5, %v1025_v49  ;;  %1098 = vst.msk [vmem:[#allocation3 + $0xc8] sm:$0xff] %vm1072_vm5, %v1027_v50 }
 0x196   : > { %1399 = vrot.lane.b32.xlu0 %v1317_v46, %s5512_s3  ;;  %1401 = vrot.lane.b32.xlu1 %v1318_v48, %s5512_s3  ;;  %v1510_v46 = vld [vmem:[#allocation2 + $0xf2] sm:$0xff]  ;;  %v1511_v48 = vld [vmem:[#allocation2 + $0xfa] sm:$0xff] }
 0x198   : > { %v1029_v55 = vpop.permute.xlu0 %1028  ;;  %v1031_v56 = vpop.permute.xlu1 %1030 }
 0x199   : > { %1099 = vst.msk [vmem:[#allocation3 + $0xd0] sm:$0xff] %vm1072_vm5, %v1029_v55  ;;  %1100 = vst.msk [vmem:[#allocation3 + $0xd8] sm:$0xff] %vm1072_vm5, %v1031_v56 }
 0x19a   : > { %1403 = vrot.lane.b32.xlu0 %v1319_v53, %s5512_s3  ;;  %1405 = vrot.lane.b32.xlu1 %v1320_v54, %s5512_s3  ;;  %v1512_v53 = vld [vmem:[#allocation2 + $0x10a] sm:$0xff]  ;;  %v1513_v54 = vld [vmem:[#allocation2 + $0x112] sm:$0xff] }
 0x19c   : > { %v1033_v61 = vpop.permute.xlu0 %1032  ;;  %v1035_v62 = vpop.permute.xlu1 %1034 }
 0x19d   : > { %1101 = vst.msk [vmem:[#allocation3 + $0xe0] sm:$0xff] %vm1072_vm5, %v1033_v61  ;;  %1102 = vst.msk [vmem:[#allocation3 + $0xe8] sm:$0xff] %vm1072_vm5, %v1035_v62 }
 0x19e   : > { %1407 = vrot.lane.b32.xlu0 %v1321_v57, %s5512_s3  ;;  %1409 = vrot.lane.b32.xlu1 %v1322_v58, %s5512_s3  ;;  %v1514_v57 = vld [vmem:[#allocation2 + $0x122] sm:$0xff]  ;;  %v1515_v58 = vld [vmem:[#allocation2 + $0x12a] sm:$0xff] }
 0x1a0   : > { %v1037_v1 = vpop.permute.xlu0 %1036  ;;  %v1039_v2 = vpop.permute.xlu1 %1038 }
 0x1a1   : > { %1103 = vst.msk [vmem:[#allocation3 + $0xf0] sm:$0xff] %vm1072_vm5, %v1037_v1  ;;  %1104 = vst.msk [vmem:[#allocation3 + $0xf8] sm:$0xff] %vm1072_vm5, %v1039_v2  ;;  %vm4163_vm5 = vcmask 515552  }
 0x1a2   : > { %1411 = vrot.lane.b32.xlu0 %v1323_v63, %s5512_s3  ;;  %1413 = vrot.lane.b32.xlu1 %v1324_v0, %s5512_s3  ;;  %v1516_v63 = vld [vmem:[#allocation2 + $0x13a] sm:$0xff]  ;;  %v1517_v0 = vld [vmem:[#allocation2 + $0x142] sm:$0xff] }
 0x1a4   : > { %v1171_v7 = vpop.permute.xlu0 %1170  ;;  %v1173_v8 = vpop.permute.xlu1 %1172 }
 0x1a5   : > { %1267 = vst.msk [vmem:[#allocation3] sm:$0xff] %vm1266_vm6, %v1171_v7  ;;  %1268 = vst.msk [vmem:[#allocation3 + $0x8] sm:$0xff] %vm1266_vm6, %v1173_v8 }
 0x1a6   : > { %1415 = vrot.lane.b32.xlu0 %v1325_v5, %s5512_s3  ;;  %1417 = vrot.lane.b32.xlu1 %v1326_v6, %s5512_s3  ;;  %v1518_v5 = vld [vmem:[#allocation2 + $0x152] sm:$0xff]  ;;  %v1519_v6 = vld [vmem:[#allocation2 + $0x15a] sm:$0xff] }
 0x1a8   : > { %v1175_v13 = vpop.permute.xlu0 %1174  ;;  %v1177_v14 = vpop.permute.xlu1 %1176 }
 0x1a9   : > { %1269 = vst.msk [vmem:[#allocation3 + $0x10] sm:$0xff] %vm1266_vm6, %v1175_v13  ;;  %1270 = vst.msk [vmem:[#allocation3 + $0x18] sm:$0xff] %vm1266_vm6, %v1177_v14 }
 0x1aa   : > { %1419 = vrot.lane.b32.xlu0 %v1327_v9, %s5512_s3  ;;  %1421 = vrot.lane.b32.xlu1 %v1328_v10, %s5512_s3  ;;  %v1520_v9 = vld [vmem:[#allocation2 + $0x16a] sm:$0xff]  ;;  %v1521_v10 = vld [vmem:[#allocation2 + $0x172] sm:$0xff] }
 0x1ac   : > { %v1179_v33 = vpop.permute.xlu0 %1178  ;;  %v1181_v34 = vpop.permute.xlu1 %1180 }
 0x1ad   : > { %1271 = vst.msk [vmem:[#allocation3 + $0x20] sm:$0xff] %vm1266_vm6, %v1179_v33  ;;  %1272 = vst.msk [vmem:[#allocation3 + $0x28] sm:$0xff] %vm1266_vm6, %v1181_v34 }
 0x1ae   : > { %1423 = vrot.lane.b32.xlu0 %v1329_v15, %s5512_s3  ;;  %1425 = vrot.lane.b32.xlu1 %v1330_v16, %s5512_s3  ;;  %v1522_v15 = vld [vmem:[#allocation2 + $0x182] sm:$0xff]  ;;  %v1523_v16 = vld [vmem:[#allocation2 + $0x18a] sm:$0xff] }
 0x1b0   : > { %v1183_v35 = vpop.permute.xlu0 %1182  ;;  %v1185_v36 = vpop.permute.xlu1 %1184 }
 0x1b1   : > { %1273 = vst.msk [vmem:[#allocation3 + $0x30] sm:$0xff] %vm1266_vm6, %v1183_v35  ;;  %1274 = vst.msk [vmem:[#allocation3 + $0x38] sm:$0xff] %vm1266_vm6, %v1185_v36 }
 0x1b2   : > { %1556 = vrot.lane.b32.xlu0 %v1492_v17, %s5513_s4  ;;  %1558 = vrot.lane.b32.xlu1 %v1493_v18, %s5513_s4  ;;  %v1685_v17 = vld [vmem:[#allocation2 + $0x1b] sm:$0xff]  ;;  %v1686_v18 = vld [vmem:[#allocation2 + $0x23] sm:$0xff] }
 0x1b4   : > { %v1187_v37 = vpop.permute.xlu0 %1186  ;;  %v1189_v38 = vpop.permute.xlu1 %1188 }
 0x1b5   : > { %1275 = vst.msk [vmem:[#allocation3 + $0x40] sm:$0xff] %vm1266_vm6, %v1187_v37  ;;  %1276 = vst.msk [vmem:[#allocation3 + $0x48] sm:$0xff] %vm1266_vm6, %v1189_v38 }
 0x1b6   : > { %1560 = vrot.lane.b32.xlu0 %v1494_v21, %s5513_s4  ;;  %1562 = vrot.lane.b32.xlu1 %v1495_v22, %s5513_s4  ;;  %v1687_v21 = vld [vmem:[#allocation2 + $0x33] sm:$0xff]  ;;  %v1688_v22 = vld [vmem:[#allocation2 + $0x3b] sm:$0xff] }
 0x1b8   : > { %v1191_v41 = vpop.permute.xlu0 %1190  ;;  %v1193_v42 = vpop.permute.xlu1 %1192 }
 0x1b9   : > { %1277 = vst.msk [vmem:[#allocation3 + $0x50] sm:$0xff] %vm1266_vm6, %v1191_v41  ;;  %1278 = vst.msk [vmem:[#allocation3 + $0x58] sm:$0xff] %vm1266_vm6, %v1193_v42 }
 0x1ba   : > { %1564 = vrot.lane.b32.xlu0 %v1496_v39, %s5513_s4  ;;  %1566 = vrot.lane.b32.xlu1 %v1497_v40, %s5513_s4  ;;  %v1689_v39 = vld [vmem:[#allocation2 + $0x4b] sm:$0xff]  ;;  %v1690_v40 = vld [vmem:[#allocation2 + $0x53] sm:$0xff] }
 0x1bc   : > { %v1195_v45 = vpop.permute.xlu0 %1194  ;;  %v1197_v47 = vpop.permute.xlu1 %1196 }
 0x1bd   : > { %1279 = vst.msk [vmem:[#allocation3 + $0x60] sm:$0xff] %vm1266_vm6, %v1195_v45  ;;  %1280 = vst.msk [vmem:[#allocation3 + $0x68] sm:$0xff] %vm1266_vm6, %v1197_v47 }
 0x1be   : > { %1568 = vrot.lane.b32.xlu0 %v1498_v43, %s5513_s4  ;;  %1570 = vrot.lane.b32.xlu1 %v1499_v44, %s5513_s4  ;;  %v1691_v43 = vld [vmem:[#allocation2 + $0x63] sm:$0xff]  ;;  %v1692_v44 = vld [vmem:[#allocation2 + $0x6b] sm:$0xff] }
 0x1c0   : > { %v1199_v59 = vpop.permute.xlu0 %1198  ;;  %v1201_v60 = vpop.permute.xlu1 %1200 }
 0x1c1   : > { %1281 = vst.msk [vmem:[#allocation3 + $0x70] sm:$0xff] %vm1266_vm6, %v1199_v59  ;;  %1282 = vst.msk [vmem:[#allocation3 + $0x78] sm:$0xff] %vm1266_vm6, %v1201_v60 }
 0x1c2   : > { %1572 = vrot.lane.b32.xlu0 %v1500_v51, %s5513_s4  ;;  %1574 = vrot.lane.b32.xlu1 %v1501_v52, %s5513_s4  ;;  %v1693_v51 = vld [vmem:[#allocation2 + $0x7b] sm:$0xff]  ;;  %v1694_v52 = vld [vmem:[#allocation2 + $0x83] sm:$0xff] }
 0x1c4   : > { %v1203_v11 = vpop.permute.xlu0 %1202  ;;  %v1205_v12 = vpop.permute.xlu1 %1204 }
 0x1c5   : > { %1283 = vst.msk [vmem:[#allocation3 + $0x80] sm:$0xff] %vm1266_vm6, %v1203_v11  ;;  %1284 = vst.msk [vmem:[#allocation3 + $0x88] sm:$0xff] %vm1266_vm6, %v1205_v12 }
 0x1c6   : > { %1576 = vrot.lane.b32.xlu0 %v1502_v3, %s5513_s4  ;;  %1578 = vrot.lane.b32.xlu1 %v1503_v4, %s5513_s4  ;;  %v1695_v3 = vld [vmem:[#allocation2 + $0x93] sm:$0xff]  ;;  %v1696_v4 = vld [vmem:[#allocation2 + $0x9b] sm:$0xff] }
 0x1c8   : > { %v1207_v23 = vpop.permute.xlu0 %1206  ;;  %v1209_v24 = vpop.permute.xlu1 %1208 }
 0x1c9   : > { %1285 = vst.msk [vmem:[#allocation3 + $0x90] sm:$0xff] %vm1266_vm6, %v1207_v23  ;;  %1286 = vst.msk [vmem:[#allocation3 + $0x98] sm:$0xff] %vm1266_vm6, %v1209_v24 }
 0x1ca   : > { %1580 = vrot.lane.b32.xlu0 %v1504_v19, %s5513_s4  ;;  %1582 = vrot.lane.b32.xlu1 %v1505_v20, %s5513_s4  ;;  %v1697_v19 = vld [vmem:[#allocation2 + $0xab] sm:$0xff]  ;;  %v1698_v20 = vld [vmem:[#allocation2 + $0xb3] sm:$0xff] }
 0x1cc   : > { %v1211_v27 = vpop.permute.xlu0 %1210  ;;  %v1213_v28 = vpop.permute.xlu1 %1212 }
 0x1cd   : > { %1287 = vst.msk [vmem:[#allocation3 + $0xa0] sm:$0xff] %vm1266_vm6, %v1211_v27  ;;  %1288 = vst.msk [vmem:[#allocation3 + $0xa8] sm:$0xff] %vm1266_vm6, %v1213_v28 }
 0x1ce   : > { %1584 = vrot.lane.b32.xlu0 %v1506_v25, %s5513_s4  ;;  %1586 = vrot.lane.b32.xlu1 %v1507_v26, %s5513_s4  ;;  %v1699_v25 = vld [vmem:[#allocation2 + $0xc3] sm:$0xff]  ;;  %v1700_v26 = vld [vmem:[#allocation2 + $0xcb] sm:$0xff] }
 0x1d0   : > { %v1215_v31 = vpop.permute.xlu0 %1214  ;;  %v1217_v32 = vpop.permute.xlu1 %1216 }
 0x1d1   : > { %1289 = vst.msk [vmem:[#allocation3 + $0xb0] sm:$0xff] %vm1266_vm6, %v1215_v31  ;;  %1290 = vst.msk [vmem:[#allocation3 + $0xb8] sm:$0xff] %vm1266_vm6, %v1217_v32 }
 0x1d2   : > { %1588 = vrot.lane.b32.xlu0 %v1508_v29, %s5513_s4  ;;  %1590 = vrot.lane.b32.xlu1 %v1509_v30, %s5513_s4  ;;  %v1701_v29 = vld [vmem:[#allocation2 + $0xdb] sm:$0xff]  ;;  %v1702_v30 = vld [vmem:[#allocation2 + $0xe3] sm:$0xff] }
 0x1d4   : > { %v1219_v49 = vpop.permute.xlu0 %1218  ;;  %v1221_v50 = vpop.permute.xlu1 %1220 }
 0x1d5   : > { %1291 = vst.msk [vmem:[#allocation3 + $0xc0] sm:$0xff] %vm1266_vm6, %v1219_v49  ;;  %1292 = vst.msk [vmem:[#allocation3 + $0xc8] sm:$0xff] %vm1266_vm6, %v1221_v50 }
 0x1d6   : > { %1592 = vrot.lane.b32.xlu0 %v1510_v46, %s5513_s4  ;;  %1594 = vrot.lane.b32.xlu1 %v1511_v48, %s5513_s4  ;;  %v1703_v46 = vld [vmem:[#allocation2 + $0xf3] sm:$0xff]  ;;  %v1704_v48 = vld [vmem:[#allocation2 + $0xfb] sm:$0xff] }
 0x1d8   : > { %v1223_v55 = vpop.permute.xlu0 %1222  ;;  %v1225_v56 = vpop.permute.xlu1 %1224 }
 0x1d9   : > { %1293 = vst.msk [vmem:[#allocation3 + $0xd0] sm:$0xff] %vm1266_vm6, %v1223_v55  ;;  %1294 = vst.msk [vmem:[#allocation3 + $0xd8] sm:$0xff] %vm1266_vm6, %v1225_v56 }
 0x1da   : > { %1596 = vrot.lane.b32.xlu0 %v1512_v53, %s5513_s4  ;;  %1598 = vrot.lane.b32.xlu1 %v1513_v54, %s5513_s4  ;;  %v1705_v53 = vld [vmem:[#allocation2 + $0x10b] sm:$0xff]  ;;  %v1706_v54 = vld [vmem:[#allocation2 + $0x113] sm:$0xff] }
 0x1dc   : > { %v1227_v61 = vpop.permute.xlu0 %1226  ;;  %v1229_v62 = vpop.permute.xlu1 %1228 }
 0x1dd   : > { %1295 = vst.msk [vmem:[#allocation3 + $0xe0] sm:$0xff] %vm1266_vm6, %v1227_v61  ;;  %1296 = vst.msk [vmem:[#allocation3 + $0xe8] sm:$0xff] %vm1266_vm6, %v1229_v62 }
 0x1de   : > { %1600 = vrot.lane.b32.xlu0 %v1514_v57, %s5513_s4  ;;  %1602 = vrot.lane.b32.xlu1 %v1515_v58, %s5513_s4  ;;  %v1707_v57 = vld [vmem:[#allocation2 + $0x123] sm:$0xff]  ;;  %v1708_v58 = vld [vmem:[#allocation2 + $0x12b] sm:$0xff] }
 0x1e0   : > { %v1231_v1 = vpop.permute.xlu0 %1230  ;;  %v1233_v2 = vpop.permute.xlu1 %1232 }
 0x1e1   : > { %1297 = vst.msk [vmem:[#allocation3 + $0xf0] sm:$0xff] %vm1266_vm6, %v1231_v1  ;;  %1298 = vst.msk [vmem:[#allocation3 + $0xf8] sm:$0xff] %vm1266_vm6, %v1233_v2  ;;  %vm4356_vm6 = vcmask 540152  }
 0x1e2   : > { %1604 = vrot.lane.b32.xlu0 %v1516_v63, %s5513_s4  ;;  %1606 = vrot.lane.b32.xlu1 %v1517_v0, %s5513_s4  ;;  %v1709_v63 = vld [vmem:[#allocation2 + $0x13b] sm:$0xff]  ;;  %v1710_v0 = vld [vmem:[#allocation2 + $0x143] sm:$0xff] }
 0x1e4   : > { %v1364_v7 = vpop.permute.xlu0 %1363  ;;  %v1366_v8 = vpop.permute.xlu1 %1365 }
 0x1e5   : > { %1460 = vst.msk [vmem:[#allocation3] sm:$0xff] %vm1459_vm7, %v1364_v7  ;;  %1461 = vst.msk [vmem:[#allocation3 + $0x8] sm:$0xff] %vm1459_vm7, %v1366_v8 }
 0x1e6   : > { %1608 = vrot.lane.b32.xlu0 %v1518_v5, %s5513_s4  ;;  %1610 = vrot.lane.b32.xlu1 %v1519_v6, %s5513_s4  ;;  %v1711_v5 = vld [vmem:[#allocation2 + $0x153] sm:$0xff]  ;;  %v1712_v6 = vld [vmem:[#allocation2 + $0x15b] sm:$0xff] }
 0x1e8   : > { %v1368_v13 = vpop.permute.xlu0 %1367  ;;  %v1370_v14 = vpop.permute.xlu1 %1369 }
 0x1e9   : > { %1462 = vst.msk [vmem:[#allocation3 + $0x10] sm:$0xff] %vm1459_vm7, %v1368_v13  ;;  %1463 = vst.msk [vmem:[#allocation3 + $0x18] sm:$0xff] %vm1459_vm7, %v1370_v14  ;;  %v1713_v13 = vld [vmem:[#allocation2 + $0x16b] sm:$0xff]  ;;  %v1714_v14 = vld [vmem:[#allocation2 + $0x173] sm:$0xff] }
 0x1ea   : > { %1612 = vrot.lane.b32.xlu0 %v1520_v9, %s5513_s4  ;;  %1614 = vrot.lane.b32.xlu1 %v1521_v10, %s5513_s4  ;;  %v234_v9 = vld [vmem:[%s5664_s25 + $0xf0] sm:$0xff]  ;;  %v235_v10 = vld [vmem:[%s5664_s25 + $0xf8] sm:$0xff]  ;;  %s5525_s25 = smov 57  }
 0x1eb   : > { %267 = vst.msk [vmem:[#allocation2 + $0x19a] sm:$0xff] %vm142_vm0, %v234_v9  ;;  %268 = vst.msk [vmem:[#allocation2 + $0x1a2] sm:$0xff] %vm142_vm0, %v235_v10  ;;  %vm3197_vm0 = vcmask 392552  }
 0x1ec   : > { %v1372_v33 = vpop.permute.xlu0 %1371  ;;  %v1374_v34 = vpop.permute.xlu1 %1373 }
 0x1ed   : > { %1464 = vst.msk [vmem:[#allocation3 + $0x20] sm:$0xff] %vm1459_vm7, %v1372_v33  ;;  %1465 = vst.msk [vmem:[#allocation3 + $0x28] sm:$0xff] %vm1459_vm7, %v1374_v34  ;;  %v1715_v33 = vld [vmem:[#allocation2 + $0x183] sm:$0xff]  ;;  %v1716_v34 = vld [vmem:[#allocation2 + $0x18b] sm:$0xff] }
 0x1ee   : > { %1616 = vrot.lane.b32.xlu0 %v1522_v15, %s5513_s4  ;;  %1618 = vrot.lane.b32.xlu1 %v1523_v16, %s5513_s4 }
 0x1f0   : > { %v1376_v35 = vpop.permute.xlu0 %1375  ;;  %v1378_v36 = vpop.permute.xlu1 %1377 }
 0x1f1   : > { %1466 = vst.msk [vmem:[#allocation3 + $0x30] sm:$0xff] %vm1459_vm7, %v1376_v35  ;;  %1467 = vst.msk [vmem:[#allocation3 + $0x38] sm:$0xff] %vm1459_vm7, %v1378_v36  ;;  %v1878_v35 = vld [vmem:[#allocation2 + $0x1c] sm:$0xff]  ;;  %v1879_v36 = vld [vmem:[#allocation2 + $0x24] sm:$0xff] }
 0x1f2   : > { %1749 = vrot.lane.b32.xlu0 %v1685_v17, %s5514_s5  ;;  %1751 = vrot.lane.b32.xlu1 %v1686_v18, %s5514_s5 }
 0x1f4   : > { %v1380_v37 = vpop.permute.xlu0 %1379  ;;  %v1382_v38 = vpop.permute.xlu1 %1381 }
 0x1f5   : > { %1468 = vst.msk [vmem:[#allocation3 + $0x40] sm:$0xff] %vm1459_vm7, %v1380_v37  ;;  %1469 = vst.msk [vmem:[#allocation3 + $0x48] sm:$0xff] %vm1459_vm7, %v1382_v38  ;;  %v1880_v37 = vld [vmem:[#allocation2 + $0x34] sm:$0xff]  ;;  %v1881_v38 = vld [vmem:[#allocation2 + $0x3c] sm:$0xff] }
 0x1f6   : > { %1753 = vrot.lane.b32.xlu0 %v1687_v21, %s5514_s5  ;;  %1755 = vrot.lane.b32.xlu1 %v1688_v22, %s5514_s5 }
 0x1f8   : > { %v1384_v41 = vpop.permute.xlu0 %1383  ;;  %v1386_v42 = vpop.permute.xlu1 %1385 }
 0x1f9   : > { %1470 = vst.msk [vmem:[#allocation3 + $0x50] sm:$0xff] %vm1459_vm7, %v1384_v41  ;;  %1471 = vst.msk [vmem:[#allocation3 + $0x58] sm:$0xff] %vm1459_vm7, %v1386_v42  ;;  %v1882_v41 = vld [vmem:[#allocation2 + $0x4c] sm:$0xff]  ;;  %v1883_v42 = vld [vmem:[#allocation2 + $0x54] sm:$0xff] }
 0x1fa   : > { %1757 = vrot.lane.b32.xlu0 %v1689_v39, %s5514_s5  ;;  %1759 = vrot.lane.b32.xlu1 %v1690_v40, %s5514_s5 }
 0x1fc   : > { %v1388_v45 = vpop.permute.xlu0 %1387  ;;  %v1390_v47 = vpop.permute.xlu1 %1389 }
 0x1fd   : > { %1472 = vst.msk [vmem:[#allocation3 + $0x60] sm:$0xff] %vm1459_vm7, %v1388_v45  ;;  %1473 = vst.msk [vmem:[#allocation3 + $0x68] sm:$0xff] %vm1459_vm7, %v1390_v47  ;;  %v1884_v45 = vld [vmem:[#allocation2 + $0x64] sm:$0xff]  ;;  %v1885_v47 = vld [vmem:[#allocation2 + $0x6c] sm:$0xff] }
 0x1fe   : > { %1761 = vrot.lane.b32.xlu0 %v1691_v43, %s5514_s5  ;;  %1763 = vrot.lane.b32.xlu1 %v1692_v44, %s5514_s5 }
 0x200   : > { %v1392_v59 = vpop.permute.xlu0 %1391  ;;  %v1394_v60 = vpop.permute.xlu1 %1393 }
 0x201   : > { %1474 = vst.msk [vmem:[#allocation3 + $0x70] sm:$0xff] %vm1459_vm7, %v1392_v59  ;;  %1475 = vst.msk [vmem:[#allocation3 + $0x78] sm:$0xff] %vm1459_vm7, %v1394_v60  ;;  %v1886_v59 = vld [vmem:[#allocation2 + $0x7c] sm:$0xff]  ;;  %v1887_v60 = vld [vmem:[#allocation2 + $0x84] sm:$0xff] }
 0x202   : > { %1765 = vrot.lane.b32.xlu0 %v1693_v51, %s5514_s5  ;;  %1767 = vrot.lane.b32.xlu1 %v1694_v52, %s5514_s5 }
 0x204   : > { %v1396_v11 = vpop.permute.xlu0 %1395  ;;  %v1398_v12 = vpop.permute.xlu1 %1397 }
 0x205   : > { %1476 = vst.msk [vmem:[#allocation3 + $0x80] sm:$0xff] %vm1459_vm7, %v1396_v11  ;;  %1477 = vst.msk [vmem:[#allocation3 + $0x88] sm:$0xff] %vm1459_vm7, %v1398_v12  ;;  %v1888_v11 = vld [vmem:[#allocation2 + $0x94] sm:$0xff]  ;;  %v1889_v12 = vld [vmem:[#allocation2 + $0x9c] sm:$0xff] }
 0x206   : > { %1769 = vrot.lane.b32.xlu0 %v1695_v3, %s5514_s5  ;;  %1771 = vrot.lane.b32.xlu1 %v1696_v4, %s5514_s5 }
 0x208   : > { %v1400_v23 = vpop.permute.xlu0 %1399  ;;  %v1402_v24 = vpop.permute.xlu1 %1401 }
 0x209   : > { %1478 = vst.msk [vmem:[#allocation3 + $0x90] sm:$0xff] %vm1459_vm7, %v1400_v23  ;;  %1479 = vst.msk [vmem:[#allocation3 + $0x98] sm:$0xff] %vm1459_vm7, %v1402_v24  ;;  %v1890_v23 = vld [vmem:[#allocation2 + $0xac] sm:$0xff]  ;;  %v1891_v24 = vld [vmem:[#allocation2 + $0xb4] sm:$0xff] }
 0x20a   : > { %1773 = vrot.lane.b32.xlu0 %v1697_v19, %s5514_s5  ;;  %1775 = vrot.lane.b32.xlu1 %v1698_v20, %s5514_s5 }
 0x20c   : > { %v1404_v27 = vpop.permute.xlu0 %1403  ;;  %v1406_v28 = vpop.permute.xlu1 %1405 }
 0x20d   : > { %1480 = vst.msk [vmem:[#allocation3 + $0xa0] sm:$0xff] %vm1459_vm7, %v1404_v27  ;;  %1481 = vst.msk [vmem:[#allocation3 + $0xa8] sm:$0xff] %vm1459_vm7, %v1406_v28  ;;  %v1892_v27 = vld [vmem:[#allocation2 + $0xc4] sm:$0xff]  ;;  %v1893_v28 = vld [vmem:[#allocation2 + $0xcc] sm:$0xff] }
 0x20e   : > { %1777 = vrot.lane.b32.xlu0 %v1699_v25, %s5514_s5  ;;  %1779 = vrot.lane.b32.xlu1 %v1700_v26, %s5514_s5 }
 0x210   : > { %v1408_v31 = vpop.permute.xlu0 %1407  ;;  %v1410_v32 = vpop.permute.xlu1 %1409 }
 0x211   : > { %1482 = vst.msk [vmem:[#allocation3 + $0xb0] sm:$0xff] %vm1459_vm7, %v1408_v31  ;;  %1483 = vst.msk [vmem:[#allocation3 + $0xb8] sm:$0xff] %vm1459_vm7, %v1410_v32  ;;  %v1894_v31 = vld [vmem:[#allocation2 + $0xdc] sm:$0xff]  ;;  %v1895_v32 = vld [vmem:[#allocation2 + $0xe4] sm:$0xff] }
 0x212   : > { %1781 = vrot.lane.b32.xlu0 %v1701_v29, %s5514_s5  ;;  %1783 = vrot.lane.b32.xlu1 %v1702_v30, %s5514_s5 }
 0x214   : > { %v1412_v49 = vpop.permute.xlu0 %1411  ;;  %v1414_v50 = vpop.permute.xlu1 %1413 }
 0x215   : > { %1484 = vst.msk [vmem:[#allocation3 + $0xc0] sm:$0xff] %vm1459_vm7, %v1412_v49  ;;  %1485 = vst.msk [vmem:[#allocation3 + $0xc8] sm:$0xff] %vm1459_vm7, %v1414_v50  ;;  %v1896_v49 = vld [vmem:[#allocation2 + $0xf4] sm:$0xff]  ;;  %v1897_v50 = vld [vmem:[#allocation2 + $0xfc] sm:$0xff] }
 0x216   : > { %1785 = vrot.lane.b32.xlu0 %v1703_v46, %s5514_s5  ;;  %1787 = vrot.lane.b32.xlu1 %v1704_v48, %s5514_s5 }
 0x218   : > { %v1416_v55 = vpop.permute.xlu0 %1415  ;;  %v1418_v56 = vpop.permute.xlu1 %1417 }
 0x219   : > { %1486 = vst.msk [vmem:[#allocation3 + $0xd0] sm:$0xff] %vm1459_vm7, %v1416_v55  ;;  %1487 = vst.msk [vmem:[#allocation3 + $0xd8] sm:$0xff] %vm1459_vm7, %v1418_v56  ;;  %v1898_v55 = vld [vmem:[#allocation2 + $0x10c] sm:$0xff]  ;;  %v1899_v56 = vld [vmem:[#allocation2 + $0x114] sm:$0xff] }
 0x21a   : > { %1789 = vrot.lane.b32.xlu0 %v1705_v53, %s5514_s5  ;;  %1791 = vrot.lane.b32.xlu1 %v1706_v54, %s5514_s5 }
 0x21c   : > { %v1420_v61 = vpop.permute.xlu0 %1419  ;;  %v1422_v62 = vpop.permute.xlu1 %1421 }
 0x21d   : > { %1488 = vst.msk [vmem:[#allocation3 + $0xe0] sm:$0xff] %vm1459_vm7, %v1420_v61  ;;  %1489 = vst.msk [vmem:[#allocation3 + $0xe8] sm:$0xff] %vm1459_vm7, %v1422_v62  ;;  %v1900_v61 = vld [vmem:[#allocation2 + $0x124] sm:$0xff]  ;;  %v1901_v62 = vld [vmem:[#allocation2 + $0x12c] sm:$0xff] }
 0x21e   : > { %1793 = vrot.lane.b32.xlu0 %v1707_v57, %s5514_s5  ;;  %1795 = vrot.lane.b32.xlu1 %v1708_v58, %s5514_s5 }
 0x220   : > { %v1424_v1 = vpop.permute.xlu0 %1423  ;;  %v1426_v2 = vpop.permute.xlu1 %1425 }
 0x221   : > { %1490 = vst.msk [vmem:[#allocation3 + $0xf0] sm:$0xff] %vm1459_vm7, %v1424_v1  ;;  %1491 = vst.msk [vmem:[#allocation3 + $0xf8] sm:$0xff] %vm1459_vm7, %v1426_v2  ;;  %v1902_v1 = vld [vmem:[#allocation2 + $0x13c] sm:$0xff]  ;;  %v1903_v2 = vld [vmem:[#allocation2 + $0x144] sm:$0xff]  ;;  %vm4549_vm7 = vcmask 564752  }
 0x222   : > { %1797 = vrot.lane.b32.xlu0 %v1709_v63, %s5514_s5  ;;  %1799 = vrot.lane.b32.xlu1 %v1710_v0, %s5514_s5 }
 0x224   : > { %v1557_v7 = vpop.permute.xlu0 %1556  ;;  %v1559_v8 = vpop.permute.xlu1 %1558 }
 0x225   : > { %1653 = vst.msk [vmem:[#allocation3] sm:$0xff] %vm1652_vm8, %v1557_v7  ;;  %1654 = vst.msk [vmem:[#allocation3 + $0x8] sm:$0xff] %vm1652_vm8, %v1559_v8  ;;  %v1904_v7 = vld [vmem:[#allocation2 + $0x154] sm:$0xff]  ;;  %v1905_v8 = vld [vmem:[#allocation2 + $0x15c] sm:$0xff] }
 0x226   : > { %1801 = vrot.lane.b32.xlu0 %v1711_v5, %s5514_s5  ;;  %1803 = vrot.lane.b32.xlu1 %v1712_v6, %s5514_s5 }
 0x228   : > { %v1561_v15 = vpop.permute.xlu0 %1560  ;;  %v1563_v16 = vpop.permute.xlu1 %1562 }
 0x229   : > { %1655 = vst.msk [vmem:[#allocation3 + $0x10] sm:$0xff] %vm1652_vm8, %v1561_v15  ;;  %1656 = vst.msk [vmem:[#allocation3 + $0x18] sm:$0xff] %vm1652_vm8, %v1563_v16 }
 0x22a   : > { %1805 = vrot.lane.b32.xlu0 %v1713_v13, %s5514_s5  ;;  %1807 = vrot.lane.b32.xlu1 %v1714_v14, %s5514_s5  ;;  %v1906_v13 = vld [vmem:[#allocation2 + $0x16c] sm:$0xff]  ;;  %v1907_v14 = vld [vmem:[#allocation2 + $0x174] sm:$0xff] }
 0x22c   : > { %v1565_v17 = vpop.permute.xlu0 %1564  ;;  %v1567_v18 = vpop.permute.xlu1 %1566 }
 0x22d   : > { %1657 = vst.msk [vmem:[#allocation3 + $0x20] sm:$0xff] %vm1652_vm8, %v1565_v17  ;;  %1658 = vst.msk [vmem:[#allocation3 + $0x28] sm:$0xff] %vm1652_vm8, %v1567_v18 }
 0x22e   : > { %1809 = vrot.lane.b32.xlu0 %v1715_v33, %s5514_s5  ;;  %1811 = vrot.lane.b32.xlu1 %v1716_v34, %s5514_s5  ;;  %v1908_v33 = vld [vmem:[#allocation2 + $0x184] sm:$0xff]  ;;  %v1909_v34 = vld [vmem:[#allocation2 + $0x18c] sm:$0xff] }
 0x230   : > { %v1569_v21 = vpop.permute.xlu0 %1568  ;;  %v1571_v22 = vpop.permute.xlu1 %1570 }
 0x231   : > { %1659 = vst.msk [vmem:[#allocation3 + $0x30] sm:$0xff] %vm1652_vm8, %v1569_v21  ;;  %1660 = vst.msk [vmem:[#allocation3 + $0x38] sm:$0xff] %vm1652_vm8, %v1571_v22 }
 0x232   : > { %1942 = vrot.lane.b32.xlu0 %v1878_v35, %s5515_s6  ;;  %1944 = vrot.lane.b32.xlu1 %v1879_v36, %s5515_s6  ;;  %v2071_v35 = vld [vmem:[#allocation2 + $0x30] sm:$0xff]  ;;  %v2072_v36 = vld [vmem:[#allocation2 + $0x38] sm:$0xff] }
 0x234   : > { %v1573_v39 = vpop.permute.xlu0 %1572  ;;  %v1575_v40 = vpop.permute.xlu1 %1574 }
 0x235   : > { %1661 = vst.msk [vmem:[#allocation3 + $0x40] sm:$0xff] %vm1652_vm8, %v1573_v39  ;;  %1662 = vst.msk [vmem:[#allocation3 + $0x48] sm:$0xff] %vm1652_vm8, %v1575_v40 }
 0x236   : > { %1946 = vrot.lane.b32.xlu0 %v1880_v37, %s5515_s6  ;;  %1948 = vrot.lane.b32.xlu1 %v1881_v38, %s5515_s6  ;;  %v2073_v37 = vld [vmem:[#allocation2 + $0x48] sm:$0xff]  ;;  %v2074_v38 = vld [vmem:[#allocation2 + $0x50] sm:$0xff] }
 0x238   : > { %v1577_v43 = vpop.permute.xlu0 %1576  ;;  %v1579_v44 = vpop.permute.xlu1 %1578 }
 0x239   : > { %1663 = vst.msk [vmem:[#allocation3 + $0x50] sm:$0xff] %vm1652_vm8, %v1577_v43  ;;  %1664 = vst.msk [vmem:[#allocation3 + $0x58] sm:$0xff] %vm1652_vm8, %v1579_v44 }
 0x23a   : > { %1950 = vrot.lane.b32.xlu0 %v1882_v41, %s5515_s6  ;;  %1952 = vrot.lane.b32.xlu1 %v1883_v42, %s5515_s6  ;;  %v2075_v41 = vld [vmem:[#allocation2 + $0x60] sm:$0xff]  ;;  %v2076_v42 = vld [vmem:[#allocation2 + $0x68] sm:$0xff] }
 0x23c   : > { %v1581_v51 = vpop.permute.xlu0 %1580  ;;  %v1583_v52 = vpop.permute.xlu1 %1582 }
 0x23d   : > { %1665 = vst.msk [vmem:[#allocation3 + $0x60] sm:$0xff] %vm1652_vm8, %v1581_v51  ;;  %1666 = vst.msk [vmem:[#allocation3 + $0x68] sm:$0xff] %vm1652_vm8, %v1583_v52 }
 0x23e   : > { %1954 = vrot.lane.b32.xlu0 %v1884_v45, %s5515_s6  ;;  %1956 = vrot.lane.b32.xlu1 %v1885_v47, %s5515_s6  ;;  %v2077_v45 = vld [vmem:[#allocation2 + $0x78] sm:$0xff]  ;;  %v2078_v47 = vld [vmem:[#allocation2 + $0x80] sm:$0xff] }
 0x240   : > { %v1585_v3 = vpop.permute.xlu0 %1584  ;;  %v1587_v4 = vpop.permute.xlu1 %1586 }
 0x241   : > { %1667 = vst.msk [vmem:[#allocation3 + $0x70] sm:$0xff] %vm1652_vm8, %v1585_v3  ;;  %1668 = vst.msk [vmem:[#allocation3 + $0x78] sm:$0xff] %vm1652_vm8, %v1587_v4 }
 0x242   : > { %1958 = vrot.lane.b32.xlu0 %v1886_v59, %s5515_s6  ;;  %1960 = vrot.lane.b32.xlu1 %v1887_v60, %s5515_s6  ;;  %v2079_v59 = vld [vmem:[#allocation2 + $0x90] sm:$0xff]  ;;  %v2080_v60 = vld [vmem:[#allocation2 + $0x98] sm:$0xff] }
 0x244   : > { %v1589_v19 = vpop.permute.xlu0 %1588  ;;  %v1591_v20 = vpop.permute.xlu1 %1590 }
 0x245   : > { %1669 = vst.msk [vmem:[#allocation3 + $0x80] sm:$0xff] %vm1652_vm8, %v1589_v19  ;;  %1670 = vst.msk [vmem:[#allocation3 + $0x88] sm:$0xff] %vm1652_vm8, %v1591_v20 }
 0x246   : > { %1962 = vrot.lane.b32.xlu0 %v1888_v11, %s5515_s6  ;;  %1964 = vrot.lane.b32.xlu1 %v1889_v12, %s5515_s6  ;;  %v2081_v11 = vld [vmem:[#allocation2 + $0xa8] sm:$0xff]  ;;  %v2082_v12 = vld [vmem:[#allocation2 + $0xb0] sm:$0xff] }
 0x248   : > { %v1593_v25 = vpop.permute.xlu0 %1592  ;;  %v1595_v26 = vpop.permute.xlu1 %1594 }
 0x249   : > { %1671 = vst.msk [vmem:[#allocation3 + $0x90] sm:$0xff] %vm1652_vm8, %v1593_v25  ;;  %1672 = vst.msk [vmem:[#allocation3 + $0x98] sm:$0xff] %vm1652_vm8, %v1595_v26 }
 0x24a   : > { %1966 = vrot.lane.b32.xlu0 %v1890_v23, %s5515_s6  ;;  %1968 = vrot.lane.b32.xlu1 %v1891_v24, %s5515_s6  ;;  %v2083_v23 = vld [vmem:[#allocation2 + $0xc0] sm:$0xff]  ;;  %v2084_v24 = vld [vmem:[#allocation2 + $0xc8] sm:$0xff] }
 0x24c   : > { %v1597_v29 = vpop.permute.xlu0 %1596  ;;  %v1599_v30 = vpop.permute.xlu1 %1598 }
 0x24d   : > { %1673 = vst.msk [vmem:[#allocation3 + $0xa0] sm:$0xff] %vm1652_vm8, %v1597_v29  ;;  %1674 = vst.msk [vmem:[#allocation3 + $0xa8] sm:$0xff] %vm1652_vm8, %v1599_v30 }
 0x24e   : > { %1970 = vrot.lane.b32.xlu0 %v1892_v27, %s5515_s6  ;;  %1972 = vrot.lane.b32.xlu1 %v1893_v28, %s5515_s6  ;;  %v2085_v27 = vld [vmem:[#allocation2 + $0xd8] sm:$0xff]  ;;  %v2086_v28 = vld [vmem:[#allocation2 + $0xe0] sm:$0xff] }
 0x250   : > { %v1601_v46 = vpop.permute.xlu0 %1600  ;;  %v1603_v48 = vpop.permute.xlu1 %1602 }
 0x251   : > { %1675 = vst.msk [vmem:[#allocation3 + $0xb0] sm:$0xff] %vm1652_vm8, %v1601_v46  ;;  %1676 = vst.msk [vmem:[#allocation3 + $0xb8] sm:$0xff] %vm1652_vm8, %v1603_v48 }
 0x252   : > { %1974 = vrot.lane.b32.xlu0 %v1894_v31, %s5515_s6  ;;  %1976 = vrot.lane.b32.xlu1 %v1895_v32, %s5515_s6  ;;  %v2087_v31 = vld [vmem:[#allocation2 + $0xf0] sm:$0xff]  ;;  %v2088_v32 = vld [vmem:[#allocation2 + $0xf8] sm:$0xff] }
 0x254   : > { %v1605_v53 = vpop.permute.xlu0 %1604  ;;  %v1607_v54 = vpop.permute.xlu1 %1606 }
 0x255   : > { %1677 = vst.msk [vmem:[#allocation3 + $0xc0] sm:$0xff] %vm1652_vm8, %v1605_v53  ;;  %1678 = vst.msk [vmem:[#allocation3 + $0xc8] sm:$0xff] %vm1652_vm8, %v1607_v54 }
 0x256   : > { %1978 = vrot.lane.b32.xlu0 %v1896_v49, %s5515_s6  ;;  %1980 = vrot.lane.b32.xlu1 %v1897_v50, %s5515_s6  ;;  %v2089_v49 = vld [vmem:[#allocation2 + $0x108] sm:$0xff]  ;;  %v2090_v50 = vld [vmem:[#allocation2 + $0x110] sm:$0xff] }
 0x258   : > { %v1609_v57 = vpop.permute.xlu0 %1608  ;;  %v1611_v58 = vpop.permute.xlu1 %1610 }
 0x259   : > { %1679 = vst.msk [vmem:[#allocation3 + $0xd0] sm:$0xff] %vm1652_vm8, %v1609_v57  ;;  %1680 = vst.msk [vmem:[#allocation3 + $0xd8] sm:$0xff] %vm1652_vm8, %v1611_v58 }
 0x25a   : > { %1982 = vrot.lane.b32.xlu0 %v1898_v55, %s5515_s6  ;;  %1984 = vrot.lane.b32.xlu1 %v1899_v56, %s5515_s6  ;;  %v2091_v55 = vld [vmem:[#allocation2 + $0x120] sm:$0xff]  ;;  %v2092_v56 = vld [vmem:[#allocation2 + $0x128] sm:$0xff] }
 0x25c   : > { %v1613_v63 = vpop.permute.xlu0 %1612  ;;  %v1615_v0 = vpop.permute.xlu1 %1614 }
 0x25d   : > { %1681 = vst.msk [vmem:[#allocation3 + $0xe0] sm:$0xff] %vm1652_vm8, %v1613_v63  ;;  %1682 = vst.msk [vmem:[#allocation3 + $0xe8] sm:$0xff] %vm1652_vm8, %v1615_v0 }
 0x25e   : > { %1986 = vrot.lane.b32.xlu0 %v1900_v61, %s5515_s6  ;;  %1988 = vrot.lane.b32.xlu1 %v1901_v62, %s5515_s6  ;;  %v2093_v61 = vld [vmem:[#allocation2 + $0x138] sm:$0xff]  ;;  %v2094_v62 = vld [vmem:[#allocation2 + $0x140] sm:$0xff] }
 0x260   : > { %v1617_v5 = vpop.permute.xlu0 %1616  ;;  %v1619_v6 = vpop.permute.xlu1 %1618 }
 0x261   : > { %1683 = vst.msk [vmem:[#allocation3 + $0xf0] sm:$0xff] %vm1652_vm8, %v1617_v5  ;;  %1684 = vst.msk [vmem:[#allocation3 + $0xf8] sm:$0xff] %vm1652_vm8, %v1619_v6  ;;  %vm4742_vm8 = vcmask 589352  }
 0x262   : > { %1990 = vrot.lane.b32.xlu0 %v1902_v1, %s5515_s6  ;;  %1992 = vrot.lane.b32.xlu1 %v1903_v2, %s5515_s6  ;;  %v2095_v1 = vld [vmem:[#allocation2 + $0x150] sm:$0xff]  ;;  %v2096_v2 = vld [vmem:[#allocation2 + $0x158] sm:$0xff] }
 0x264   : > { %v1750_v9 = vpop.permute.xlu0 %1749  ;;  %v1752_v10 = vpop.permute.xlu1 %1751 }
 0x265   : > { %1846 = vst.msk [vmem:[#allocation3] sm:$0xff] %vm1845_vm9, %v1750_v9  ;;  %1847 = vst.msk [vmem:[#allocation3 + $0x8] sm:$0xff] %vm1845_vm9, %v1752_v10 }
 0x266   : > { %1994 = vrot.lane.b32.xlu0 %v1904_v7, %s5515_s6  ;;  %1996 = vrot.lane.b32.xlu1 %v1905_v8, %s5515_s6  ;;  %v2097_v7 = vld [vmem:[#allocation2 + $0x168] sm:$0xff]  ;;  %v2098_v8 = vld [vmem:[#allocation2 + $0x170] sm:$0xff] }
 0x268   : > { %v1754_v15 = vpop.permute.xlu0 %1753  ;;  %v1756_v16 = vpop.permute.xlu1 %1755 }
 0x269   : > { %1848 = vst.msk [vmem:[#allocation3 + $0x10] sm:$0xff] %vm1845_vm9, %v1754_v15  ;;  %1849 = vst.msk [vmem:[#allocation3 + $0x18] sm:$0xff] %vm1845_vm9, %v1756_v16 }
 0x26a   : > { %1998 = vrot.lane.b32.xlu0 %v1906_v13, %s5515_s6  ;;  %2000 = vrot.lane.b32.xlu1 %v1907_v14, %s5515_s6  ;;  %v2099_v13 = vld [vmem:[#allocation2 + $0x180] sm:$0xff]  ;;  %v2100_v14 = vld [vmem:[#allocation2 + $0x188] sm:$0xff] }
 0x26c   : > { %v1758_v17 = vpop.permute.xlu0 %1757  ;;  %v1760_v18 = vpop.permute.xlu1 %1759 }
 0x26d   : > { %1850 = vst.msk [vmem:[#allocation3 + $0x20] sm:$0xff] %vm1845_vm9, %v1758_v17  ;;  %1851 = vst.msk [vmem:[#allocation3 + $0x28] sm:$0xff] %vm1845_vm9, %v1760_v18 }
 0x26e   : > { %2002 = vrot.lane.b32.xlu0 %v1908_v33, %s5515_s6  ;;  %2004 = vrot.lane.b32.xlu1 %v1909_v34, %s5515_s6  ;;  %v2101_v33 = vld [vmem:[#allocation2 + $0x198] sm:$0xff]  ;;  %v2102_v34 = vld [vmem:[#allocation2 + $0x1a0] sm:$0xff] }
 0x270   : > { %v1762_v21 = vpop.permute.xlu0 %1761  ;;  %v1764_v22 = vpop.permute.xlu1 %1763 }
 0x271   : > { %1852 = vst.msk [vmem:[#allocation3 + $0x30] sm:$0xff] %vm1845_vm9, %v1762_v21  ;;  %1853 = vst.msk [vmem:[#allocation3 + $0x38] sm:$0xff] %vm1845_vm9, %v1764_v22 }
 0x272   : > { %2135 = vrot.lane.b32.xlu0 %v2071_v35, %s5516_s7  ;;  %2137 = vrot.lane.b32.xlu1 %v2072_v36, %s5516_s7  ;;  %v2264_v35 = vld [vmem:[#allocation2 + $0x31] sm:$0xff]  ;;  %v2265_v36 = vld [vmem:[#allocation2 + $0x39] sm:$0xff] }
 0x274   : > { %v1766_v39 = vpop.permute.xlu0 %1765  ;;  %v1768_v40 = vpop.permute.xlu1 %1767 }
 0x275   : > { %1854 = vst.msk [vmem:[#allocation3 + $0x40] sm:$0xff] %vm1845_vm9, %v1766_v39  ;;  %1855 = vst.msk [vmem:[#allocation3 + $0x48] sm:$0xff] %vm1845_vm9, %v1768_v40 }
 0x276   : > { %2139 = vrot.lane.b32.xlu0 %v2073_v37, %s5516_s7  ;;  %2141 = vrot.lane.b32.xlu1 %v2074_v38, %s5516_s7  ;;  %v2266_v37 = vld [vmem:[#allocation2 + $0x49] sm:$0xff]  ;;  %v2267_v38 = vld [vmem:[#allocation2 + $0x51] sm:$0xff] }
 0x278   : > { %v1770_v43 = vpop.permute.xlu0 %1769  ;;  %v1772_v44 = vpop.permute.xlu1 %1771 }
 0x279   : > { %1856 = vst.msk [vmem:[#allocation3 + $0x50] sm:$0xff] %vm1845_vm9, %v1770_v43  ;;  %1857 = vst.msk [vmem:[#allocation3 + $0x58] sm:$0xff] %vm1845_vm9, %v1772_v44 }
 0x27a   : > { %2143 = vrot.lane.b32.xlu0 %v2075_v41, %s5516_s7  ;;  %2145 = vrot.lane.b32.xlu1 %v2076_v42, %s5516_s7  ;;  %v2268_v41 = vld [vmem:[#allocation2 + $0x61] sm:$0xff]  ;;  %v2269_v42 = vld [vmem:[#allocation2 + $0x69] sm:$0xff] }
 0x27c   : > { %v1774_v51 = vpop.permute.xlu0 %1773  ;;  %v1776_v52 = vpop.permute.xlu1 %1775 }
 0x27d   : > { %1858 = vst.msk [vmem:[#allocation3 + $0x60] sm:$0xff] %vm1845_vm9, %v1774_v51  ;;  %1859 = vst.msk [vmem:[#allocation3 + $0x68] sm:$0xff] %vm1845_vm9, %v1776_v52 }
 0x27e   : > { %2147 = vrot.lane.b32.xlu0 %v2077_v45, %s5516_s7  ;;  %2149 = vrot.lane.b32.xlu1 %v2078_v47, %s5516_s7  ;;  %v2270_v45 = vld [vmem:[#allocation2 + $0x79] sm:$0xff]  ;;  %v2271_v47 = vld [vmem:[#allocation2 + $0x81] sm:$0xff] }
 0x280   : > { %v1778_v3 = vpop.permute.xlu0 %1777  ;;  %v1780_v4 = vpop.permute.xlu1 %1779 }
 0x281   : > { %1860 = vst.msk [vmem:[#allocation3 + $0x70] sm:$0xff] %vm1845_vm9, %v1778_v3  ;;  %1861 = vst.msk [vmem:[#allocation3 + $0x78] sm:$0xff] %vm1845_vm9, %v1780_v4 }
 0x282   : > { %2151 = vrot.lane.b32.xlu0 %v2079_v59, %s5516_s7  ;;  %2153 = vrot.lane.b32.xlu1 %v2080_v60, %s5516_s7  ;;  %v2272_v59 = vld [vmem:[#allocation2 + $0x91] sm:$0xff]  ;;  %v2273_v60 = vld [vmem:[#allocation2 + $0x99] sm:$0xff] }
 0x284   : > { %v1782_v19 = vpop.permute.xlu0 %1781  ;;  %v1784_v20 = vpop.permute.xlu1 %1783 }
 0x285   : > { %1862 = vst.msk [vmem:[#allocation3 + $0x80] sm:$0xff] %vm1845_vm9, %v1782_v19  ;;  %1863 = vst.msk [vmem:[#allocation3 + $0x88] sm:$0xff] %vm1845_vm9, %v1784_v20 }
 0x286   : > { %2155 = vrot.lane.b32.xlu0 %v2081_v11, %s5516_s7  ;;  %2157 = vrot.lane.b32.xlu1 %v2082_v12, %s5516_s7  ;;  %v2274_v11 = vld [vmem:[#allocation2 + $0xa9] sm:$0xff]  ;;  %v2275_v12 = vld [vmem:[#allocation2 + $0xb1] sm:$0xff] }
 0x288   : > { %v1786_v25 = vpop.permute.xlu0 %1785  ;;  %v1788_v26 = vpop.permute.xlu1 %1787 }
 0x289   : > { %1864 = vst.msk [vmem:[#allocation3 + $0x90] sm:$0xff] %vm1845_vm9, %v1786_v25  ;;  %1865 = vst.msk [vmem:[#allocation3 + $0x98] sm:$0xff] %vm1845_vm9, %v1788_v26 }
 0x28a   : > { %2159 = vrot.lane.b32.xlu0 %v2083_v23, %s5516_s7  ;;  %2161 = vrot.lane.b32.xlu1 %v2084_v24, %s5516_s7  ;;  %v2276_v23 = vld [vmem:[#allocation2 + $0xc1] sm:$0xff]  ;;  %v2277_v24 = vld [vmem:[#allocation2 + $0xc9] sm:$0xff] }
 0x28c   : > { %v1790_v29 = vpop.permute.xlu0 %1789  ;;  %v1792_v30 = vpop.permute.xlu1 %1791 }
 0x28d   : > { %1866 = vst.msk [vmem:[#allocation3 + $0xa0] sm:$0xff] %vm1845_vm9, %v1790_v29  ;;  %1867 = vst.msk [vmem:[#allocation3 + $0xa8] sm:$0xff] %vm1845_vm9, %v1792_v30 }
 0x28e   : > { %2163 = vrot.lane.b32.xlu0 %v2085_v27, %s5516_s7  ;;  %2165 = vrot.lane.b32.xlu1 %v2086_v28, %s5516_s7  ;;  %v2278_v27 = vld [vmem:[#allocation2 + $0xd9] sm:$0xff]  ;;  %v2279_v28 = vld [vmem:[#allocation2 + $0xe1] sm:$0xff] }
 0x290   : > { %v1794_v46 = vpop.permute.xlu0 %1793  ;;  %v1796_v48 = vpop.permute.xlu1 %1795 }
 0x291   : > { %1868 = vst.msk [vmem:[#allocation3 + $0xb0] sm:$0xff] %vm1845_vm9, %v1794_v46  ;;  %1869 = vst.msk [vmem:[#allocation3 + $0xb8] sm:$0xff] %vm1845_vm9, %v1796_v48 }
 0x292   : > { %2167 = vrot.lane.b32.xlu0 %v2087_v31, %s5516_s7  ;;  %2169 = vrot.lane.b32.xlu1 %v2088_v32, %s5516_s7  ;;  %v2280_v31 = vld [vmem:[#allocation2 + $0xf1] sm:$0xff]  ;;  %v2281_v32 = vld [vmem:[#allocation2 + $0xf9] sm:$0xff] }
 0x294   : > { %v1798_v53 = vpop.permute.xlu0 %1797  ;;  %v1800_v54 = vpop.permute.xlu1 %1799 }
 0x295   : > { %1870 = vst.msk [vmem:[#allocation3 + $0xc0] sm:$0xff] %vm1845_vm9, %v1798_v53  ;;  %1871 = vst.msk [vmem:[#allocation3 + $0xc8] sm:$0xff] %vm1845_vm9, %v1800_v54 }
 0x296   : > { %2171 = vrot.lane.b32.xlu0 %v2089_v49, %s5516_s7  ;;  %2173 = vrot.lane.b32.xlu1 %v2090_v50, %s5516_s7  ;;  %v2282_v49 = vld [vmem:[#allocation2 + $0x109] sm:$0xff]  ;;  %v2283_v50 = vld [vmem:[#allocation2 + $0x111] sm:$0xff] }
 0x298   : > { %v1802_v57 = vpop.permute.xlu0 %1801  ;;  %v1804_v58 = vpop.permute.xlu1 %1803 }
 0x299   : > { %1872 = vst.msk [vmem:[#allocation3 + $0xd0] sm:$0xff] %vm1845_vm9, %v1802_v57  ;;  %1873 = vst.msk [vmem:[#allocation3 + $0xd8] sm:$0xff] %vm1845_vm9, %v1804_v58 }
 0x29a   : > { %2175 = vrot.lane.b32.xlu0 %v2091_v55, %s5516_s7  ;;  %2177 = vrot.lane.b32.xlu1 %v2092_v56, %s5516_s7  ;;  %v2284_v55 = vld [vmem:[#allocation2 + $0x121] sm:$0xff]  ;;  %v2285_v56 = vld [vmem:[#allocation2 + $0x129] sm:$0xff] }
 0x29c   : > { %v1806_v63 = vpop.permute.xlu0 %1805  ;;  %v1808_v0 = vpop.permute.xlu1 %1807 }
 0x29d   : > { %1874 = vst.msk [vmem:[#allocation3 + $0xe0] sm:$0xff] %vm1845_vm9, %v1806_v63  ;;  %1875 = vst.msk [vmem:[#allocation3 + $0xe8] sm:$0xff] %vm1845_vm9, %v1808_v0 }
 0x29e   : > { %2179 = vrot.lane.b32.xlu0 %v2093_v61, %s5516_s7  ;;  %2181 = vrot.lane.b32.xlu1 %v2094_v62, %s5516_s7  ;;  %v2286_v61 = vld [vmem:[#allocation2 + $0x139] sm:$0xff]  ;;  %v2287_v62 = vld [vmem:[#allocation2 + $0x141] sm:$0xff] }
 0x2a0   : > { %v1810_v5 = vpop.permute.xlu0 %1809  ;;  %v1812_v6 = vpop.permute.xlu1 %1811 }
 0x2a1   : > { %1876 = vst.msk [vmem:[#allocation3 + $0xf0] sm:$0xff] %vm1845_vm9, %v1810_v5  ;;  %1877 = vst.msk [vmem:[#allocation3 + $0xf8] sm:$0xff] %vm1845_vm9, %v1812_v6  ;;  %vm4935_vm9 = vcmask 613952  }
 0x2a2   : > { %2183 = vrot.lane.b32.xlu0 %v2095_v1, %s5516_s7  ;;  %2185 = vrot.lane.b32.xlu1 %v2096_v2, %s5516_s7  ;;  %v2288_v1 = vld [vmem:[#allocation2 + $0x151] sm:$0xff]  ;;  %v2289_v2 = vld [vmem:[#allocation2 + $0x159] sm:$0xff] }
 0x2a4   : > { %v1943_v9 = vpop.permute.xlu0 %1942  ;;  %v1945_v10 = vpop.permute.xlu1 %1944 }
 0x2a5   : > { %2039 = vst.msk [vmem:[#allocation3] sm:$0xff] %vm2038_vm10, %v1943_v9  ;;  %2040 = vst.msk [vmem:[#allocation3 + $0x8] sm:$0xff] %vm2038_vm10, %v1945_v10 }
 0x2a6   : > { %2187 = vrot.lane.b32.xlu0 %v2097_v7, %s5516_s7  ;;  %2189 = vrot.lane.b32.xlu1 %v2098_v8, %s5516_s7  ;;  %v2290_v7 = vld [vmem:[#allocation2 + $0x169] sm:$0xff]  ;;  %v2291_v8 = vld [vmem:[#allocation2 + $0x171] sm:$0xff] }
 0x2a8   : > { %v1947_v15 = vpop.permute.xlu0 %1946  ;;  %v1949_v16 = vpop.permute.xlu1 %1948 }
 0x2a9   : > { %2041 = vst.msk [vmem:[#allocation3 + $0x10] sm:$0xff] %vm2038_vm10, %v1947_v15  ;;  %2042 = vst.msk [vmem:[#allocation3 + $0x18] sm:$0xff] %vm2038_vm10, %v1949_v16 }
 0x2aa   : > { %2191 = vrot.lane.b32.xlu0 %v2099_v13, %s5516_s7  ;;  %2193 = vrot.lane.b32.xlu1 %v2100_v14, %s5516_s7  ;;  %v2292_v13 = vld [vmem:[#allocation2 + $0x181] sm:$0xff]  ;;  %v2293_v14 = vld [vmem:[#allocation2 + $0x189] sm:$0xff] }
 0x2ac   : > { %v1951_v17 = vpop.permute.xlu0 %1950  ;;  %v1953_v18 = vpop.permute.xlu1 %1952 }
 0x2ad   : > { %2043 = vst.msk [vmem:[#allocation3 + $0x20] sm:$0xff] %vm2038_vm10, %v1951_v17  ;;  %2044 = vst.msk [vmem:[#allocation3 + $0x28] sm:$0xff] %vm2038_vm10, %v1953_v18 }
 0x2ae   : > { %2195 = vrot.lane.b32.xlu0 %v2101_v33, %s5516_s7  ;;  %2197 = vrot.lane.b32.xlu1 %v2102_v34, %s5516_s7  ;;  %v2294_v33 = vld [vmem:[#allocation2 + $0x199] sm:$0xff]  ;;  %v2295_v34 = vld [vmem:[#allocation2 + $0x1a1] sm:$0xff]  ;;  %s134_s7 = sand.u32 1, %s5496_s10  }
 0x2b0   : > { %v1955_v21 = vpop.permute.xlu0 %1954  ;;  %v1957_v22 = vpop.permute.xlu1 %1956 }
 0x2b1   : > { %2045 = vst.msk [vmem:[#allocation3 + $0x30] sm:$0xff] %vm2038_vm10, %v1955_v21  ;;  %2046 = vst.msk [vmem:[#allocation3 + $0x38] sm:$0xff] %vm2038_vm10, %v1957_v22 }
 0x2b2   : > { %2328 = vrot.lane.b32.xlu0 %v2264_v35, %s5517_s8  ;;  %2330 = vrot.lane.b32.xlu1 %v2265_v36, %s5517_s8  ;;  %v2457_v35 = vld [vmem:[#allocation2 + $0x32] sm:$0xff]  ;;  %v2458_v36 = vld [vmem:[#allocation2 + $0x3a] sm:$0xff] }
 0x2b4   : > { %v1959_v39 = vpop.permute.xlu0 %1958  ;;  %v1961_v40 = vpop.permute.xlu1 %1960 }
 0x2b5   : > { %2047 = vst.msk [vmem:[#allocation3 + $0x40] sm:$0xff] %vm2038_vm10, %v1959_v39  ;;  %2048 = vst.msk [vmem:[#allocation3 + $0x48] sm:$0xff] %vm2038_vm10, %v1961_v40 }
 0x2b6   : > { %2332 = vrot.lane.b32.xlu0 %v2266_v37, %s5517_s8  ;;  %2334 = vrot.lane.b32.xlu1 %v2267_v38, %s5517_s8  ;;  %v2459_v37 = vld [vmem:[#allocation2 + $0x4a] sm:$0xff]  ;;  %v2460_v38 = vld [vmem:[#allocation2 + $0x52] sm:$0xff] }
 0x2b8   : > { %v1963_v43 = vpop.permute.xlu0 %1962  ;;  %v1965_v44 = vpop.permute.xlu1 %1964 }
 0x2b9   : > { %2049 = vst.msk [vmem:[#allocation3 + $0x50] sm:$0xff] %vm2038_vm10, %v1963_v43  ;;  %2050 = vst.msk [vmem:[#allocation3 + $0x58] sm:$0xff] %vm2038_vm10, %v1965_v44 }
 0x2ba   : > { %2336 = vrot.lane.b32.xlu0 %v2268_v41, %s5517_s8  ;;  %2338 = vrot.lane.b32.xlu1 %v2269_v42, %s5517_s8  ;;  %v2461_v41 = vld [vmem:[#allocation2 + $0x62] sm:$0xff]  ;;  %v2462_v42 = vld [vmem:[#allocation2 + $0x6a] sm:$0xff] }
 0x2bc   : > { %v1967_v51 = vpop.permute.xlu0 %1966  ;;  %v1969_v52 = vpop.permute.xlu1 %1968 }
 0x2bd   : > { %2051 = vst.msk [vmem:[#allocation3 + $0x60] sm:$0xff] %vm2038_vm10, %v1967_v51  ;;  %2052 = vst.msk [vmem:[#allocation3 + $0x68] sm:$0xff] %vm2038_vm10, %v1969_v52 }
 0x2be   : > { %2340 = vrot.lane.b32.xlu0 %v2270_v45, %s5517_s8  ;;  %2342 = vrot.lane.b32.xlu1 %v2271_v47, %s5517_s8  ;;  %v2463_v45 = vld [vmem:[#allocation2 + $0x7a] sm:$0xff]  ;;  %v2464_v47 = vld [vmem:[#allocation2 + $0x82] sm:$0xff] }
 0x2c0   : > { %v1971_v3 = vpop.permute.xlu0 %1970  ;;  %v1973_v4 = vpop.permute.xlu1 %1972 }
 0x2c1   : > { %2053 = vst.msk [vmem:[#allocation3 + $0x70] sm:$0xff] %vm2038_vm10, %v1971_v3  ;;  %2054 = vst.msk [vmem:[#allocation3 + $0x78] sm:$0xff] %vm2038_vm10, %v1973_v4 }
 0x2c2   : > { %2344 = vrot.lane.b32.xlu0 %v2272_v59, %s5517_s8  ;;  %2346 = vrot.lane.b32.xlu1 %v2273_v60, %s5517_s8  ;;  %v2465_v59 = vld [vmem:[#allocation2 + $0x92] sm:$0xff]  ;;  %v2466_v60 = vld [vmem:[#allocation2 + $0x9a] sm:$0xff] }
 0x2c4   : > { %v1975_v19 = vpop.permute.xlu0 %1974  ;;  %v1977_v20 = vpop.permute.xlu1 %1976 }
 0x2c5   : > { %2055 = vst.msk [vmem:[#allocation3 + $0x80] sm:$0xff] %vm2038_vm10, %v1975_v19  ;;  %2056 = vst.msk [vmem:[#allocation3 + $0x88] sm:$0xff] %vm2038_vm10, %v1977_v20 }
 0x2c6   : > { %2348 = vrot.lane.b32.xlu0 %v2274_v11, %s5517_s8  ;;  %2350 = vrot.lane.b32.xlu1 %v2275_v12, %s5517_s8  ;;  %v2467_v11 = vld [vmem:[#allocation2 + $0xaa] sm:$0xff]  ;;  %v2468_v12 = vld [vmem:[#allocation2 + $0xb2] sm:$0xff] }
 0x2c8   : > { %v1979_v25 = vpop.permute.xlu0 %1978  ;;  %v1981_v26 = vpop.permute.xlu1 %1980 }
 0x2c9   : > { %2057 = vst.msk [vmem:[#allocation3 + $0x90] sm:$0xff] %vm2038_vm10, %v1979_v25  ;;  %2058 = vst.msk [vmem:[#allocation3 + $0x98] sm:$0xff] %vm2038_vm10, %v1981_v26 }
 0x2ca   : > { %2352 = vrot.lane.b32.xlu0 %v2276_v23, %s5517_s8  ;;  %2354 = vrot.lane.b32.xlu1 %v2277_v24, %s5517_s8  ;;  %v2469_v23 = vld [vmem:[#allocation2 + $0xc2] sm:$0xff]  ;;  %v2470_v24 = vld [vmem:[#allocation2 + $0xca] sm:$0xff] }
 0x2cc   : > { %v1983_v29 = vpop.permute.xlu0 %1982  ;;  %v1985_v30 = vpop.permute.xlu1 %1984 }
 0x2cd   : > { %2059 = vst.msk [vmem:[#allocation3 + $0xa0] sm:$0xff] %vm2038_vm10, %v1983_v29  ;;  %2060 = vst.msk [vmem:[#allocation3 + $0xa8] sm:$0xff] %vm2038_vm10, %v1985_v30 }
 0x2ce   : > { %2356 = vrot.lane.b32.xlu0 %v2278_v27, %s5517_s8  ;;  %2358 = vrot.lane.b32.xlu1 %v2279_v28, %s5517_s8  ;;  %v2471_v27 = vld [vmem:[#allocation2 + $0xda] sm:$0xff]  ;;  %v2472_v28 = vld [vmem:[#allocation2 + $0xe2] sm:$0xff] }
 0x2d0   : > { %v1987_v46 = vpop.permute.xlu0 %1986  ;;  %v1989_v48 = vpop.permute.xlu1 %1988 }
 0x2d1   : > { %2061 = vst.msk [vmem:[#allocation3 + $0xb0] sm:$0xff] %vm2038_vm10, %v1987_v46  ;;  %2062 = vst.msk [vmem:[#allocation3 + $0xb8] sm:$0xff] %vm2038_vm10, %v1989_v48 }
 0x2d2   : > { %2360 = vrot.lane.b32.xlu0 %v2280_v31, %s5517_s8  ;;  %2362 = vrot.lane.b32.xlu1 %v2281_v32, %s5517_s8  ;;  %v2473_v31 = vld [vmem:[#allocation2 + $0xf2] sm:$0xff]  ;;  %v2474_v32 = vld [vmem:[#allocation2 + $0xfa] sm:$0xff] }
 0x2d4   : > { %v1991_v53 = vpop.permute.xlu0 %1990  ;;  %v1993_v54 = vpop.permute.xlu1 %1992 }
 0x2d5   : > { %2063 = vst.msk [vmem:[#allocation3 + $0xc0] sm:$0xff] %vm2038_vm10, %v1991_v53  ;;  %2064 = vst.msk [vmem:[#allocation3 + $0xc8] sm:$0xff] %vm2038_vm10, %v1993_v54 }
 0x2d6   : > { %2364 = vrot.lane.b32.xlu0 %v2282_v49, %s5517_s8  ;;  %2366 = vrot.lane.b32.xlu1 %v2283_v50, %s5517_s8  ;;  %v2475_v49 = vld [vmem:[#allocation2 + $0x10a] sm:$0xff]  ;;  %v2476_v50 = vld [vmem:[#allocation2 + $0x112] sm:$0xff] }
 0x2d8   : > { %v1995_v57 = vpop.permute.xlu0 %1994  ;;  %v1997_v58 = vpop.permute.xlu1 %1996 }
 0x2d9   : > { %2065 = vst.msk [vmem:[#allocation3 + $0xd0] sm:$0xff] %vm2038_vm10, %v1995_v57  ;;  %2066 = vst.msk [vmem:[#allocation3 + $0xd8] sm:$0xff] %vm2038_vm10, %v1997_v58 }
 0x2da   : > { %2368 = vrot.lane.b32.xlu0 %v2284_v55, %s5517_s8  ;;  %2370 = vrot.lane.b32.xlu1 %v2285_v56, %s5517_s8  ;;  %v2477_v55 = vld [vmem:[#allocation2 + $0x122] sm:$0xff]  ;;  %v2478_v56 = vld [vmem:[#allocation2 + $0x12a] sm:$0xff] }
 0x2dc   : > { %v1999_v63 = vpop.permute.xlu0 %1998  ;;  %v2001_v0 = vpop.permute.xlu1 %2000 }
 0x2dd   : > { %2067 = vst.msk [vmem:[#allocation3 + $0xe0] sm:$0xff] %vm2038_vm10, %v1999_v63  ;;  %2068 = vst.msk [vmem:[#allocation3 + $0xe8] sm:$0xff] %vm2038_vm10, %v2001_v0 }
 0x2de   : > { %2372 = vrot.lane.b32.xlu0 %v2286_v61, %s5517_s8  ;;  %2374 = vrot.lane.b32.xlu1 %v2287_v62, %s5517_s8  ;;  %v2479_v61 = vld [vmem:[#allocation2 + $0x13a] sm:$0xff]  ;;  %v2480_v62 = vld [vmem:[#allocation2 + $0x142] sm:$0xff] }
 0x2e0   : > { %v2003_v5 = vpop.permute.xlu0 %2002  ;;  %v2005_v6 = vpop.permute.xlu1 %2004 }
 0x2e1   : > { %2069 = vst.msk [vmem:[#allocation3 + $0xf0] sm:$0xff] %vm2038_vm10, %v2003_v5  ;;  %2070 = vst.msk [vmem:[#allocation3 + $0xf8] sm:$0xff] %vm2038_vm10, %v2005_v6  ;;  %vm5002_vm10 = vcmask 613376  }
 0x2e2   : > { %2376 = vrot.lane.b32.xlu0 %v2288_v1, %s5517_s8  ;;  %2378 = vrot.lane.b32.xlu1 %v2289_v2, %s5517_s8  ;;  %v2481_v1 = vld [vmem:[#allocation2 + $0x152] sm:$0xff]  ;;  %v2482_v2 = vld [vmem:[#allocation2 + $0x15a] sm:$0xff] }
 0x2e4   : > { %v2136_v9 = vpop.permute.xlu0 %2135  ;;  %v2138_v10 = vpop.permute.xlu1 %2137 }
 0x2e5   : > { %2232 = vst.msk [vmem:[#allocation3] sm:$0xff] %vm2231_vm11, %v2136_v9  ;;  %2233 = vst.msk [vmem:[#allocation3 + $0x8] sm:$0xff] %vm2231_vm11, %v2138_v10 }
 0x2e6   : > { %2380 = vrot.lane.b32.xlu0 %v2290_v7, %s5517_s8  ;;  %2382 = vrot.lane.b32.xlu1 %v2291_v8, %s5517_s8  ;;  %v2483_v7 = vld [vmem:[#allocation2 + $0x16a] sm:$0xff]  ;;  %v2484_v8 = vld [vmem:[#allocation2 + $0x172] sm:$0xff] }
 0x2e8   : > { %v2140_v15 = vpop.permute.xlu0 %2139  ;;  %v2142_v16 = vpop.permute.xlu1 %2141 }
 0x2e9   : > { %2234 = vst.msk [vmem:[#allocation3 + $0x10] sm:$0xff] %vm2231_vm11, %v2140_v15  ;;  %2235 = vst.msk [vmem:[#allocation3 + $0x18] sm:$0xff] %vm2231_vm11, %v2142_v16 }
 0x2ea   : > { %2384 = vrot.lane.b32.xlu0 %v2292_v13, %s5517_s8  ;;  %2386 = vrot.lane.b32.xlu1 %v2293_v14, %s5517_s8  ;;  %v2485_v13 = vld [vmem:[#allocation2 + $0x182] sm:$0xff]  ;;  %v2486_v14 = vld [vmem:[#allocation2 + $0x18a] sm:$0xff] }
 0x2ec   : > { %v2144_v17 = vpop.permute.xlu0 %2143  ;;  %v2146_v18 = vpop.permute.xlu1 %2145 }
 0x2ed   : > { %2236 = vst.msk [vmem:[#allocation3 + $0x20] sm:$0xff] %vm2231_vm11, %v2144_v17  ;;  %2237 = vst.msk [vmem:[#allocation3 + $0x28] sm:$0xff] %vm2231_vm11, %v2146_v18 }
 0x2ee   : > { %2388 = vrot.lane.b32.xlu0 %v2294_v33, %s5517_s8  ;;  %2390 = vrot.lane.b32.xlu1 %v2295_v34, %s5517_s8  ;;  %v2487_v33 = vld [vmem:[#allocation2 + $0x19a] sm:$0xff]  ;;  %v2488_v34 = vld [vmem:[#allocation2 + $0x1a2] sm:$0xff]  ;;  %s5266_s8 = sshll.u32 %s134_s7, 5 }
 0x2f0   : > { %v2148_v21 = vpop.permute.xlu0 %2147  ;;  %v2150_v22 = vpop.permute.xlu1 %2149 }
 0x2f1   : > { %2238 = vst.msk [vmem:[#allocation3 + $0x30] sm:$0xff] %vm2231_vm11, %v2148_v21  ;;  %2239 = vst.msk [vmem:[#allocation3 + $0x38] sm:$0xff] %vm2231_vm11, %v2150_v22 }
 0x2f2   : > { %2521 = vrot.lane.b32.xlu0 %v2457_v35, %s5518_s14  ;;  %2523 = vrot.lane.b32.xlu1 %v2458_v36, %s5518_s14  ;;  %v2650_v35 = vld [vmem:[#allocation2 + $0x33] sm:$0xff]  ;;  %v2651_v36 = vld [vmem:[#allocation2 + $0x3b] sm:$0xff] }
 0x2f4   : > { %v2152_v39 = vpop.permute.xlu0 %2151  ;;  %v2154_v40 = vpop.permute.xlu1 %2153 }
 0x2f5   : > { %2240 = vst.msk [vmem:[#allocation3 + $0x40] sm:$0xff] %vm2231_vm11, %v2152_v39  ;;  %2241 = vst.msk [vmem:[#allocation3 + $0x48] sm:$0xff] %vm2231_vm11, %v2154_v40 }
 0x2f6   : > { %2525 = vrot.lane.b32.xlu0 %v2459_v37, %s5518_s14  ;;  %2527 = vrot.lane.b32.xlu1 %v2460_v38, %s5518_s14  ;;  %v2652_v37 = vld [vmem:[#allocation2 + $0x4b] sm:$0xff]  ;;  %v2653_v38 = vld [vmem:[#allocation2 + $0x53] sm:$0xff] }
 0x2f8   : > { %v2156_v43 = vpop.permute.xlu0 %2155  ;;  %v2158_v44 = vpop.permute.xlu1 %2157 }
 0x2f9   : > { %2242 = vst.msk [vmem:[#allocation3 + $0x50] sm:$0xff] %vm2231_vm11, %v2156_v43  ;;  %2243 = vst.msk [vmem:[#allocation3 + $0x58] sm:$0xff] %vm2231_vm11, %v2158_v44 }
 0x2fa   : > { %2529 = vrot.lane.b32.xlu0 %v2461_v41, %s5518_s14  ;;  %2531 = vrot.lane.b32.xlu1 %v2462_v42, %s5518_s14  ;;  %v2654_v41 = vld [vmem:[#allocation2 + $0x63] sm:$0xff]  ;;  %v2655_v42 = vld [vmem:[#allocation2 + $0x6b] sm:$0xff] }
 0x2fc   : > { %v2160_v51 = vpop.permute.xlu0 %2159  ;;  %v2162_v52 = vpop.permute.xlu1 %2161 }
 0x2fd   : > { %2244 = vst.msk [vmem:[#allocation3 + $0x60] sm:$0xff] %vm2231_vm11, %v2160_v51  ;;  %2245 = vst.msk [vmem:[#allocation3 + $0x68] sm:$0xff] %vm2231_vm11, %v2162_v52 }
 0x2fe   : > { %2533 = vrot.lane.b32.xlu0 %v2463_v45, %s5518_s14  ;;  %2535 = vrot.lane.b32.xlu1 %v2464_v47, %s5518_s14  ;;  %v2656_v45 = vld [vmem:[#allocation2 + $0x7b] sm:$0xff]  ;;  %v2657_v47 = vld [vmem:[#allocation2 + $0x83] sm:$0xff] }
 0x300   : > { %v2164_v3 = vpop.permute.xlu0 %2163  ;;  %v2166_v4 = vpop.permute.xlu1 %2165 }
 0x301   : > { %2246 = vst.msk [vmem:[#allocation3 + $0x70] sm:$0xff] %vm2231_vm11, %v2164_v3  ;;  %2247 = vst.msk [vmem:[#allocation3 + $0x78] sm:$0xff] %vm2231_vm11, %v2166_v4 }
 0x302   : > { %2537 = vrot.lane.b32.xlu0 %v2465_v59, %s5518_s14  ;;  %2539 = vrot.lane.b32.xlu1 %v2466_v60, %s5518_s14  ;;  %v2658_v59 = vld [vmem:[#allocation2 + $0x93] sm:$0xff]  ;;  %v2659_v60 = vld [vmem:[#allocation2 + $0x9b] sm:$0xff] }
 0x304   : > { %v2168_v19 = vpop.permute.xlu0 %2167  ;;  %v2170_v20 = vpop.permute.xlu1 %2169 }
 0x305   : > { %2248 = vst.msk [vmem:[#allocation3 + $0x80] sm:$0xff] %vm2231_vm11, %v2168_v19  ;;  %2249 = vst.msk [vmem:[#allocation3 + $0x88] sm:$0xff] %vm2231_vm11, %v2170_v20 }
 0x306   : > { %2541 = vrot.lane.b32.xlu0 %v2467_v11, %s5518_s14  ;;  %2543 = vrot.lane.b32.xlu1 %v2468_v12, %s5518_s14  ;;  %v2660_v11 = vld [vmem:[#allocation2 + $0xab] sm:$0xff]  ;;  %v2661_v12 = vld [vmem:[#allocation2 + $0xb3] sm:$0xff] }
 0x308   : > { %v2172_v25 = vpop.permute.xlu0 %2171  ;;  %v2174_v26 = vpop.permute.xlu1 %2173 }
 0x309   : > { %2250 = vst.msk [vmem:[#allocation3 + $0x90] sm:$0xff] %vm2231_vm11, %v2172_v25  ;;  %2251 = vst.msk [vmem:[#allocation3 + $0x98] sm:$0xff] %vm2231_vm11, %v2174_v26 }
 0x30a   : > { %2545 = vrot.lane.b32.xlu0 %v2469_v23, %s5518_s14  ;;  %2547 = vrot.lane.b32.xlu1 %v2470_v24, %s5518_s14  ;;  %v2662_v23 = vld [vmem:[#allocation2 + $0xc3] sm:$0xff]  ;;  %v2663_v24 = vld [vmem:[#allocation2 + $0xcb] sm:$0xff] }
 0x30c   : > { %v2176_v29 = vpop.permute.xlu0 %2175  ;;  %v2178_v30 = vpop.permute.xlu1 %2177 }
 0x30d   : > { %2252 = vst.msk [vmem:[#allocation3 + $0xa0] sm:$0xff] %vm2231_vm11, %v2176_v29  ;;  %2253 = vst.msk [vmem:[#allocation3 + $0xa8] sm:$0xff] %vm2231_vm11, %v2178_v30 }
 0x30e   : > { %2549 = vrot.lane.b32.xlu0 %v2471_v27, %s5518_s14  ;;  %2551 = vrot.lane.b32.xlu1 %v2472_v28, %s5518_s14  ;;  %v2664_v27 = vld [vmem:[#allocation2 + $0xdb] sm:$0xff]  ;;  %v2665_v28 = vld [vmem:[#allocation2 + $0xe3] sm:$0xff] }
 0x310   : > { %v2180_v46 = vpop.permute.xlu0 %2179  ;;  %v2182_v48 = vpop.permute.xlu1 %2181 }
 0x311   : > { %2254 = vst.msk [vmem:[#allocation3 + $0xb0] sm:$0xff] %vm2231_vm11, %v2180_v46  ;;  %2255 = vst.msk [vmem:[#allocation3 + $0xb8] sm:$0xff] %vm2231_vm11, %v2182_v48 }
 0x312   : > { %2553 = vrot.lane.b32.xlu0 %v2473_v31, %s5518_s14  ;;  %2555 = vrot.lane.b32.xlu1 %v2474_v32, %s5518_s14  ;;  %v2666_v31 = vld [vmem:[#allocation2 + $0xf3] sm:$0xff]  ;;  %v2667_v32 = vld [vmem:[#allocation2 + $0xfb] sm:$0xff] }
 0x314   : > { %v2184_v53 = vpop.permute.xlu0 %2183  ;;  %v2186_v54 = vpop.permute.xlu1 %2185 }
 0x315   : > { %2256 = vst.msk [vmem:[#allocation3 + $0xc0] sm:$0xff] %vm2231_vm11, %v2184_v53  ;;  %2257 = vst.msk [vmem:[#allocation3 + $0xc8] sm:$0xff] %vm2231_vm11, %v2186_v54 }
 0x316   : > { %2557 = vrot.lane.b32.xlu0 %v2475_v49, %s5518_s14  ;;  %2559 = vrot.lane.b32.xlu1 %v2476_v50, %s5518_s14  ;;  %v2668_v49 = vld [vmem:[#allocation2 + $0x10b] sm:$0xff]  ;;  %v2669_v50 = vld [vmem:[#allocation2 + $0x113] sm:$0xff] }
 0x318   : > { %v2188_v57 = vpop.permute.xlu0 %2187  ;;  %v2190_v58 = vpop.permute.xlu1 %2189 }
 0x319   : > { %2258 = vst.msk [vmem:[#allocation3 + $0xd0] sm:$0xff] %vm2231_vm11, %v2188_v57  ;;  %2259 = vst.msk [vmem:[#allocation3 + $0xd8] sm:$0xff] %vm2231_vm11, %v2190_v58 }
 0x31a   : > { %2561 = vrot.lane.b32.xlu0 %v2477_v55, %s5518_s14  ;;  %2563 = vrot.lane.b32.xlu1 %v2478_v56, %s5518_s14  ;;  %v2670_v55 = vld [vmem:[#allocation2 + $0x123] sm:$0xff]  ;;  %v2671_v56 = vld [vmem:[#allocation2 + $0x12b] sm:$0xff] }
 0x31c   : > { %v2192_v63 = vpop.permute.xlu0 %2191  ;;  %v2194_v0 = vpop.permute.xlu1 %2193 }
 0x31d   : > { %2260 = vst.msk [vmem:[#allocation3 + $0xe0] sm:$0xff] %vm2231_vm11, %v2192_v63  ;;  %2261 = vst.msk [vmem:[#allocation3 + $0xe8] sm:$0xff] %vm2231_vm11, %v2194_v0 }
 0x31e   : > { %2565 = vrot.lane.b32.xlu0 %v2479_v61, %s5518_s14  ;;  %2567 = vrot.lane.b32.xlu1 %v2480_v62, %s5518_s14  ;;  %v2672_v61 = vld [vmem:[#allocation2 + $0x13b] sm:$0xff]  ;;  %v2673_v62 = vld [vmem:[#allocation2 + $0x143] sm:$0xff] }
 0x320   : > { %v2196_v5 = vpop.permute.xlu0 %2195  ;;  %v2198_v6 = vpop.permute.xlu1 %2197 }
 0x321   : > { %2262 = vst.msk [vmem:[#allocation3 + $0xf0] sm:$0xff] %vm2231_vm11, %v2196_v5  ;;  %2263 = vst.msk [vmem:[#allocation3 + $0xf8] sm:$0xff] %vm2231_vm11, %v2198_v6 }
 0x322   : > { %2569 = vrot.lane.b32.xlu0 %v2481_v1, %s5518_s14  ;;  %2571 = vrot.lane.b32.xlu1 %v2482_v2, %s5518_s14  ;;  %v2674_v1 = vld [vmem:[#allocation2 + $0x153] sm:$0xff]  ;;  %v2675_v2 = vld [vmem:[#allocation2 + $0x15b] sm:$0xff] }
 0x324   : > { %v2329_v9 = vpop.permute.xlu0 %2328  ;;  %v2331_v10 = vpop.permute.xlu1 %2330 }
 0x325   : > { %2425 = vst.msk [vmem:[#allocation3] sm:$0xff] %vm2424_vm12, %v2329_v9  ;;  %2426 = vst.msk [vmem:[#allocation3 + $0x8] sm:$0xff] %vm2424_vm12, %v2331_v10 }
 0x326   : > { %2573 = vrot.lane.b32.xlu0 %v2483_v7, %s5518_s14  ;;  %2575 = vrot.lane.b32.xlu1 %v2484_v8, %s5518_s14  ;;  %v2676_v7 = vld [vmem:[#allocation2 + $0x16b] sm:$0xff]  ;;  %v2677_v8 = vld [vmem:[#allocation2 + $0x173] sm:$0xff] }
 0x328   : > { %v2333_v15 = vpop.permute.xlu0 %2332  ;;  %v2335_v16 = vpop.permute.xlu1 %2334 }
 0x329   : > { %2427 = vst.msk [vmem:[#allocation3 + $0x10] sm:$0xff] %vm2424_vm12, %v2333_v15  ;;  %2428 = vst.msk [vmem:[#allocation3 + $0x18] sm:$0xff] %vm2424_vm12, %v2335_v16 }
 0x32a   : > { %2577 = vrot.lane.b32.xlu0 %v2485_v13, %s5518_s14  ;;  %2579 = vrot.lane.b32.xlu1 %v2486_v14, %s5518_s14  ;;  %v2678_v13 = vld [vmem:[#allocation2 + $0x183] sm:$0xff]  ;;  %v2679_v14 = vld [vmem:[#allocation2 + $0x18b] sm:$0xff] }
 0x32c   : > { %v2337_v17 = vpop.permute.xlu0 %2336  ;;  %v2339_v18 = vpop.permute.xlu1 %2338 }
 0x32d   : > { %2429 = vst.msk [vmem:[#allocation3 + $0x20] sm:$0xff] %vm2424_vm12, %v2337_v17  ;;  %2430 = vst.msk [vmem:[#allocation3 + $0x28] sm:$0xff] %vm2424_vm12, %v2339_v18 }
 0x32e   : > { %2581 = vrot.lane.b32.xlu0 %v2487_v33, %s5518_s14  ;;  %2583 = vrot.lane.b32.xlu1 %v2488_v34, %s5518_s14  ;;  %v2680_v33 = vld [vmem:[#allocation2 + $0x19b] sm:$0xff]  ;;  %v2681_v34 = vld [vmem:[#allocation2 + $0x1a3] sm:$0xff]  ;;  %s136_s14 = scalar_lea.vmem [#allocation4], %s5266_s8 }
 0x330   : > { %v2341_v21 = vpop.permute.xlu0 %2340  ;;  %v2343_v22 = vpop.permute.xlu1 %2342 }
 0x331   : > { %2431 = vst.msk [vmem:[#allocation3 + $0x30] sm:$0xff] %vm2424_vm12, %v2341_v21  ;;  %2432 = vst.msk [vmem:[#allocation3 + $0x38] sm:$0xff] %vm2424_vm12, %v2343_v22 }
 0x332   : > { %2714 = vrot.lane.b32.xlu0 %v2650_v35, %s5519_s16  ;;  %2716 = vrot.lane.b32.xlu1 %v2651_v36, %s5519_s16  ;;  %v2843_v35 = vld [vmem:[#allocation2 + $0x34] sm:$0xff]  ;;  %v2844_v36 = vld [vmem:[#allocation2 + $0x3c] sm:$0xff] }
 0x334   : > { %v2345_v39 = vpop.permute.xlu0 %2344  ;;  %v2347_v40 = vpop.permute.xlu1 %2346 }
 0x335   : > { %2433 = vst.msk [vmem:[#allocation3 + $0x40] sm:$0xff] %vm2424_vm12, %v2345_v39  ;;  %2434 = vst.msk [vmem:[#allocation3 + $0x48] sm:$0xff] %vm2424_vm12, %v2347_v40 }
 0x336   : > { %2718 = vrot.lane.b32.xlu0 %v2652_v37, %s5519_s16  ;;  %2720 = vrot.lane.b32.xlu1 %v2653_v38, %s5519_s16  ;;  %v2845_v37 = vld [vmem:[#allocation2 + $0x4c] sm:$0xff]  ;;  %v2846_v38 = vld [vmem:[#allocation2 + $0x54] sm:$0xff] }
 0x338   : > { %v2349_v43 = vpop.permute.xlu0 %2348  ;;  %v2351_v44 = vpop.permute.xlu1 %2350 }
 0x339   : > { %2435 = vst.msk [vmem:[#allocation3 + $0x50] sm:$0xff] %vm2424_vm12, %v2349_v43  ;;  %2436 = vst.msk [vmem:[#allocation3 + $0x58] sm:$0xff] %vm2424_vm12, %v2351_v44 }
 0x33a   : > { %2722 = vrot.lane.b32.xlu0 %v2654_v41, %s5519_s16  ;;  %2724 = vrot.lane.b32.xlu1 %v2655_v42, %s5519_s16  ;;  %v2847_v41 = vld [vmem:[#allocation2 + $0x64] sm:$0xff]  ;;  %v2848_v42 = vld [vmem:[#allocation2 + $0x6c] sm:$0xff] }
 0x33c   : > { %v2353_v51 = vpop.permute.xlu0 %2352  ;;  %v2355_v52 = vpop.permute.xlu1 %2354 }
 0x33d   : > { %2437 = vst.msk [vmem:[#allocation3 + $0x60] sm:$0xff] %vm2424_vm12, %v2353_v51  ;;  %2438 = vst.msk [vmem:[#allocation3 + $0x68] sm:$0xff] %vm2424_vm12, %v2355_v52 }
 0x33e   : > { %2726 = vrot.lane.b32.xlu0 %v2656_v45, %s5519_s16  ;;  %2728 = vrot.lane.b32.xlu1 %v2657_v47, %s5519_s16  ;;  %v2849_v45 = vld [vmem:[#allocation2 + $0x7c] sm:$0xff]  ;;  %v2850_v47 = vld [vmem:[#allocation2 + $0x84] sm:$0xff] }
 0x340   : > { %v2357_v3 = vpop.permute.xlu0 %2356  ;;  %v2359_v4 = vpop.permute.xlu1 %2358 }
 0x341   : > { %2439 = vst.msk [vmem:[#allocation3 + $0x70] sm:$0xff] %vm2424_vm12, %v2357_v3  ;;  %2440 = vst.msk [vmem:[#allocation3 + $0x78] sm:$0xff] %vm2424_vm12, %v2359_v4 }
 0x342   : > { %2730 = vrot.lane.b32.xlu0 %v2658_v59, %s5519_s16  ;;  %2732 = vrot.lane.b32.xlu1 %v2659_v60, %s5519_s16  ;;  %v2851_v59 = vld [vmem:[#allocation2 + $0x94] sm:$0xff]  ;;  %v2852_v60 = vld [vmem:[#allocation2 + $0x9c] sm:$0xff] }
 0x344   : > { %v2361_v19 = vpop.permute.xlu0 %2360  ;;  %v2363_v20 = vpop.permute.xlu1 %2362 }
 0x345   : > { %2441 = vst.msk [vmem:[#allocation3 + $0x80] sm:$0xff] %vm2424_vm12, %v2361_v19  ;;  %2442 = vst.msk [vmem:[#allocation3 + $0x88] sm:$0xff] %vm2424_vm12, %v2363_v20 }
 0x346   : > { %2734 = vrot.lane.b32.xlu0 %v2660_v11, %s5519_s16  ;;  %2736 = vrot.lane.b32.xlu1 %v2661_v12, %s5519_s16  ;;  %v2853_v11 = vld [vmem:[#allocation2 + $0xac] sm:$0xff]  ;;  %v2854_v12 = vld [vmem:[#allocation2 + $0xb4] sm:$0xff] }
 0x348   : > { %v2365_v25 = vpop.permute.xlu0 %2364  ;;  %v2367_v26 = vpop.permute.xlu1 %2366 }
 0x349   : > { %2443 = vst.msk [vmem:[#allocation3 + $0x90] sm:$0xff] %vm2424_vm12, %v2365_v25  ;;  %2444 = vst.msk [vmem:[#allocation3 + $0x98] sm:$0xff] %vm2424_vm12, %v2367_v26 }
 0x34a   : > { %2738 = vrot.lane.b32.xlu0 %v2662_v23, %s5519_s16  ;;  %2740 = vrot.lane.b32.xlu1 %v2663_v24, %s5519_s16  ;;  %v2855_v23 = vld [vmem:[#allocation2 + $0xc4] sm:$0xff]  ;;  %v2856_v24 = vld [vmem:[#allocation2 + $0xcc] sm:$0xff] }
 0x34c   : > { %v2369_v29 = vpop.permute.xlu0 %2368  ;;  %v2371_v30 = vpop.permute.xlu1 %2370 }
 0x34d   : > { %2445 = vst.msk [vmem:[#allocation3 + $0xa0] sm:$0xff] %vm2424_vm12, %v2369_v29  ;;  %2446 = vst.msk [vmem:[#allocation3 + $0xa8] sm:$0xff] %vm2424_vm12, %v2371_v30 }
 0x34e   : > { %2742 = vrot.lane.b32.xlu0 %v2664_v27, %s5519_s16  ;;  %2744 = vrot.lane.b32.xlu1 %v2665_v28, %s5519_s16  ;;  %v2857_v27 = vld [vmem:[#allocation2 + $0xdc] sm:$0xff]  ;;  %v2858_v28 = vld [vmem:[#allocation2 + $0xe4] sm:$0xff] }
 0x350   : > { %v2373_v46 = vpop.permute.xlu0 %2372  ;;  %v2375_v48 = vpop.permute.xlu1 %2374 }
 0x351   : > { %2447 = vst.msk [vmem:[#allocation3 + $0xb0] sm:$0xff] %vm2424_vm12, %v2373_v46  ;;  %2448 = vst.msk [vmem:[#allocation3 + $0xb8] sm:$0xff] %vm2424_vm12, %v2375_v48 }
 0x352   : > { %2746 = vrot.lane.b32.xlu0 %v2666_v31, %s5519_s16  ;;  %2748 = vrot.lane.b32.xlu1 %v2667_v32, %s5519_s16  ;;  %v2859_v31 = vld [vmem:[#allocation2 + $0xf4] sm:$0xff]  ;;  %v2860_v32 = vld [vmem:[#allocation2 + $0xfc] sm:$0xff] }
 0x354   : > { %v2377_v53 = vpop.permute.xlu0 %2376  ;;  %v2379_v54 = vpop.permute.xlu1 %2378 }
 0x355   : > { %2449 = vst.msk [vmem:[#allocation3 + $0xc0] sm:$0xff] %vm2424_vm12, %v2377_v53  ;;  %2450 = vst.msk [vmem:[#allocation3 + $0xc8] sm:$0xff] %vm2424_vm12, %v2379_v54 }
 0x356   : > { %2750 = vrot.lane.b32.xlu0 %v2668_v49, %s5519_s16  ;;  %2752 = vrot.lane.b32.xlu1 %v2669_v50, %s5519_s16  ;;  %v2861_v49 = vld [vmem:[#allocation2 + $0x10c] sm:$0xff]  ;;  %v2862_v50 = vld [vmem:[#allocation2 + $0x114] sm:$0xff] }
 0x358   : > { %v2381_v57 = vpop.permute.xlu0 %2380  ;;  %v2383_v58 = vpop.permute.xlu1 %2382 }
 0x359   : > { %2451 = vst.msk [vmem:[#allocation3 + $0xd0] sm:$0xff] %vm2424_vm12, %v2381_v57  ;;  %2452 = vst.msk [vmem:[#allocation3 + $0xd8] sm:$0xff] %vm2424_vm12, %v2383_v58 }
 0x35a   : > { %2754 = vrot.lane.b32.xlu0 %v2670_v55, %s5519_s16  ;;  %2756 = vrot.lane.b32.xlu1 %v2671_v56, %s5519_s16  ;;  %v2863_v55 = vld [vmem:[#allocation2 + $0x124] sm:$0xff]  ;;  %v2864_v56 = vld [vmem:[#allocation2 + $0x12c] sm:$0xff] }
 0x35c   : > { %v2385_v63 = vpop.permute.xlu0 %2384  ;;  %v2387_v0 = vpop.permute.xlu1 %2386 }
 0x35d   : > { %2453 = vst.msk [vmem:[#allocation3 + $0xe0] sm:$0xff] %vm2424_vm12, %v2385_v63  ;;  %2454 = vst.msk [vmem:[#allocation3 + $0xe8] sm:$0xff] %vm2424_vm12, %v2387_v0 }
 0x35e   : > { %2758 = vrot.lane.b32.xlu0 %v2672_v61, %s5519_s16  ;;  %2760 = vrot.lane.b32.xlu1 %v2673_v62, %s5519_s16  ;;  %v2865_v61 = vld [vmem:[#allocation2 + $0x13c] sm:$0xff]  ;;  %v2866_v62 = vld [vmem:[#allocation2 + $0x144] sm:$0xff] }
 0x360   : > { %v2389_v5 = vpop.permute.xlu0 %2388  ;;  %v2391_v6 = vpop.permute.xlu1 %2390 }
 0x361   : > { %2455 = vst.msk [vmem:[#allocation3 + $0xf0] sm:$0xff] %vm2424_vm12, %v2389_v5  ;;  %2456 = vst.msk [vmem:[#allocation3 + $0xf8] sm:$0xff] %vm2424_vm12, %v2391_v6 }
 0x362   : > { %2762 = vrot.lane.b32.xlu0 %v2674_v1, %s5519_s16  ;;  %2764 = vrot.lane.b32.xlu1 %v2675_v2, %s5519_s16  ;;  %v2867_v1 = vld [vmem:[#allocation2 + $0x154] sm:$0xff]  ;;  %v2868_v2 = vld [vmem:[#allocation2 + $0x15c] sm:$0xff] }
 0x364   : > { %v2522_v9 = vpop.permute.xlu0 %2521  ;;  %v2524_v10 = vpop.permute.xlu1 %2523 }
 0x365   : > { %2618 = vst.msk [vmem:[#allocation3] sm:$0xff] %vm2617_vm13, %v2522_v9  ;;  %2619 = vst.msk [vmem:[#allocation3 + $0x8] sm:$0xff] %vm2617_vm13, %v2524_v10 }
 0x366   : > { %2766 = vrot.lane.b32.xlu0 %v2676_v7, %s5519_s16  ;;  %2768 = vrot.lane.b32.xlu1 %v2677_v8, %s5519_s16  ;;  %v2869_v7 = vld [vmem:[#allocation2 + $0x16c] sm:$0xff]  ;;  %v2870_v8 = vld [vmem:[#allocation2 + $0x174] sm:$0xff] }
 0x368   : > { %v2526_v15 = vpop.permute.xlu0 %2525  ;;  %v2528_v16 = vpop.permute.xlu1 %2527 }
 0x369   : > { %2620 = vst.msk [vmem:[#allocation3 + $0x10] sm:$0xff] %vm2617_vm13, %v2526_v15  ;;  %2621 = vst.msk [vmem:[#allocation3 + $0x18] sm:$0xff] %vm2617_vm13, %v2528_v16 }
 0x36a   : > { %2770 = vrot.lane.b32.xlu0 %v2678_v13, %s5519_s16  ;;  %2772 = vrot.lane.b32.xlu1 %v2679_v14, %s5519_s16  ;;  %v2871_v13 = vld [vmem:[#allocation2 + $0x184] sm:$0xff]  ;;  %v2872_v14 = vld [vmem:[#allocation2 + $0x18c] sm:$0xff] }
 0x36c   : > { %v2530_v17 = vpop.permute.xlu0 %2529  ;;  %v2532_v18 = vpop.permute.xlu1 %2531 }
 0x36d   : > { %2622 = vst.msk [vmem:[#allocation3 + $0x20] sm:$0xff] %vm2617_vm13, %v2530_v17  ;;  %2623 = vst.msk [vmem:[#allocation3 + $0x28] sm:$0xff] %vm2617_vm13, %v2532_v18 }
 0x36e   : > { %2774 = vrot.lane.b32.xlu0 %v2680_v33, %s5519_s16  ;;  %2776 = vrot.lane.b32.xlu1 %v2681_v34, %s5519_s16  ;;  %v2873_v33 = vld [vmem:[#allocation2 + $0x19c] sm:$0xff]  ;;  %v2874_v34 = vld [vmem:[#allocation2 + $0x1a4] sm:$0xff]  ;;  %s5200_s16 = sshll.u32 %s136_s14, 4  ;;  %s7670_s16 = int_to_ptr.vmem [resolvable:$true] %s5200_s16 }
 0x370   : > { %v2534_v21 = vpop.permute.xlu0 %2533  ;;  %v2536_v22 = vpop.permute.xlu1 %2535 }
 0x371   : > { %2624 = vst.msk [vmem:[#allocation3 + $0x30] sm:$0xff] %vm2617_vm13, %v2534_v21  ;;  %2625 = vst.msk [vmem:[#allocation3 + $0x38] sm:$0xff] %vm2617_vm13, %v2536_v22 }
 0x372   : > { %2907 = vrot.lane.b32.xlu0 %v2843_v35, %s5520_s17  ;;  %2909 = vrot.lane.b32.xlu1 %v2844_v36, %s5520_s17  ;;  %v3037_v35 = vld [vmem:[#allocation2 + $0x48] sm:$0xff]  ;;  %v3038_v36 = vld [vmem:[#allocation2 + $0x50] sm:$0xff] }
 0x374   : > { %v2538_v39 = vpop.permute.xlu0 %2537  ;;  %v2540_v40 = vpop.permute.xlu1 %2539 }
 0x375   : > { %2626 = vst.msk [vmem:[#allocation3 + $0x40] sm:$0xff] %vm2617_vm13, %v2538_v39  ;;  %2627 = vst.msk [vmem:[#allocation3 + $0x48] sm:$0xff] %vm2617_vm13, %v2540_v40 }
 0x376   : > { %2911 = vrot.lane.b32.xlu0 %v2845_v37, %s5520_s17  ;;  %2913 = vrot.lane.b32.xlu1 %v2846_v38, %s5520_s17  ;;  %v3039_v37 = vld [vmem:[#allocation2 + $0x60] sm:$0xff]  ;;  %v3040_v38 = vld [vmem:[#allocation2 + $0x68] sm:$0xff] }
 0x378   : > { %v2542_v43 = vpop.permute.xlu0 %2541  ;;  %v2544_v44 = vpop.permute.xlu1 %2543 }
 0x379   : > { %2628 = vst.msk [vmem:[#allocation3 + $0x50] sm:$0xff] %vm2617_vm13, %v2542_v43  ;;  %2629 = vst.msk [vmem:[#allocation3 + $0x58] sm:$0xff] %vm2617_vm13, %v2544_v44 }
 0x37a   : > { %2915 = vrot.lane.b32.xlu0 %v2847_v41, %s5520_s17  ;;  %2917 = vrot.lane.b32.xlu1 %v2848_v42, %s5520_s17  ;;  %v3041_v41 = vld [vmem:[#allocation2 + $0x78] sm:$0xff]  ;;  %v3042_v42 = vld [vmem:[#allocation2 + $0x80] sm:$0xff] }
 0x37c   : > { %v2546_v51 = vpop.permute.xlu0 %2545  ;;  %v2548_v52 = vpop.permute.xlu1 %2547 }
 0x37d   : > { %2630 = vst.msk [vmem:[#allocation3 + $0x60] sm:$0xff] %vm2617_vm13, %v2546_v51  ;;  %2631 = vst.msk [vmem:[#allocation3 + $0x68] sm:$0xff] %vm2617_vm13, %v2548_v52 }
 0x37e   : > { %2919 = vrot.lane.b32.xlu0 %v2849_v45, %s5520_s17  ;;  %2921 = vrot.lane.b32.xlu1 %v2850_v47, %s5520_s17  ;;  %v3043_v45 = vld [vmem:[#allocation2 + $0x90] sm:$0xff]  ;;  %v3044_v47 = vld [vmem:[#allocation2 + $0x98] sm:$0xff] }
 0x380   : > { %v2550_v3 = vpop.permute.xlu0 %2549  ;;  %v2552_v4 = vpop.permute.xlu1 %2551 }
 0x381   : > { %2632 = vst.msk [vmem:[#allocation3 + $0x70] sm:$0xff] %vm2617_vm13, %v2550_v3  ;;  %2633 = vst.msk [vmem:[#allocation3 + $0x78] sm:$0xff] %vm2617_vm13, %v2552_v4 }
 0x382   : > { %2923 = vrot.lane.b32.xlu0 %v2851_v59, %s5520_s17  ;;  %2925 = vrot.lane.b32.xlu1 %v2852_v60, %s5520_s17  ;;  %v3045_v59 = vld [vmem:[#allocation2 + $0xa8] sm:$0xff]  ;;  %v3046_v60 = vld [vmem:[#allocation2 + $0xb0] sm:$0xff] }
 0x384   : > { %v2554_v19 = vpop.permute.xlu0 %2553  ;;  %v2556_v20 = vpop.permute.xlu1 %2555 }
 0x385   : > { %2634 = vst.msk [vmem:[#allocation3 + $0x80] sm:$0xff] %vm2617_vm13, %v2554_v19  ;;  %2635 = vst.msk [vmem:[#allocation3 + $0x88] sm:$0xff] %vm2617_vm13, %v2556_v20 }
 0x386   : > { %2927 = vrot.lane.b32.xlu0 %v2853_v11, %s5520_s17  ;;  %2929 = vrot.lane.b32.xlu1 %v2854_v12, %s5520_s17  ;;  %v3047_v11 = vld [vmem:[#allocation2 + $0xc0] sm:$0xff]  ;;  %v3048_v12 = vld [vmem:[#allocation2 + $0xc8] sm:$0xff] }
 0x388   : > { %v2558_v25 = vpop.permute.xlu0 %2557  ;;  %v2560_v26 = vpop.permute.xlu1 %2559 }
 0x389   : > { %2636 = vst.msk [vmem:[#allocation3 + $0x90] sm:$0xff] %vm2617_vm13, %v2558_v25  ;;  %2637 = vst.msk [vmem:[#allocation3 + $0x98] sm:$0xff] %vm2617_vm13, %v2560_v26 }
 0x38a   : > { %2931 = vrot.lane.b32.xlu0 %v2855_v23, %s5520_s17  ;;  %2933 = vrot.lane.b32.xlu1 %v2856_v24, %s5520_s17  ;;  %v3049_v23 = vld [vmem:[#allocation2 + $0xd8] sm:$0xff]  ;;  %v3050_v24 = vld [vmem:[#allocation2 + $0xe0] sm:$0xff] }
 0x38c   : > { %v2562_v29 = vpop.permute.xlu0 %2561  ;;  %v2564_v30 = vpop.permute.xlu1 %2563 }
 0x38d   : > { %2638 = vst.msk [vmem:[#allocation3 + $0xa0] sm:$0xff] %vm2617_vm13, %v2562_v29  ;;  %2639 = vst.msk [vmem:[#allocation3 + $0xa8] sm:$0xff] %vm2617_vm13, %v2564_v30 }
 0x38e   : > { %2935 = vrot.lane.b32.xlu0 %v2857_v27, %s5520_s17  ;;  %2937 = vrot.lane.b32.xlu1 %v2858_v28, %s5520_s17  ;;  %v3051_v27 = vld [vmem:[#allocation2 + $0xf0] sm:$0xff]  ;;  %v3052_v28 = vld [vmem:[#allocation2 + $0xf8] sm:$0xff] }
 0x390   : > { %v2566_v46 = vpop.permute.xlu0 %2565  ;;  %v2568_v48 = vpop.permute.xlu1 %2567 }
 0x391   : > { %2640 = vst.msk [vmem:[#allocation3 + $0xb0] sm:$0xff] %vm2617_vm13, %v2566_v46  ;;  %2641 = vst.msk [vmem:[#allocation3 + $0xb8] sm:$0xff] %vm2617_vm13, %v2568_v48 }
 0x392   : > { %2939 = vrot.lane.b32.xlu0 %v2859_v31, %s5520_s17  ;;  %2941 = vrot.lane.b32.xlu1 %v2860_v32, %s5520_s17  ;;  %v3053_v31 = vld [vmem:[#allocation2 + $0x108] sm:$0xff]  ;;  %v3054_v32 = vld [vmem:[#allocation2 + $0x110] sm:$0xff] }
 0x394   : > { %v2570_v53 = vpop.permute.xlu0 %2569  ;;  %v2572_v54 = vpop.permute.xlu1 %2571 }
 0x395   : > { %2642 = vst.msk [vmem:[#allocation3 + $0xc0] sm:$0xff] %vm2617_vm13, %v2570_v53  ;;  %2643 = vst.msk [vmem:[#allocation3 + $0xc8] sm:$0xff] %vm2617_vm13, %v2572_v54 }
 0x396   : > { %2943 = vrot.lane.b32.xlu0 %v2861_v49, %s5520_s17  ;;  %2945 = vrot.lane.b32.xlu1 %v2862_v50, %s5520_s17  ;;  %v3055_v49 = vld [vmem:[#allocation2 + $0x120] sm:$0xff]  ;;  %v3056_v50 = vld [vmem:[#allocation2 + $0x128] sm:$0xff] }
 0x398   : > { %v2574_v57 = vpop.permute.xlu0 %2573  ;;  %v2576_v58 = vpop.permute.xlu1 %2575 }
 0x399   : > { %2644 = vst.msk [vmem:[#allocation3 + $0xd0] sm:$0xff] %vm2617_vm13, %v2574_v57  ;;  %2645 = vst.msk [vmem:[#allocation3 + $0xd8] sm:$0xff] %vm2617_vm13, %v2576_v58 }
 0x39a   : > { %2947 = vrot.lane.b32.xlu0 %v2863_v55, %s5520_s17  ;;  %2949 = vrot.lane.b32.xlu1 %v2864_v56, %s5520_s17  ;;  %v3057_v55 = vld [vmem:[#allocation2 + $0x138] sm:$0xff]  ;;  %v3058_v56 = vld [vmem:[#allocation2 + $0x140] sm:$0xff] }
 0x39c   : > { %v2578_v63 = vpop.permute.xlu0 %2577  ;;  %v2580_v0 = vpop.permute.xlu1 %2579 }
 0x39d   : > { %2646 = vst.msk [vmem:[#allocation3 + $0xe0] sm:$0xff] %vm2617_vm13, %v2578_v63  ;;  %2647 = vst.msk [vmem:[#allocation3 + $0xe8] sm:$0xff] %vm2617_vm13, %v2580_v0 }
 0x39e   : > { %2951 = vrot.lane.b32.xlu0 %v2865_v61, %s5520_s17  ;;  %2953 = vrot.lane.b32.xlu1 %v2866_v62, %s5520_s17  ;;  %v3059_v61 = vld [vmem:[#allocation2 + $0x150] sm:$0xff]  ;;  %v3060_v62 = vld [vmem:[#allocation2 + $0x158] sm:$0xff] }
 0x3a0   : > { %v2582_v5 = vpop.permute.xlu0 %2581  ;;  %v2584_v6 = vpop.permute.xlu1 %2583 }
 0x3a1   : > { %2648 = vst.msk [vmem:[#allocation3 + $0xf0] sm:$0xff] %vm2617_vm13, %v2582_v5  ;;  %2649 = vst.msk [vmem:[#allocation3 + $0xf8] sm:$0xff] %vm2617_vm13, %v2584_v6 }
 0x3a2   : > { %2955 = vrot.lane.b32.xlu0 %v2867_v1, %s5520_s17  ;;  %2957 = vrot.lane.b32.xlu1 %v2868_v2, %s5520_s17  ;;  %v3061_v1 = vld [vmem:[#allocation2 + $0x168] sm:$0xff]  ;;  %v3062_v2 = vld [vmem:[#allocation2 + $0x170] sm:$0xff] }
 0x3a4   : > { %v2715_v9 = vpop.permute.xlu0 %2714  ;;  %v2717_v10 = vpop.permute.xlu1 %2716 }
 0x3a5   : > { %2811 = vst.msk [vmem:[#allocation3] sm:$0xff] %vm2810_vm14, %v2715_v9  ;;  %2812 = vst.msk [vmem:[#allocation3 + $0x8] sm:$0xff] %vm2810_vm14, %v2717_v10 }
 0x3a6   : > { %2959 = vrot.lane.b32.xlu0 %v2869_v7, %s5520_s17  ;;  %2961 = vrot.lane.b32.xlu1 %v2870_v8, %s5520_s17  ;;  %v3063_v7 = vld [vmem:[#allocation2 + $0x180] sm:$0xff]  ;;  %v3064_v8 = vld [vmem:[#allocation2 + $0x188] sm:$0xff] }
 0x3a8   : > { %v2719_v15 = vpop.permute.xlu0 %2718  ;;  %v2721_v16 = vpop.permute.xlu1 %2720 }
 0x3a9   : > { %2813 = vst.msk [vmem:[#allocation3 + $0x10] sm:$0xff] %vm2810_vm14, %v2719_v15  ;;  %2814 = vst.msk [vmem:[#allocation3 + $0x18] sm:$0xff] %vm2810_vm14, %v2721_v16 }
 0x3aa   : > { %2963 = vrot.lane.b32.xlu0 %v2871_v13, %s5520_s17  ;;  %2965 = vrot.lane.b32.xlu1 %v2872_v14, %s5520_s17  ;;  %v3065_v13 = vld [vmem:[#allocation2 + $0x198] sm:$0xff]  ;;  %v3066_v14 = vld [vmem:[#allocation2 + $0x1a0] sm:$0xff] }
 0x3ac   : > { %v2723_v17 = vpop.permute.xlu0 %2722  ;;  %v2725_v18 = vpop.permute.xlu1 %2724 }
 0x3ad   : > { %2815 = vst.msk [vmem:[#allocation3 + $0x20] sm:$0xff] %vm2810_vm14, %v2723_v17  ;;  %2816 = vst.msk [vmem:[#allocation3 + $0x28] sm:$0xff] %vm2810_vm14, %v2725_v18 }
 0x3ae   : > { %2967 = vrot.lane.b32.xlu0 %v2873_v33, %s5520_s17  ;;  %2969 = vrot.lane.b32.xlu1 %v2874_v34, %s5520_s17  ;;  %v3067_v33 = vld [vmem:[#allocation2 + $0x1b0] sm:$0xff]  ;;  %v3068_v34 = vld [vmem:[#allocation2 + $0x1b8] sm:$0xff]  ;;  %s5309_s17 = sshll.u32 %s5570_s13, 9  ;;  %s5444_s13 = scalar_lea.vmem %s7670_s16, 512 }
 0x3af   : > { %p5445_p11 = scmp.ne.s32.totalorder %s7670_s16, %s5444_s13 }
 0x3b0   : > { %v2727_v21 = vpop.permute.xlu0 %2726  ;;  %v2729_v22 = vpop.permute.xlu1 %2728 }
 0x3b1   : > { %2817 = vst.msk [vmem:[#allocation3 + $0x30] sm:$0xff] %vm2810_vm14, %v2727_v21  ;;  %2818 = vst.msk [vmem:[#allocation3 + $0x38] sm:$0xff] %vm2810_vm14, %v2729_v22  ;;  %p5446_p12 = pnand %p5445_p11, %p5587_p5 }
 0x3b2   : > { %3101 = vrot.lane.b32.xlu0 %v3037_v35, %s5521_s21  ;;  %3103 = vrot.lane.b32.xlu1 %v3038_v36, %s5521_s21  ;;  %v3230_v35 = vld [vmem:[#allocation2 + $0x49] sm:$0xff]  ;;  %v3231_v36 = vld [vmem:[#allocation2 + $0x51] sm:$0xff] }
 0x3b3   : > { %p5447_p13 = pneg %p5446_p12 }
 0x3b4   : > { %v2731_v39 = vpop.permute.xlu0 %2730  ;;  %v2733_v40 = vpop.permute.xlu1 %2732 }
 0x3b5   : > { %2819 = vst.msk [vmem:[#allocation3 + $0x40] sm:$0xff] %vm2810_vm14, %v2731_v39  ;;  %2820 = vst.msk [vmem:[#allocation3 + $0x48] sm:$0xff] %vm2810_vm14, %v2733_v40 }
 0x3b6   : > { %3105 = vrot.lane.b32.xlu0 %v3039_v37, %s5521_s21  ;;  %3107 = vrot.lane.b32.xlu1 %v3040_v38, %s5521_s21  ;;  %v3232_v37 = vld [vmem:[#allocation2 + $0x61] sm:$0xff]  ;;  %v3233_v38 = vld [vmem:[#allocation2 + $0x69] sm:$0xff] }
 0x3b8   : > { %v2735_v43 = vpop.permute.xlu0 %2734  ;;  %v2737_v44 = vpop.permute.xlu1 %2736 }
 0x3b9   : > { %2821 = vst.msk [vmem:[#allocation3 + $0x50] sm:$0xff] %vm2810_vm14, %v2735_v43  ;;  %2822 = vst.msk [vmem:[#allocation3 + $0x58] sm:$0xff] %vm2810_vm14, %v2737_v44 }
 0x3ba   : > { %3109 = vrot.lane.b32.xlu0 %v3041_v41, %s5521_s21  ;;  %3111 = vrot.lane.b32.xlu1 %v3042_v42, %s5521_s21  ;;  %v3234_v41 = vld [vmem:[#allocation2 + $0x79] sm:$0xff]  ;;  %v3235_v42 = vld [vmem:[#allocation2 + $0x81] sm:$0xff] }
 0x3bc   : > { %v2739_v51 = vpop.permute.xlu0 %2738  ;;  %v2741_v52 = vpop.permute.xlu1 %2740 }
 0x3bd   : > { %2823 = vst.msk [vmem:[#allocation3 + $0x60] sm:$0xff] %vm2810_vm14, %v2739_v51  ;;  %2824 = vst.msk [vmem:[#allocation3 + $0x68] sm:$0xff] %vm2810_vm14, %v2741_v52 }
 0x3be   : > { %3113 = vrot.lane.b32.xlu0 %v3043_v45, %s5521_s21  ;;  %3115 = vrot.lane.b32.xlu1 %v3044_v47, %s5521_s21  ;;  %v3236_v45 = vld [vmem:[#allocation2 + $0x91] sm:$0xff]  ;;  %v3237_v47 = vld [vmem:[#allocation2 + $0x99] sm:$0xff] }
 0x3c0   : > { %v2743_v3 = vpop.permute.xlu0 %2742  ;;  %v2745_v4 = vpop.permute.xlu1 %2744 }
 0x3c1   : > { %2825 = vst.msk [vmem:[#allocation3 + $0x70] sm:$0xff] %vm2810_vm14, %v2743_v3  ;;  %2826 = vst.msk [vmem:[#allocation3 + $0x78] sm:$0xff] %vm2810_vm14, %v2745_v4 }
 0x3c2   : > { %3117 = vrot.lane.b32.xlu0 %v3045_v59, %s5521_s21  ;;  %3119 = vrot.lane.b32.xlu1 %v3046_v60, %s5521_s21  ;;  %v3238_v59 = vld [vmem:[#allocation2 + $0xa9] sm:$0xff]  ;;  %v3239_v60 = vld [vmem:[#allocation2 + $0xb1] sm:$0xff] }
 0x3c4   : > { %v2747_v19 = vpop.permute.xlu0 %2746  ;;  %v2749_v20 = vpop.permute.xlu1 %2748 }
 0x3c5   : > { %2827 = vst.msk [vmem:[#allocation3 + $0x80] sm:$0xff] %vm2810_vm14, %v2747_v19  ;;  %2828 = vst.msk [vmem:[#allocation3 + $0x88] sm:$0xff] %vm2810_vm14, %v2749_v20 }
 0x3c6   : > { %3121 = vrot.lane.b32.xlu0 %v3047_v11, %s5521_s21  ;;  %3123 = vrot.lane.b32.xlu1 %v3048_v12, %s5521_s21  ;;  %v3240_v11 = vld [vmem:[#allocation2 + $0xc1] sm:$0xff]  ;;  %v3241_v12 = vld [vmem:[#allocation2 + $0xc9] sm:$0xff] }
 0x3c8   : > { %v2751_v25 = vpop.permute.xlu0 %2750  ;;  %v2753_v26 = vpop.permute.xlu1 %2752 }
 0x3c9   : > { %2829 = vst.msk [vmem:[#allocation3 + $0x90] sm:$0xff] %vm2810_vm14, %v2751_v25  ;;  %2830 = vst.msk [vmem:[#allocation3 + $0x98] sm:$0xff] %vm2810_vm14, %v2753_v26 }
 0x3ca   : > { %3125 = vrot.lane.b32.xlu0 %v3049_v23, %s5521_s21  ;;  %3127 = vrot.lane.b32.xlu1 %v3050_v24, %s5521_s21  ;;  %v3242_v23 = vld [vmem:[#allocation2 + $0xd9] sm:$0xff]  ;;  %v3243_v24 = vld [vmem:[#allocation2 + $0xe1] sm:$0xff] }
 0x3cc   : > { %v2755_v29 = vpop.permute.xlu0 %2754  ;;  %v2757_v30 = vpop.permute.xlu1 %2756 }
 0x3cd   : > { %2831 = vst.msk [vmem:[#allocation3 + $0xa0] sm:$0xff] %vm2810_vm14, %v2755_v29  ;;  %2832 = vst.msk [vmem:[#allocation3 + $0xa8] sm:$0xff] %vm2810_vm14, %v2757_v30 }
 0x3ce   : > { %3129 = vrot.lane.b32.xlu0 %v3051_v27, %s5521_s21  ;;  %3131 = vrot.lane.b32.xlu1 %v3052_v28, %s5521_s21  ;;  %v3244_v27 = vld [vmem:[#allocation2 + $0xf1] sm:$0xff]  ;;  %v3245_v28 = vld [vmem:[#allocation2 + $0xf9] sm:$0xff] }
 0x3d0   : > { %v2759_v46 = vpop.permute.xlu0 %2758  ;;  %v2761_v48 = vpop.permute.xlu1 %2760 }
 0x3d1   : > { %2833 = vst.msk [vmem:[#allocation3 + $0xb0] sm:$0xff] %vm2810_vm14, %v2759_v46  ;;  %2834 = vst.msk [vmem:[#allocation3 + $0xb8] sm:$0xff] %vm2810_vm14, %v2761_v48 }
 0x3d2   : > { %3133 = vrot.lane.b32.xlu0 %v3053_v31, %s5521_s21  ;;  %3135 = vrot.lane.b32.xlu1 %v3054_v32, %s5521_s21  ;;  %v6816_v31 = vld [vmem:[#allocation2 + $0x109] sm:$0xff]  ;;  %v6818_v32 = vld [vmem:[#allocation2 + $0x111] sm:$0xff] }
 0x3d4   : > { %v2763_v53 = vpop.permute.xlu0 %2762  ;;  %v2765_v54 = vpop.permute.xlu1 %2764 }
 0x3d5   : > { %2835 = vst.msk [vmem:[#allocation3 + $0xc0] sm:$0xff] %vm2810_vm14, %v2763_v53  ;;  %2836 = vst.msk [vmem:[#allocation3 + $0xc8] sm:$0xff] %vm2810_vm14, %v2765_v54 }
 0x3d6   : > { %3137 = vrot.lane.b32.xlu0 %v3055_v49, %s5521_s21  ;;  %3139 = vrot.lane.b32.xlu1 %v3056_v50, %s5521_s21  ;;  %v3248_v49 = vld [vmem:[#allocation2 + $0x121] sm:$0xff]  ;;  %v3249_v50 = vld [vmem:[#allocation2 + $0x129] sm:$0xff] }
 0x3d8   : > { %v2767_v57 = vpop.permute.xlu0 %2766  ;;  %v2769_v58 = vpop.permute.xlu1 %2768 }
 0x3d9   : > { %2837 = vst.msk [vmem:[#allocation3 + $0xd0] sm:$0xff] %vm2810_vm14, %v2767_v57  ;;  %2838 = vst.msk [vmem:[#allocation3 + $0xd8] sm:$0xff] %vm2810_vm14, %v2769_v58 }
 0x3da   : > { %3141 = vrot.lane.b32.xlu0 %v3057_v55, %s5521_s21  ;;  %3143 = vrot.lane.b32.xlu1 %v3058_v56, %s5521_s21  ;;  %v3250_v55 = vld [vmem:[#allocation2 + $0x139] sm:$0xff]  ;;  %v3251_v56 = vld [vmem:[#allocation2 + $0x141] sm:$0xff] }
 0x3dc   : > { %v2771_v63 = vpop.permute.xlu0 %2770  ;;  %v2773_v0 = vpop.permute.xlu1 %2772 }
 0x3dd   : > { %2839 = vst.msk [vmem:[#allocation3 + $0xe0] sm:$0xff] %vm2810_vm14, %v2771_v63  ;;  %2840 = vst.msk [vmem:[#allocation3 + $0xe8] sm:$0xff] %vm2810_vm14, %v2773_v0 }
 0x3de   : > { %3145 = vrot.lane.b32.xlu0 %v3059_v61, %s5521_s21  ;;  %3147 = vrot.lane.b32.xlu1 %v3060_v62, %s5521_s21  ;;  %v3252_v61 = vld [vmem:[#allocation2 + $0x151] sm:$0xff]  ;;  %v3253_v62 = vld [vmem:[#allocation2 + $0x159] sm:$0xff] }
 0x3e0   : > { %v2775_v5 = vpop.permute.xlu0 %2774  ;;  %v2777_v6 = vpop.permute.xlu1 %2776 }
 0x3e1   : > { %2841 = vst.msk [vmem:[#allocation3 + $0xf0] sm:$0xff] %vm2810_vm14, %v2775_v5  ;;  %2842 = vst.msk [vmem:[#allocation3 + $0xf8] sm:$0xff] %vm2810_vm14, %v2777_v6 }
 0x3e2   : > { %3149 = vrot.lane.b32.xlu0 %v3061_v1, %s5521_s21  ;;  %3151 = vrot.lane.b32.xlu1 %v3062_v2, %s5521_s21  ;;  %v3254_v1 = vld [vmem:[#allocation2 + $0x169] sm:$0xff]  ;;  %v3255_v2 = vld [vmem:[#allocation2 + $0x171] sm:$0xff] }
 0x3e4   : > { %v2908_v9 = vpop.permute.xlu0 %2907  ;;  %v2910_v10 = vpop.permute.xlu1 %2909 }
 0x3e5   : > { %3004 = vst.msk [vmem:[#allocation3] sm:$0xff] %vm3003_vm15, %v2908_v9  ;;  %3005 = vst.msk [vmem:[#allocation3 + $0x8] sm:$0xff] %vm3003_vm15, %v2910_v10 }
 0x3e6   : > { %3153 = vrot.lane.b32.xlu0 %v3063_v7, %s5521_s21  ;;  %3155 = vrot.lane.b32.xlu1 %v3064_v8, %s5521_s21  ;;  %v3256_v7 = vld [vmem:[#allocation2 + $0x181] sm:$0xff]  ;;  %v3257_v8 = vld [vmem:[#allocation2 + $0x189] sm:$0xff] }
 0x3e8   : > { %v2912_v15 = vpop.permute.xlu0 %2911  ;;  %v2914_v16 = vpop.permute.xlu1 %2913 }
 0x3e9   : > { %3006 = vst.msk [vmem:[#allocation3 + $0x10] sm:$0xff] %vm3003_vm15, %v2912_v15  ;;  %3007 = vst.msk [vmem:[#allocation3 + $0x18] sm:$0xff] %vm3003_vm15, %v2914_v16 }
 0x3ea   : > { %3157 = vrot.lane.b32.xlu0 %v3065_v13, %s5521_s21  ;;  %3159 = vrot.lane.b32.xlu1 %v3066_v14, %s5521_s21  ;;  %v3258_v13 = vld [vmem:[#allocation2 + $0x199] sm:$0xff]  ;;  %v3259_v14 = vld [vmem:[#allocation2 + $0x1a1] sm:$0xff] }
 0x3ec   : > { %v2916_v17 = vpop.permute.xlu0 %2915  ;;  %v2918_v18 = vpop.permute.xlu1 %2917 }
 0x3ed   : > { %3008 = vst.msk [vmem:[#allocation3 + $0x20] sm:$0xff] %vm3003_vm15, %v2916_v17  ;;  %3009 = vst.msk [vmem:[#allocation3 + $0x28] sm:$0xff] %vm3003_vm15, %v2918_v18 }
 0x3ee   : > { %3161 = vrot.lane.b32.xlu0 %v3067_v33, %s5521_s21  ;;  %3163 = vrot.lane.b32.xlu1 %v3068_v34, %s5521_s21  ;;  %v3260_v33 = vld [vmem:[#allocation2 + $0x1b1] sm:$0xff]  ;;  %v6850_v34 = vld [vmem:[#allocation2 + $0x1b9] sm:$0xff] }
 0x3f0   : > { %v2920_v21 = vpop.permute.xlu0 %2919  ;;  %v2922_v22 = vpop.permute.xlu1 %2921 }
 0x3f1   : > { %3010 = vst.msk [vmem:[#allocation3 + $0x30] sm:$0xff] %vm3003_vm15, %v2920_v21  ;;  %3011 = vst.msk [vmem:[#allocation3 + $0x38] sm:$0xff] %vm3003_vm15, %v2922_v22 }
 0x3f2   : > { %3294 = vrot.lane.b32.xlu0 %v3230_v35, %s5522_s22  ;;  %3296 = vrot.lane.b32.xlu1 %v3231_v36, %s5522_s22  ;;  %v3423_v35 = vld [vmem:[#allocation2 + $0x4a] sm:$0xff]  ;;  %v3424_v36 = vld [vmem:[#allocation2 + $0x52] sm:$0xff] }
 0x3f4   : > { %v2924_v39 = vpop.permute.xlu0 %2923  ;;  %v2926_v40 = vpop.permute.xlu1 %2925 }
 0x3f5   : > { %3012 = vst.msk [vmem:[#allocation3 + $0x40] sm:$0xff] %vm3003_vm15, %v2924_v39  ;;  %3013 = vst.msk [vmem:[#allocation3 + $0x48] sm:$0xff] %vm3003_vm15, %v2926_v40 }
 0x3f6   : > { %3298 = vrot.lane.b32.xlu0 %v3232_v37, %s5522_s22  ;;  %3300 = vrot.lane.b32.xlu1 %v3233_v38, %s5522_s22  ;;  %v3425_v37 = vld [vmem:[#allocation2 + $0x62] sm:$0xff]  ;;  %v3426_v38 = vld [vmem:[#allocation2 + $0x6a] sm:$0xff] }
 0x3f8   : > { %v2928_v43 = vpop.permute.xlu0 %2927  ;;  %v2930_v44 = vpop.permute.xlu1 %2929 }
 0x3f9   : > { %3014 = vst.msk [vmem:[#allocation3 + $0x50] sm:$0xff] %vm3003_vm15, %v2928_v43  ;;  %3015 = vst.msk [vmem:[#allocation3 + $0x58] sm:$0xff] %vm3003_vm15, %v2930_v44 }
 0x3fa   : > { %3302 = vrot.lane.b32.xlu0 %v3234_v41, %s5522_s22  ;;  %3304 = vrot.lane.b32.xlu1 %v3235_v42, %s5522_s22  ;;  %v3427_v41 = vld [vmem:[#allocation2 + $0x7a] sm:$0xff]  ;;  %v3428_v42 = vld [vmem:[#allocation2 + $0x82] sm:$0xff] }
 0x3fc   : > { %v2932_v51 = vpop.permute.xlu0 %2931  ;;  %v2934_v52 = vpop.permute.xlu1 %2933 }
 0x3fd   : > { %3016 = vst.msk [vmem:[#allocation3 + $0x60] sm:$0xff] %vm3003_vm15, %v2932_v51  ;;  %3017 = vst.msk [vmem:[#allocation3 + $0x68] sm:$0xff] %vm3003_vm15, %v2934_v52 }
 0x3fe   : > { %3306 = vrot.lane.b32.xlu0 %v3236_v45, %s5522_s22  ;;  %3308 = vrot.lane.b32.xlu1 %v3237_v47, %s5522_s22  ;;  %v3429_v45 = vld [vmem:[#allocation2 + $0x92] sm:$0xff]  ;;  %v3430_v47 = vld [vmem:[#allocation2 + $0x9a] sm:$0xff] }
 0x400   : > { %v2936_v3 = vpop.permute.xlu0 %2935  ;;  %v2938_v4 = vpop.permute.xlu1 %2937 }
 0x401   : > { %3018 = vst.msk [vmem:[#allocation3 + $0x70] sm:$0xff] %vm3003_vm15, %v2936_v3  ;;  %3019 = vst.msk [vmem:[#allocation3 + $0x78] sm:$0xff] %vm3003_vm15, %v2938_v4 }
 0x402   : > { %3310 = vrot.lane.b32.xlu0 %v3238_v59, %s5522_s22  ;;  %3312 = vrot.lane.b32.xlu1 %v3239_v60, %s5522_s22  ;;  %v3431_v59 = vld [vmem:[#allocation2 + $0xaa] sm:$0xff]  ;;  %v3432_v60 = vld [vmem:[#allocation2 + $0xb2] sm:$0xff] }
 0x404   : > { %v2940_v19 = vpop.permute.xlu0 %2939  ;;  %v2942_v20 = vpop.permute.xlu1 %2941 }
 0x405   : > { %3020 = vst.msk [vmem:[#allocation3 + $0x80] sm:$0xff] %vm3003_vm15, %v2940_v19  ;;  %3021 = vst.msk [vmem:[#allocation3 + $0x88] sm:$0xff] %vm3003_vm15, %v2942_v20 }
 0x406   : > { %3314 = vrot.lane.b32.xlu0 %v3240_v11, %s5522_s22  ;;  %3316 = vrot.lane.b32.xlu1 %v3241_v12, %s5522_s22  ;;  %v3433_v11 = vld [vmem:[#allocation2 + $0xc2] sm:$0xff]  ;;  %v3434_v12 = vld [vmem:[#allocation2 + $0xca] sm:$0xff] }
 0x408   : > { %v2944_v25 = vpop.permute.xlu0 %2943  ;;  %v2946_v26 = vpop.permute.xlu1 %2945 }
 0x409   : > { %3022 = vst.msk [vmem:[#allocation3 + $0x90] sm:$0xff] %vm3003_vm15, %v2944_v25  ;;  %3023 = vst.msk [vmem:[#allocation3 + $0x98] sm:$0xff] %vm3003_vm15, %v2946_v26 }
 0x40a   : > { %3318 = vrot.lane.b32.xlu0 %v3242_v23, %s5522_s22  ;;  %3320 = vrot.lane.b32.xlu1 %v3243_v24, %s5522_s22  ;;  %v3435_v23 = vld [vmem:[#allocation2 + $0xda] sm:$0xff]  ;;  %v3436_v24 = vld [vmem:[#allocation2 + $0xe2] sm:$0xff] }
 0x40c   : > { %v2948_v29 = vpop.permute.xlu0 %2947  ;;  %v2950_v30 = vpop.permute.xlu1 %2949 }
 0x40d   : > { %3024 = vst.msk [vmem:[#allocation3 + $0xa0] sm:$0xff] %vm3003_vm15, %v2948_v29  ;;  %3025 = vst.msk [vmem:[#allocation3 + $0xa8] sm:$0xff] %vm3003_vm15, %v2950_v30 }
 0x40e   : > { %3322 = vrot.lane.b32.xlu0 %v3244_v27, %s5522_s22  ;;  %3324 = vrot.lane.b32.xlu1 %v3245_v28, %s5522_s22  ;;  %v6885_v27 = vld [vmem:[#allocation2 + $0xf2] sm:$0xff]  ;;  %v6887_v28 = vld [vmem:[#allocation2 + $0xfa] sm:$0xff] }
 0x410   : > { %v2952_v46 = vpop.permute.xlu0 %2951  ;;  %v2954_v48 = vpop.permute.xlu1 %2953 }
 0x411   : > { %3026 = vst.msk [vmem:[#allocation3 + $0xb0] sm:$0xff] %vm3003_vm15, %v2952_v46  ;;  %3027 = vst.msk [vmem:[#allocation3 + $0xb8] sm:$0xff] %vm3003_vm15, %v2954_v48  ;;  %v6895_v46 = vld [vmem:[#allocation2 + $0x10a] sm:$0xff]  ;;  %v6897_v48 = vld [vmem:[#allocation2 + $0x112] sm:$0xff] }
 0x412   : > { %3326 = vrot.lane.b32.xlu0 %v6816_v31, %s5522_s22  ;;  %3328 = vrot.lane.b32.xlu1 %v6818_v32, %s5522_s22 }
 0x414   : > { %v2956_v53 = vpop.permute.xlu0 %2955  ;;  %v2958_v54 = vpop.permute.xlu1 %2957 }
 0x415   : > { %3028 = vst.msk [vmem:[#allocation3 + $0xc0] sm:$0xff] %vm3003_vm15, %v2956_v53  ;;  %3029 = vst.msk [vmem:[#allocation3 + $0xc8] sm:$0xff] %vm3003_vm15, %v2958_v54  ;;  %v3441_v53 = vld [vmem:[#allocation2 + $0x122] sm:$0xff]  ;;  %v3442_v54 = vld [vmem:[#allocation2 + $0x12a] sm:$0xff] }
 0x416   : > { %3330 = vrot.lane.b32.xlu0 %v3248_v49, %s5522_s22  ;;  %3332 = vrot.lane.b32.xlu1 %v3249_v50, %s5522_s22 }
 0x418   : > { %v2960_v57 = vpop.permute.xlu0 %2959  ;;  %v2962_v58 = vpop.permute.xlu1 %2961 }
 0x419   : > { %3030 = vst.msk [vmem:[#allocation3 + $0xd0] sm:$0xff] %vm3003_vm15, %v2960_v57  ;;  %3031 = vst.msk [vmem:[#allocation3 + $0xd8] sm:$0xff] %vm3003_vm15, %v2962_v58  ;;  %v3443_v57 = vld [vmem:[#allocation2 + $0x13a] sm:$0xff]  ;;  %v3444_v58 = vld [vmem:[#allocation2 + $0x142] sm:$0xff] }
 0x41a   : > { %3334 = vrot.lane.b32.xlu0 %v3250_v55, %s5522_s22  ;;  %3336 = vrot.lane.b32.xlu1 %v3251_v56, %s5522_s22 }
 0x41c   : > { %v2964_v63 = vpop.permute.xlu0 %2963  ;;  %v2966_v0 = vpop.permute.xlu1 %2965 }
 0x41d   : > { %3032 = vst.msk [vmem:[#allocation3 + $0xe0] sm:$0xff] %vm3003_vm15, %v2964_v63  ;;  %3033 = vst.msk [vmem:[#allocation3 + $0xe8] sm:$0xff] %vm3003_vm15, %v2966_v0  ;;  %v3445_v63 = vld [vmem:[#allocation2 + $0x152] sm:$0xff]  ;;  %v3446_v0 = vld [vmem:[#allocation2 + $0x15a] sm:$0xff] }
 0x41e   : > { %3338 = vrot.lane.b32.xlu0 %v3252_v61, %s5522_s22  ;;  %3340 = vrot.lane.b32.xlu1 %v3253_v62, %s5522_s22 }
 0x420   : > { %v2968_v5 = vpop.permute.xlu0 %2967  ;;  %v2970_v6 = vpop.permute.xlu1 %2969 }
 0x421   : > { %3034 = vst.msk [vmem:[#allocation3 + $0xf0] sm:$0xff] %vm3003_vm15, %v2968_v5  ;;  %3035 = vst.msk [vmem:[#allocation3 + $0xf8] sm:$0xff] %vm3003_vm15, %v2970_v6  ;;  %v3447_v5 = vld [vmem:[#allocation2 + $0x16a] sm:$0xff]  ;;  %v3448_v6 = vld [vmem:[#allocation2 + $0x172] sm:$0xff] }
 0x422   : > { %3342 = vrot.lane.b32.xlu0 %v3254_v1, %s5522_s22  ;;  %3344 = vrot.lane.b32.xlu1 %v3255_v2, %s5522_s22 }
 0x424   : > { %v3102_v9 = vpop.permute.xlu0 %3101  ;;  %v3104_v10 = vpop.permute.xlu1 %3103 }
 0x425   : > { %3198 = vst.msk [vmem:[#allocation3] sm:$0xff] %vm3197_vm0, %v3102_v9  ;;  %3199 = vst.msk [vmem:[#allocation3 + $0x8] sm:$0xff] %vm3197_vm0, %v3104_v10  ;;  %v3449_v9 = vld [vmem:[#allocation2 + $0x182] sm:$0xff]  ;;  %v3450_v10 = vld [vmem:[#allocation2 + $0x18a] sm:$0xff] }
 0x426   : > { %3346 = vrot.lane.b32.xlu0 %v3256_v7, %s5522_s22  ;;  %3348 = vrot.lane.b32.xlu1 %v3257_v8, %s5522_s22 }
 0x428   : > { %v3106_v15 = vpop.permute.xlu0 %3105  ;;  %v3108_v16 = vpop.permute.xlu1 %3107 }
 0x429   : > { %3200 = vst.msk [vmem:[#allocation3 + $0x10] sm:$0xff] %vm3197_vm0, %v3106_v15  ;;  %3201 = vst.msk [vmem:[#allocation3 + $0x18] sm:$0xff] %vm3197_vm0, %v3108_v16  ;;  %v6925_v15 = vld [vmem:[#allocation2 + $0x19a] sm:$0xff]  ;;  %v6927_v16 = vld [vmem:[#allocation2 + $0x1a2] sm:$0xff] }
 0x42a   : > { %3350 = vrot.lane.b32.xlu0 %v3258_v13, %s5522_s22  ;;  %3352 = vrot.lane.b32.xlu1 %v3259_v14, %s5522_s22 }
 0x42c   : > { %v3110_v17 = vpop.permute.xlu0 %3109  ;;  %v3112_v18 = vpop.permute.xlu1 %3111 }
 0x42d   : > { %3202 = vst.msk [vmem:[#allocation3 + $0x20] sm:$0xff] %vm3197_vm0, %v3110_v17  ;;  %3203 = vst.msk [vmem:[#allocation3 + $0x28] sm:$0xff] %vm3197_vm0, %v3112_v18  ;;  %v6935_v18 = vld [vmem:[#allocation2 + $0x1b2] sm:$0xff] }
 0x42e   : > { %3354 = vrot.lane.b32.xlu0 %v3260_v33, %s5522_s22  ;;  %3356 = vrot.lane.b32.xlu1 %v6850_v34, %s5522_s22 }
 0x430   : > { %v3114_v21 = vpop.permute.xlu0 %3113  ;;  %v3116_v22 = vpop.permute.xlu1 %3115 }
 0x431   : > { %3204 = vst.msk [vmem:[#allocation3 + $0x30] sm:$0xff] %vm3197_vm0, %v3114_v21  ;;  %3205 = vst.msk [vmem:[#allocation3 + $0x38] sm:$0xff] %vm3197_vm0, %v3116_v22  ;;  %v3616_v22 = vld [vmem:[#allocation2 + $0x4b] sm:$0xff] }
 0x432   : > { %3487 = vrot.lane.b32.xlu0 %v3423_v35, %s5523_s23  ;;  %3489 = vrot.lane.b32.xlu1 %v3424_v36, %s5523_s23  ;;  %v6937_v35 = vld [vmem:[#allocation2 + $0x1ba] sm:$0xff] }
 0x434   : > { %v3118_v39 = vpop.permute.xlu0 %3117  ;;  %v3120_v40 = vpop.permute.xlu1 %3119 }
 0x435   : > { %3206 = vst.msk [vmem:[#allocation3 + $0x40] sm:$0xff] %vm3197_vm0, %v3118_v39  ;;  %3207 = vst.msk [vmem:[#allocation3 + $0x48] sm:$0xff] %vm3197_vm0, %v3120_v40  ;;  %v3618_v40 = vld [vmem:[#allocation2 + $0x63] sm:$0xff] }
 0x436   : > { %3491 = vrot.lane.b32.xlu0 %v3425_v37, %s5523_s23  ;;  %3493 = vrot.lane.b32.xlu1 %v3426_v38, %s5523_s23  ;;  %v3617_v37 = vld [vmem:[#allocation2 + $0x53] sm:$0xff] }
 0x438   : > { %v3122_v43 = vpop.permute.xlu0 %3121  ;;  %v3124_v44 = vpop.permute.xlu1 %3123 }
 0x439   : > { %3208 = vst.msk [vmem:[#allocation3 + $0x50] sm:$0xff] %vm3197_vm0, %v3122_v43  ;;  %3209 = vst.msk [vmem:[#allocation3 + $0x58] sm:$0xff] %vm3197_vm0, %v3124_v44  ;;  %v3620_v44 = vld [vmem:[#allocation2 + $0x7b] sm:$0xff] }
 0x43a   : > { %3495 = vrot.lane.b32.xlu0 %v3427_v41, %s5523_s23  ;;  %3497 = vrot.lane.b32.xlu1 %v3428_v42, %s5523_s23  ;;  %v3619_v41 = vld [vmem:[#allocation2 + $0x6b] sm:$0xff] }
 0x43c   : > { %v3126_v51 = vpop.permute.xlu0 %3125  ;;  %v3128_v52 = vpop.permute.xlu1 %3127 }
 0x43d   : > { %3210 = vst.msk [vmem:[#allocation3 + $0x60] sm:$0xff] %vm3197_vm0, %v3126_v51  ;;  %3211 = vst.msk [vmem:[#allocation3 + $0x68] sm:$0xff] %vm3197_vm0, %v3128_v52  ;;  %v3622_v52 = vld [vmem:[#allocation2 + $0x93] sm:$0xff] }
 0x43e   : > { %3499 = vrot.lane.b32.xlu0 %v3429_v45, %s5523_s23  ;;  %3501 = vrot.lane.b32.xlu1 %v3430_v47, %s5523_s23  ;;  %v3621_v45 = vld [vmem:[#allocation2 + $0x83] sm:$0xff] }
 0x440   : > { %v3130_v3 = vpop.permute.xlu0 %3129  ;;  %v3132_v4 = vpop.permute.xlu1 %3131 }
 0x441   : > { %3212 = vst.msk [vmem:[#allocation3 + $0x70] sm:$0xff] %vm3197_vm0, %v3130_v3  ;;  %3213 = vst.msk [vmem:[#allocation3 + $0x78] sm:$0xff] %vm3197_vm0, %v3132_v4  ;;  %v3624_v4 = vld [vmem:[#allocation2 + $0xab] sm:$0xff] }
 0x442   : > { %3503 = vrot.lane.b32.xlu0 %v3431_v59, %s5523_s23  ;;  %3505 = vrot.lane.b32.xlu1 %v3432_v60, %s5523_s23  ;;  %v3623_v59 = vld [vmem:[#allocation2 + $0x9b] sm:$0xff] }
 0x444   : > { %v3134_v19 = vpop.permute.xlu0 %3133  ;;  %v3136_v20 = vpop.permute.xlu1 %3135 }
 0x445   : > { %3214 = vst.msk [vmem:[#allocation3 + $0x80] sm:$0xff] %vm3197_vm0, %v3134_v19  ;;  %3215 = vst.msk [vmem:[#allocation3 + $0x88] sm:$0xff] %vm3197_vm0, %v3136_v20  ;;  %v3626_v20 = vld [vmem:[#allocation2 + $0xc3] sm:$0xff] }
 0x446   : > { %3507 = vrot.lane.b32.xlu0 %v3433_v11, %s5523_s23  ;;  %3509 = vrot.lane.b32.xlu1 %v3434_v12, %s5523_s23  ;;  %v3625_v11 = vld [vmem:[#allocation2 + $0xb3] sm:$0xff] }
 0x448   : > { %v3138_v25 = vpop.permute.xlu0 %3137  ;;  %v3140_v26 = vpop.permute.xlu1 %3139 }
 0x449   : > { %3216 = vst.msk [vmem:[#allocation3 + $0x90] sm:$0xff] %vm3197_vm0, %v3138_v25  ;;  %3217 = vst.msk [vmem:[#allocation3 + $0x98] sm:$0xff] %vm3197_vm0, %v3140_v26  ;;  %v6972_v26 = vld [vmem:[#allocation2 + $0xdb] sm:$0xff] }
 0x44a   : > { %3511 = vrot.lane.b32.xlu0 %v3435_v23, %s5523_s23  ;;  %3513 = vrot.lane.b32.xlu1 %v3436_v24, %s5523_s23  ;;  %v6965_v23 = vld [vmem:[#allocation2 + $0xcb] sm:$0xff] }
 0x44c   : > { %v3142_v29 = vpop.permute.xlu0 %3141  ;;  %v3144_v30 = vpop.permute.xlu1 %3143 }
 0x44d   : > { %3218 = vst.msk [vmem:[#allocation3 + $0xa0] sm:$0xff] %vm3197_vm0, %v3142_v29  ;;  %3219 = vst.msk [vmem:[#allocation3 + $0xa8] sm:$0xff] %vm3197_vm0, %v3144_v30  ;;  %v6974_v29 = vld [vmem:[#allocation2 + $0xe3] sm:$0xff] }
 0x44e   : > { %3515 = vrot.lane.b32.xlu0 %v6885_v27, %s5523_s23  ;;  %3517 = vrot.lane.b32.xlu1 %v6887_v28, %s5523_s23 }
 0x450   : > { %v3146_v49 = vpop.permute.xlu0 %3145  ;;  %v3148_v50 = vpop.permute.xlu1 %3147 }
 0x451   : > { %3220 = vst.msk [vmem:[#allocation3 + $0xb0] sm:$0xff] %vm3197_vm0, %v3146_v49  ;;  %3221 = vst.msk [vmem:[#allocation3 + $0xb8] sm:$0xff] %vm3197_vm0, %v3148_v50  ;;  %v6982_v50 = vld [vmem:[#allocation2 + $0xf3] sm:$0xff] }
 0x452   : > { %3519 = vrot.lane.b32.xlu0 %v6895_v46, %s5523_s23  ;;  %3521 = vrot.lane.b32.xlu1 %v6897_v48, %s5523_s23 }
 0x454   : > { %v3150_v55 = vpop.permute.xlu0 %3149  ;;  %v3152_v56 = vpop.permute.xlu1 %3151 }
 0x455   : > { %3222 = vst.msk [vmem:[#allocation3 + $0xc0] sm:$0xff] %vm3197_vm0, %v3150_v55  ;;  %3223 = vst.msk [vmem:[#allocation3 + $0xc8] sm:$0xff] %vm3197_vm0, %v3152_v56  ;;  %v6992_v56 = vld [vmem:[#allocation2 + $0x10b] sm:$0xff] }
 0x456   : > { %3523 = vrot.lane.b32.xlu0 %v3441_v53, %s5523_s23  ;;  %3525 = vrot.lane.b32.xlu1 %v3442_v54, %s5523_s23  ;;  %v6984_v53 = vld [vmem:[#allocation2 + $0xfb] sm:$0xff] }
 0x458   : > { %v3154_v61 = vpop.permute.xlu0 %3153  ;;  %v3156_v62 = vpop.permute.xlu1 %3155 }
 0x459   : > { %3224 = vst.msk [vmem:[#allocation3 + $0xd0] sm:$0xff] %vm3197_vm0, %v3154_v61  ;;  %3225 = vst.msk [vmem:[#allocation3 + $0xd8] sm:$0xff] %vm3197_vm0, %v3156_v62  ;;  %v3634_v62 = vld [vmem:[#allocation2 + $0x123] sm:$0xff] }
 0x45a   : > { %3527 = vrot.lane.b32.xlu0 %v3443_v57, %s5523_s23  ;;  %3529 = vrot.lane.b32.xlu1 %v3444_v58, %s5523_s23  ;;  %v6994_v57 = vld [vmem:[#allocation2 + $0x113] sm:$0xff] }
 0x45c   : > { %v3158_v1 = vpop.permute.xlu0 %3157  ;;  %v3160_v2 = vpop.permute.xlu1 %3159 }
 0x45d   : > { %3226 = vst.msk [vmem:[#allocation3 + $0xe0] sm:$0xff] %vm3197_vm0, %v3158_v1  ;;  %3227 = vst.msk [vmem:[#allocation3 + $0xe8] sm:$0xff] %vm3197_vm0, %v3160_v2  ;;  %v3636_v2 = vld [vmem:[#allocation2 + $0x13b] sm:$0xff] }
 0x45e   : > { %3531 = vrot.lane.b32.xlu0 %v3445_v63, %s5523_s23  ;;  %3533 = vrot.lane.b32.xlu1 %v3446_v0, %s5523_s23  ;;  %v3635_v63 = vld [vmem:[#allocation2 + $0x12b] sm:$0xff] }
 0x460   : > { %v3162_v7 = vpop.permute.xlu0 %3161  ;;  %v3164_v8 = vpop.permute.xlu1 %3163 }
 0x461   : > { %3228 = vst.msk [vmem:[#allocation3 + $0xf0] sm:$0xff] %vm3197_vm0, %v3162_v7  ;;  %3229 = vst.msk [vmem:[#allocation3 + $0xf8] sm:$0xff] %vm3197_vm0, %v3164_v8  ;;  %v3638_v8 = vld [vmem:[#allocation2 + $0x153] sm:$0xff] }
 0x462   : > { %3535 = vrot.lane.b32.xlu0 %v3447_v5, %s5523_s23  ;;  %3537 = vrot.lane.b32.xlu1 %v3448_v6, %s5523_s23  ;;  %v3637_v5 = vld [vmem:[#allocation2 + $0x143] sm:$0xff] }
 0x464   : > { %v3295_v13 = vpop.permute.xlu0 %3294  ;;  %v3297_v14 = vpop.permute.xlu1 %3296 }
 0x465   : > { %3391 = vst.msk [vmem:[#allocation3] sm:$0xff] %vm3390_vm1, %v3295_v13  ;;  %3392 = vst.msk [vmem:[#allocation3 + $0x8] sm:$0xff] %vm3390_vm1, %v3297_v14  ;;  %v3640_v14 = vld [vmem:[#allocation2 + $0x16b] sm:$0xff] }
 0x466   : > { %3539 = vrot.lane.b32.xlu0 %v3449_v9, %s5523_s23  ;;  %3541 = vrot.lane.b32.xlu1 %v3450_v10, %s5523_s23  ;;  %v3639_v9 = vld [vmem:[#allocation2 + $0x15b] sm:$0xff] }
 0x468   : > { %v3299_v33 = vpop.permute.xlu0 %3298  ;;  %v3301_v17 = vpop.permute.xlu1 %3300 }
 0x469   : > { %3393 = vst.msk [vmem:[#allocation3 + $0x10] sm:$0xff] %vm3390_vm1, %v3299_v33  ;;  %3394 = vst.msk [vmem:[#allocation3 + $0x18] sm:$0xff] %vm3390_vm1, %v3301_v17  ;;  %v3641_v33 = vld [vmem:[#allocation2 + $0x173] sm:$0xff] }
 0x46a   : > { %3543 = vrot.lane.b32.xlu0 %v6925_v15, %s5523_s23  ;;  %3545 = vrot.lane.b32.xlu1 %v6927_v16, %s5523_s23 }
 0x46c   : > { %v3303_v36 = vpop.permute.xlu0 %3302  ;;  %v3305_v21 = vpop.permute.xlu1 %3304 }
 0x46d   : > { %3395 = vst.msk [vmem:[#allocation3 + $0x20] sm:$0xff] %vm3390_vm1, %v3303_v36  ;;  %3396 = vst.msk [vmem:[#allocation3 + $0x28] sm:$0xff] %vm3390_vm1, %v3305_v21  ;;  %v7018_v21 = vld [vmem:[#allocation2 + $0x183] sm:$0xff] }
 0x46e   : > { %3547 = vrot.lane.b32.xlu0 %v6935_v18, %s5523_s23  ;;  %3549 = vrot.lane.b32.xlu1 %v6937_v35, %s5523_s23  ;;  %s7675_s23 = scalar_lea.hbm %s7719_s2, %s5309_s17 }
 0x470   : > { %v3307_v38 = vpop.permute.xlu0 %3306  ;;  %v3309_v39 = vpop.permute.xlu1 %3308 }
 0x471   : > { %3397 = vst.msk [vmem:[#allocation3 + $0x30] sm:$0xff] %vm3390_vm1, %v3307_v38  ;;  %3398 = vst.msk [vmem:[#allocation3 + $0x38] sm:$0xff] %vm3390_vm1, %v3309_v39  ;;  %v7028_v39 = vld [vmem:[#allocation2 + $0x19b] sm:$0xff] }
 0x472   : > { %3680 = vrot.lane.b32.xlu0 %v3616_v22, %s5524_s24  ;;  %3682 = vrot.lane.b32.xlu1 %v3617_v37, %s5524_s24  ;;  %v7020_v22 = vld [vmem:[#allocation2 + $0x18b] sm:$0xff] }
 0x474   : > { %v3311_v42 = vpop.permute.xlu0 %3310  ;;  %v3313_v43 = vpop.permute.xlu1 %3312 }
 0x475   : > { %3399 = vst.msk [vmem:[#allocation3 + $0x40] sm:$0xff] %vm3390_vm1, %v3311_v42  ;;  %3400 = vst.msk [vmem:[#allocation3 + $0x48] sm:$0xff] %vm3390_vm1, %v3313_v43  ;;  %v7038_v43 = vld [vmem:[#allocation2 + $0x1b3] sm:$0xff] }
 0x476   : > { %3684 = vrot.lane.b32.xlu0 %v3618_v40, %s5524_s24  ;;  %3686 = vrot.lane.b32.xlu1 %v3619_v41, %s5524_s24  ;;  %v7030_v40 = vld [vmem:[#allocation2 + $0x1a3] sm:$0xff] }
 0x478   : > { %v3315_v47 = vpop.permute.xlu0 %3314  ;;  %v3317_v51 = vpop.permute.xlu1 %3316 }
 0x479   : > { %3401 = vst.msk [vmem:[#allocation3 + $0x50] sm:$0xff] %vm3390_vm1, %v3315_v47  ;;  %3402 = vst.msk [vmem:[#allocation3 + $0x58] sm:$0xff] %vm3390_vm1, %v3317_v51  ;;  %v3809_v51 = vld [vmem:[#allocation2 + $0x4c] sm:$0xff] }
 0x47a   : > { %3688 = vrot.lane.b32.xlu0 %v3620_v44, %s5524_s24  ;;  %3690 = vrot.lane.b32.xlu1 %v3621_v45, %s5524_s24  ;;  %v7040_v44 = vld [vmem:[#allocation2 + $0x1bb] sm:$0xff] }
 0x47c   : > { %v3319_v60 = vpop.permute.xlu0 %3318  ;;  %v3321_v3 = vpop.permute.xlu1 %3320 }
 0x47d   : > { %3403 = vst.msk [vmem:[#allocation3 + $0x60] sm:$0xff] %vm3390_vm1, %v3319_v60  ;;  %3404 = vst.msk [vmem:[#allocation3 + $0x68] sm:$0xff] %vm3390_vm1, %v3321_v3  ;;  %v3811_v3 = vld [vmem:[#allocation2 + $0x64] sm:$0xff] }
 0x47e   : > { %3692 = vrot.lane.b32.xlu0 %v3622_v52, %s5524_s24  ;;  %3694 = vrot.lane.b32.xlu1 %v3623_v59, %s5524_s24  ;;  %v3810_v52 = vld [vmem:[#allocation2 + $0x54] sm:$0xff] }
 0x480   : > { %v3323_v12 = vpop.permute.xlu0 %3322  ;;  %v3325_v19 = vpop.permute.xlu1 %3324 }
 0x481   : > { %3405 = vst.msk [vmem:[#allocation3 + $0x70] sm:$0xff] %vm3390_vm1, %v3323_v12  ;;  %3406 = vst.msk [vmem:[#allocation3 + $0x78] sm:$0xff] %vm3390_vm1, %v3325_v19  ;;  %v3813_v19 = vld [vmem:[#allocation2 + $0x7c] sm:$0xff] }
 0x482   : > { %3696 = vrot.lane.b32.xlu0 %v3624_v4, %s5524_s24  ;;  %3698 = vrot.lane.b32.xlu1 %v3625_v11, %s5524_s24  ;;  %v3812_v4 = vld [vmem:[#allocation2 + $0x6c] sm:$0xff] }
 0x484   : > { %v3327_v24 = vpop.permute.xlu0 %3326  ;;  %v3329_v25 = vpop.permute.xlu1 %3328 }
 0x485   : > { %3407 = vst.msk [vmem:[#allocation3 + $0x80] sm:$0xff] %vm3390_vm1, %v3327_v24  ;;  %3408 = vst.msk [vmem:[#allocation3 + $0x88] sm:$0xff] %vm3390_vm1, %v3329_v25 }
 0x486   : > { %3700 = vrot.lane.b32.xlu0 %v3626_v20, %s5524_s24  ;;  %3702 = vrot.lane.b32.xlu1 %v6965_v23, %s5524_s24  ;;  %v3814_v20 = vld [vmem:[#allocation2 + $0x84] sm:$0xff] }
 0x488   : > { %v3331_v30 = vpop.permute.xlu0 %3330  ;;  %v3333_v49 = vpop.permute.xlu1 %3332 }
 0x489   : > { %3409 = vst.msk [vmem:[#allocation3 + $0x90] sm:$0xff] %vm3390_vm1, %v3331_v30  ;;  %3410 = vst.msk [vmem:[#allocation3 + $0x98] sm:$0xff] %vm3390_vm1, %v3333_v49  ;;  %v3815_v30 = vld [vmem:[#allocation2 + $0x94] sm:$0xff]  ;;  %v3816_v49 = vld [vmem:[#allocation2 + $0x9c] sm:$0xff] }
 0x48a   : > { %3704 = vrot.lane.b32.xlu0 %v6972_v26, %s5524_s24  ;;  %3706 = vrot.lane.b32.xlu1 %v6974_v29, %s5524_s24 }
 0x48c   : > { %v3335_v54 = vpop.permute.xlu0 %3334  ;;  %v3337_v55 = vpop.permute.xlu1 %3336 }
 0x48d   : > { %3411 = vst.msk [vmem:[#allocation3 + $0xa0] sm:$0xff] %vm3390_vm1, %v3335_v54  ;;  %3412 = vst.msk [vmem:[#allocation3 + $0xa8] sm:$0xff] %vm3390_vm1, %v3337_v55 }
 0x48e   : > { %3708 = vrot.lane.b32.xlu0 %v6982_v50, %s5524_s24  ;;  %3710 = vrot.lane.b32.xlu1 %v6984_v53, %s5524_s24 }
 0x490   : > { %v3339_v58 = vpop.permute.xlu0 %3338  ;;  %v3341_v61 = vpop.permute.xlu1 %3340 }
 0x491   : > { %3413 = vst.msk [vmem:[#allocation3 + $0xb0] sm:$0xff] %vm3390_vm1, %v3339_v58  ;;  %3414 = vst.msk [vmem:[#allocation3 + $0xb8] sm:$0xff] %vm3390_vm1, %v3341_v61  ;;  %v3817_v58 = vld [vmem:[#allocation2 + $0xac] sm:$0xff]  ;;  %v7064_v61 = vld [vmem:[#allocation2 + $0xb4] sm:$0xff] }
 0x492   : > { %3712 = vrot.lane.b32.xlu0 %v6992_v56, %s5524_s24  ;;  %3714 = vrot.lane.b32.xlu1 %v6994_v57, %s5524_s24 }
 0x494   : > { %v3343_v0 = vpop.permute.xlu0 %3342  ;;  %v3345_v1 = vpop.permute.xlu1 %3344 }
 0x495   : > { %3415 = vst.msk [vmem:[#allocation3 + $0xc0] sm:$0xff] %vm3390_vm1, %v3343_v0  ;;  %3416 = vst.msk [vmem:[#allocation3 + $0xc8] sm:$0xff] %vm3390_vm1, %v3345_v1  ;;  %v7071_v0 = vld [vmem:[#allocation2 + $0xc4] sm:$0xff]  ;;  %v7073_v1 = vld [vmem:[#allocation2 + $0xcc] sm:$0xff] }
 0x496   : > { %3716 = vrot.lane.b32.xlu0 %v3634_v62, %s5524_s24  ;;  %3718 = vrot.lane.b32.xlu1 %v3635_v63, %s5524_s24 }
 0x498   : > { %v3347_v6 = vpop.permute.xlu0 %3346  ;;  %v3349_v7 = vpop.permute.xlu1 %3348 }
 0x499   : > { %3417 = vst.msk [vmem:[#allocation3 + $0xd0] sm:$0xff] %vm3390_vm1, %v3347_v6  ;;  %3418 = vst.msk [vmem:[#allocation3 + $0xd8] sm:$0xff] %vm3390_vm1, %v3349_v7  ;;  %v7081_v6 = vld [vmem:[#allocation2 + $0xdc] sm:$0xff]  ;;  %v7083_v7 = vld [vmem:[#allocation2 + $0xe4] sm:$0xff] }
 0x49a   : > { %3720 = vrot.lane.b32.xlu0 %v3636_v2, %s5524_s24  ;;  %3722 = vrot.lane.b32.xlu1 %v3637_v5, %s5524_s24 }
 0x49c   : > { %v3351_v10 = vpop.permute.xlu0 %3350  ;;  %v3353_v13 = vpop.permute.xlu1 %3352 }
 0x49d   : > { %3419 = vst.msk [vmem:[#allocation3 + $0xe0] sm:$0xff] %vm3390_vm1, %v3351_v10  ;;  %3420 = vst.msk [vmem:[#allocation3 + $0xe8] sm:$0xff] %vm3390_vm1, %v3353_v13  ;;  %v7091_v10 = vld [vmem:[#allocation2 + $0xf4] sm:$0xff]  ;;  %v7093_v13 = vld [vmem:[#allocation2 + $0xfc] sm:$0xff] }
 0x49e   : > { %3724 = vrot.lane.b32.xlu0 %v3638_v8, %s5524_s24  ;;  %3726 = vrot.lane.b32.xlu1 %v3639_v9, %s5524_s24 }
 0x4a0   : > { %v3355_v17 = vpop.permute.xlu0 %3354  ;;  %v3357_v36 = vpop.permute.xlu1 %3356 }
 0x4a1   : > { %3421 = vst.msk [vmem:[#allocation3 + $0xf0] sm:$0xff] %vm3390_vm1, %v3355_v17  ;;  %3422 = vst.msk [vmem:[#allocation3 + $0xf8] sm:$0xff] %vm3390_vm1, %v3357_v36  ;;  %v7101_v17 = vld [vmem:[#allocation2 + $0x10c] sm:$0xff]  ;;  %v7103_v36 = vld [vmem:[#allocation2 + $0x114] sm:$0xff] }
 0x4a2   : > { %3728 = vrot.lane.b32.xlu0 %v3640_v14, %s5524_s24  ;;  %3730 = vrot.lane.b32.xlu1 %v3641_v33, %s5524_s24 }
 0x4a4   : > { %v3488_v37 = vpop.permute.xlu0 %3487  ;;  %v3490_v38 = vpop.permute.xlu1 %3489 }
 0x4a5   : > { %3584 = vst.msk [vmem:[#allocation3] sm:$0xff] %vm3583_vm2, %v3488_v37  ;;  %3585 = vst.msk [vmem:[#allocation3 + $0x8] sm:$0xff] %vm3583_vm2, %v3490_v38 }
 0x4a6   : > { %3732 = vrot.lane.b32.xlu0 %v7018_v21, %s5524_s24  ;;  %3734 = vrot.lane.b32.xlu1 %v7020_v22, %s5524_s24 }
 0x4a8   : > { %v3492_v41 = vpop.permute.xlu0 %3491  ;;  %v3494_v42 = vpop.permute.xlu1 %3493 }
 0x4a9   : > { %3586 = vst.msk [vmem:[#allocation3 + $0x10] sm:$0xff] %vm3583_vm2, %v3492_v41  ;;  %3587 = vst.msk [vmem:[#allocation3 + $0x18] sm:$0xff] %vm3583_vm2, %v3494_v42  ;;  %v3827_v41 = vld [vmem:[#allocation2 + $0x124] sm:$0xff]  ;;  %v3828_v42 = vld [vmem:[#allocation2 + $0x12c] sm:$0xff] }
 0x4aa   : > { %3736 = vrot.lane.b32.xlu0 %v7028_v39, %s5524_s24  ;;  %3738 = vrot.lane.b32.xlu1 %v7030_v40, %s5524_s24 }
 0x4ac   : > { %v3496_v45 = vpop.permute.xlu0 %3495  ;;  %v3498_v47 = vpop.permute.xlu1 %3497 }
 0x4ad   : > { %3588 = vst.msk [vmem:[#allocation3 + $0x20] sm:$0xff] %vm3583_vm2, %v3496_v45  ;;  %3589 = vst.msk [vmem:[#allocation3 + $0x28] sm:$0xff] %vm3583_vm2, %v3498_v47 }
 0x4ae   : > { %3740 = vrot.lane.b32.xlu0 %v7038_v43, %s5524_s24  ;;  %3742 = vrot.lane.b32.xlu1 %v7040_v44, %s5524_s24  ;;  %s7677_s24 = scalar_lea.sflag [#allocation5], %s134_s7 }
 0x4b0   : > { %v3500_v59 = vpop.permute.xlu0 %3499  ;;  %v3502_v60 = vpop.permute.xlu1 %3501 }
 0x4b1   : > { %3590 = vst.msk [vmem:[#allocation3 + $0x30] sm:$0xff] %vm3583_vm2, %v3500_v59  ;;  %3591 = vst.msk [vmem:[#allocation3 + $0x38] sm:$0xff] %vm3583_vm2, %v3502_v60 }
 0x4b2   : > { %3873 = vrot.lane.b32.xlu0 %v3809_v51, %s5525_s25  ;;  %3875 = vrot.lane.b32.xlu1 %v3810_v52, %s5525_s25  ;;  %v3829_v51 = vld [vmem:[#allocation2 + $0x13c] sm:$0xff]  ;;  %v3830_v52 = vld [vmem:[#allocation2 + $0x144] sm:$0xff] }
 0x4b4   : > { %v3504_v11 = vpop.permute.xlu0 %3503  ;;  %v3506_v12 = vpop.permute.xlu1 %3505 }
 0x4b5   : > { %3592 = vst.msk [vmem:[#allocation3 + $0x40] sm:$0xff] %vm3583_vm2, %v3504_v11  ;;  %3593 = vst.msk [vmem:[#allocation3 + $0x48] sm:$0xff] %vm3583_vm2, %v3506_v12 }
 0x4b6   : > { %3877 = vrot.lane.b32.xlu0 %v3811_v3, %s5525_s25  ;;  %3879 = vrot.lane.b32.xlu1 %v3812_v4, %s5525_s25  ;;  %v3831_v3 = vld [vmem:[#allocation2 + $0x154] sm:$0xff]  ;;  %v7119_v4 = vld [vmem:[#allocation2 + $0x15c] sm:$0xff] }
 0x4b8   : > { %v3508_v24 = vpop.permute.xlu0 %3507  ;;  %v3510_v25 = vpop.permute.xlu1 %3509 }
 0x4b9   : > { %3594 = vst.msk [vmem:[#allocation3 + $0x50] sm:$0xff] %vm3583_vm2, %v3508_v24  ;;  %3595 = vst.msk [vmem:[#allocation3 + $0x58] sm:$0xff] %vm3583_vm2, %v3510_v25 }
 0x4ba   : > { %3881 = vrot.lane.b32.xlu0 %v3813_v19, %s5525_s25  ;;  %3883 = vrot.lane.b32.xlu1 %v3814_v20, %s5525_s25  ;;  %v7126_v19 = vld [vmem:[#allocation2 + $0x16c] sm:$0xff]  ;;  %v7128_v20 = vld [vmem:[#allocation2 + $0x174] sm:$0xff] }
 0x4bc   : > { %v3512_v54 = vpop.permute.xlu0 %3511  ;;  %v3514_v55 = vpop.permute.xlu1 %3513 }
 0x4bd   : > { %3596 = vst.msk [vmem:[#allocation3 + $0x60] sm:$0xff] %vm3583_vm2, %v3512_v54  ;;  %3597 = vst.msk [vmem:[#allocation3 + $0x68] sm:$0xff] %vm3583_vm2, %v3514_v55 }
 0x4be   : > { %3885 = vrot.lane.b32.xlu0 %v3815_v30, %s5525_s25  ;;  %3887 = vrot.lane.b32.xlu1 %v3816_v49, %s5525_s25  ;;  %v7136_v30 = vld [vmem:[#allocation2 + $0x184] sm:$0xff]  ;;  %v7138_v49 = vld [vmem:[#allocation2 + $0x1bc] sm:$0xff] }
 0x4c0   : > { %v3516_v62 = vpop.permute.xlu0 %3515  ;;  %v3518_v63 = vpop.permute.xlu1 %3517 }
 0x4c1   : > { %3598 = vst.msk [vmem:[#allocation3 + $0x70] sm:$0xff] %vm3583_vm2, %v3516_v62  ;;  %3599 = vst.msk [vmem:[#allocation3 + $0x78] sm:$0xff] %vm3583_vm2, %v3518_v63  ;;  %v4018_v62 = vld [vmem:[#allocation2 + $0x110] sm:$0xff] }
 0x4c2   : > { %3889 = vrot.lane.b32.xlu0 %v3817_v58, %s5525_s25  ;;  %3891 = vrot.lane.b32.xlu1 %v7064_v61, %s5525_s25  ;;  %v4034_v58 = vld [vmem:[#allocation2 + $0x1d0] sm:$0xff] }
 0x4c4   : > { %v3520_v2 = vpop.permute.xlu0 %3519  ;;  %v3522_v5 = vpop.permute.xlu1 %3521 }
 0x4c5   : > { %3600 = vst.msk [vmem:[#allocation3 + $0x80] sm:$0xff] %vm3583_vm2, %v3520_v2  ;;  %3601 = vst.msk [vmem:[#allocation3 + $0x88] sm:$0xff] %vm3583_vm2, %v3522_v5  ;;  %v4227_v5 = vld [vmem:[#allocation2 + $0x1d1] sm:$0xff] }
 0x4c6   : > { %3893 = vrot.lane.b32.xlu0 %v7071_v0, %s5525_s25  ;;  %3895 = vrot.lane.b32.xlu1 %v7073_v1, %s5525_s25 }
 0x4c8   : > { %v3524_v8 = vpop.permute.xlu0 %3523  ;;  %v3526_v9 = vpop.permute.xlu1 %3525 }
 0x4c9   : > { %3602 = vst.msk [vmem:[#allocation3 + $0x90] sm:$0xff] %vm3583_vm2, %v3524_v8  ;;  %3603 = vst.msk [vmem:[#allocation3 + $0x98] sm:$0xff] %vm3583_vm2, %v3526_v9 }
 0x4ca   : > { %3897 = vrot.lane.b32.xlu0 %v7081_v6, %s5525_s25  ;;  %3899 = vrot.lane.b32.xlu1 %v7083_v7, %s5525_s25 }
 0x4cc   : > { %v3528_v14 = vpop.permute.xlu0 %3527  ;;  %v3530_v33 = vpop.permute.xlu1 %3529 }
 0x4cd   : > { %3604 = vst.msk [vmem:[#allocation3 + $0xa0] sm:$0xff] %vm3583_vm2, %v3528_v14  ;;  %3605 = vst.msk [vmem:[#allocation3 + $0xa8] sm:$0xff] %vm3583_vm2, %v3530_v33  ;;  %v4420_v14 = vld [vmem:[#allocation2 + $0x1d2] sm:$0xff] }
 0x4ce   : > { %3901 = vrot.lane.b32.xlu0 %v7091_v10, %s5525_s25  ;;  %3903 = vrot.lane.b32.xlu1 %v7093_v13, %s5525_s25  ;;  %v7155_v33 = vld [vmem:[#allocation2 + $0x1b4] sm:$0xff] }
 0x4d0   : > { %v3532_v37 = vpop.permute.xlu0 %3531  ;;  %v3534_v38 = vpop.permute.xlu1 %3533 }
 0x4d1   : > { %3606 = vst.msk [vmem:[#allocation3 + $0xb0] sm:$0xff] %vm3583_vm2, %v3532_v37  ;;  %3607 = vst.msk [vmem:[#allocation3 + $0xb8] sm:$0xff] %vm3583_vm2, %v3534_v38 }
 0x4d2   : > { %3905 = vrot.lane.b32.xlu0 %v7101_v17, %s5525_s25  ;;  %3907 = vrot.lane.b32.xlu1 %v7103_v36, %s5525_s25 }
 0x4d4   : > { %v3536_v45 = vpop.permute.xlu0 %3535  ;;  %v3538_v47 = vpop.permute.xlu1 %3537 }
 0x4d5   : > { %3608 = vst.msk [vmem:[#allocation3 + $0xc0] sm:$0xff] %vm3583_vm2, %v3536_v45  ;;  %3609 = vst.msk [vmem:[#allocation3 + $0xc8] sm:$0xff] %vm3583_vm2, %v3538_v47 }
 0x4d6   : > { %3909 = vrot.lane.b32.xlu0 %v3827_v41, %s5525_s25  ;;  %3911 = vrot.lane.b32.xlu1 %v3828_v42, %s5525_s25  ;;  %v4613_v41 = vld [vmem:[#allocation2 + $0x1d3] sm:$0xff] }
 0x4d8   : > { %v3540_v59 = vpop.permute.xlu0 %3539  ;;  %v3542_v60 = vpop.permute.xlu1 %3541 }
 0x4d9   : > { %3610 = vst.msk [vmem:[#allocation3 + $0xd0] sm:$0xff] %vm3583_vm2, %v3540_v59  ;;  %3611 = vst.msk [vmem:[#allocation3 + $0xd8] sm:$0xff] %vm3583_vm2, %v3542_v60  ;;  %v4017_v59 = vld [vmem:[#allocation2 + $0x108] sm:$0xff] }
 0x4da   : > { %3913 = vrot.lane.b32.xlu0 %v3829_v51, %s5525_s25  ;;  %3915 = vrot.lane.b32.xlu1 %v3830_v52, %s5525_s25  ;;  %v4806_v52 = vld [vmem:[#allocation2 + $0x1d4] sm:$0xff] }
 0x4dc   : > { %v3544_v11 = vpop.permute.xlu0 %3543  ;;  %v3546_v12 = vpop.permute.xlu1 %3545 }
 0x4dd   : > { %3612 = vst.msk [vmem:[#allocation3 + $0xe0] sm:$0xff] %vm3583_vm2, %v3544_v11  ;;  %3613 = vst.msk [vmem:[#allocation3 + $0xe8] sm:$0xff] %vm3583_vm2, %v3546_v12 }
 0x4de   : > { %3917 = vrot.lane.b32.xlu0 %v3831_v3, %s5525_s25  ;;  %3919 = vrot.lane.b32.xlu1 %v7119_v4, %s5525_s25 }
 0x4e0   : > { %v3548_v24 = vpop.permute.xlu0 %3547  ;;  %v3550_v25 = vpop.permute.xlu1 %3549 }
 0x4e1   : > { %3614 = vst.msk [vmem:[#allocation3 + $0xf0] sm:$0xff] %vm3583_vm2, %v3548_v24  ;;  %3615 = vst.msk [vmem:[#allocation3 + $0xf8] sm:$0xff] %vm3583_vm2, %v3550_v25 }
 0x4e2   : > { %3921 = vrot.lane.b32.xlu0 %v7126_v19, %s5525_s25  ;;  %3923 = vrot.lane.b32.xlu1 %v7128_v20, %s5525_s25 }
 0x4e4   : > { %v3681_v54 = vpop.permute.xlu0 %3680  ;;  %v3683_v55 = vpop.permute.xlu1 %3682 }
 0x4e5   : > { %3777 = vst.msk [vmem:[#allocation3] sm:$0xff] %vm3776_vm3, %v3681_v54  ;;  %3778 = vst.msk [vmem:[#allocation3 + $0x8] sm:$0xff] %vm3776_vm3, %v3683_v55  ;;  %v7186_v54 = vld [vmem:[#allocation2 + $0x1a4] sm:$0xff] }
 0x4e6   : > { %3925 = vrot.lane.b32.xlu0 %v7136_v30, %s5525_s25  ;;  %3935 = vrot.lane.b32.xlu1 %v7138_v49, %s5525_s25 }
 0x4e8   : > { %v3685_v63 = vpop.permute.xlu0 %3684  ;;  %v3687_v2 = vpop.permute.xlu1 %3686 }
 0x4e9   : > { %3779 = vst.msk [vmem:[#allocation3 + $0x10] sm:$0xff] %vm3776_vm3, %v3685_v63  ;;  %3780 = vst.msk [vmem:[#allocation3 + $0x18] sm:$0xff] %vm3776_vm3, %v3687_v2  ;;  %v4805_v2 = vld [vmem:[#allocation2 + $0x1cc] sm:$0xff] }
 0x4ea   : > { %4129 = vrot.lane.b32.xlu0 %v4034_v58, %s5526_s26  ;;  %4097 = vrot.lane.b32.xlu1 %v4018_v62, %s5526_s26  ;;  %v4032_v62 = vld [vmem:[#allocation2 + $0x1b8] sm:$0xff] }
 0x4ec   : > { %v3689_v8 = vpop.permute.xlu0 %3688  ;;  %v3691_v9 = vpop.permute.xlu1 %3690 }
 0x4ed   : > { %3781 = vst.msk [vmem:[#allocation3 + $0x20] sm:$0xff] %vm3776_vm3, %v3689_v8  ;;  %3782 = vst.msk [vmem:[#allocation3 + $0x28] sm:$0xff] %vm3776_vm3, %v3691_v9 }
 0x4ee   : > { %4322 = vrot.lane.b32.xlu0 %v4227_v5, %s5527_s27  ;;  %4290 = vrot.lane.b32.xlu1 %v6818_v32, %s5527_s27  ;;  %v4033_v32 = vld [vmem:[#allocation2 + $0x1c8] sm:$0xff] }
 0x4f0   : > { %v3693_v37 = vpop.permute.xlu0 %3692  ;;  %v3695_v38 = vpop.permute.xlu1 %3694 }
 0x4f1   : > { %3783 = vst.msk [vmem:[#allocation3 + $0x30] sm:$0xff] %vm3776_vm3, %v3693_v37  ;;  %3784 = vst.msk [vmem:[#allocation3 + $0x38] sm:$0xff] %vm3776_vm3, %v3695_v38  ;;  %v4209_v37 = vld [vmem:[#allocation2 + $0xf9] sm:$0xff] }
 0x4f2   : > { %4515 = vrot.lane.b32.xlu0 %v4420_v14, %s5528_s28  ;;  %3933 = vrot.lane.b32.xlu1 %v7155_v33, %s5525_s25 }
 0x4f4   : > { %v3697_v42 = vpop.permute.xlu0 %3696  ;;  %v3699_v45 = vpop.permute.xlu1 %3698 }
 0x4f5   : > { %3785 = vst.msk [vmem:[#allocation3 + $0x40] sm:$0xff] %vm3776_vm3, %v3697_v42  ;;  %3786 = vst.msk [vmem:[#allocation3 + $0x48] sm:$0xff] %vm3776_vm3, %v3699_v45 }
 0x4f6   : > { %4483 = vrot.lane.b32.xlu0 %v6897_v48, %s5528_s28  ;;  %4708 = vrot.lane.b32.xlu1 %v4613_v41, %s5529_s29  ;;  %v4226_v48 = vld [vmem:[#allocation2 + $0x1c9] sm:$0xff] }
 0x4f8   : > { %v3701_v47 = vpop.permute.xlu0 %3700  ;;  %v3703_v51 = vpop.permute.xlu1 %3702 }
 0x4f9   : > { %3787 = vst.msk [vmem:[#allocation3 + $0x50] sm:$0xff] %vm3776_vm3, %v3701_v47  ;;  %3788 = vst.msk [vmem:[#allocation3 + $0x58] sm:$0xff] %vm3776_vm3, %v3703_v51 }
 0x4fa   : > { %4127 = vrot.lane.b32.xlu0 %v4033_v32, %s5526_s26  ;;  %4676 = vrot.lane.b32.xlu1 %v6994_v57, %s5529_s29  ;;  %v4419_v57 = vld [vmem:[#allocation2 + $0x1ca] sm:$0xff] }
 0x4fc   : > { %v3705_v60 = vpop.permute.xlu0 %3704  ;;  %v3707_v3 = vpop.permute.xlu1 %3706 }
 0x4fd   : > { %3789 = vst.msk [vmem:[#allocation3 + $0x60] sm:$0xff] %vm3776_vm3, %v3705_v60  ;;  %3790 = vst.msk [vmem:[#allocation3 + $0x68] sm:$0xff] %vm3776_vm3, %v3707_v3 }
 0x4fe   : > { %4901 = vrot.lane.b32.xlu0 %v4806_v52, %s5530_s30  ;;  %4095 = vrot.lane.b32.xlu1 %v4017_v59, %s5526_s26 }
 0x500   : > { %v3709_v11 = vpop.permute.xlu0 %3708  ;;  %v3711_v12 = vpop.permute.xlu1 %3710 }
 0x501   : > { %3791 = vst.msk [vmem:[#allocation3 + $0x70] sm:$0xff] %vm3776_vm3, %v3709_v11  ;;  %3792 = vst.msk [vmem:[#allocation3 + $0x78] sm:$0xff] %vm3776_vm3, %v3711_v12 }
 0x502   : > { %4320 = vrot.lane.b32.xlu0 %v4226_v48, %s5527_s27  ;;  %4869 = vrot.lane.b32.xlu1 %v7103_v36, %s5530_s30  ;;  %v4612_v36 = vld [vmem:[#allocation2 + $0x1cb] sm:$0xff] }
 0x504   : > { %v3713_v24 = vpop.permute.xlu0 %3712  ;;  %v3715_v25 = vpop.permute.xlu1 %3714 }
 0x505   : > { %3793 = vst.msk [vmem:[#allocation3 + $0x80] sm:$0xff] %vm3776_vm3, %v3713_v24  ;;  %3794 = vst.msk [vmem:[#allocation3 + $0x88] sm:$0xff] %vm3776_vm3, %v3715_v25 }
 0x506   : > { %4288 = vrot.lane.b32.xlu0 %v6816_v31, %s5527_s27  ;;  %4513 = vrot.lane.b32.xlu1 %v4419_v57, %s5528_s28 }
 0x508   : > { %v3717_v55 = vpop.permute.xlu0 %3716  ;;  %v3719_v58 = vpop.permute.xlu1 %3718 }
 0x509   : > { %3795 = vst.msk [vmem:[#allocation3 + $0x90] sm:$0xff] %vm3776_vm3, %v3717_v55  ;;  %3796 = vst.msk [vmem:[#allocation3 + $0x98] sm:$0xff] %vm3776_vm3, %v3719_v58  ;;  %v4223_v55 = vld [vmem:[#allocation2 + $0x1a1] sm:$0xff] }
 0x50a   : > { %3931 = vrot.lane.b32.xlu0 %v7186_v54, %s5525_s25  ;;  %4481 = vrot.lane.b32.xlu1 %v6895_v46, %s5528_s28  ;;  %v4016_v46 = vld [vmem:[#allocation2 + $0xf8] sm:$0xff] }
 0x50c   : > { %v3721_v63 = vpop.permute.xlu0 %3720  ;;  %v3723_v31 = vpop.permute.xlu1 %3722 }
 0x50d   : > { %3797 = vst.msk [vmem:[#allocation3 + $0xa0] sm:$0xff] %vm3776_vm3, %v3721_v63  ;;  %3798 = vst.msk [vmem:[#allocation3 + $0xa8] sm:$0xff] %vm3776_vm3, %v3723_v31 }
 0x50e   : > { %4706 = vrot.lane.b32.xlu0 %v4612_v36, %s5529_s29  ;;  %4125 = vrot.lane.b32.xlu1 %v4032_v62, %s5526_s26 }
 0x510   : > { %v3725_v5 = vpop.permute.xlu0 %3724  ;;  %v3727_v8 = vpop.permute.xlu1 %3726 }
 0x511   : > { %3799 = vst.msk [vmem:[#allocation3 + $0xb0] sm:$0xff] %vm3776_vm3, %v3725_v5  ;;  %3800 = vst.msk [vmem:[#allocation3 + $0xb8] sm:$0xff] %vm3776_vm3, %v3727_v8 }
 0x512   : > { %4674 = vrot.lane.b32.xlu0 %v6992_v56, %s5529_s29  ;;  %4899 = vrot.lane.b32.xlu1 %v4805_v2, %s5530_s30  ;;  %v7213_v56 = vld [vmem:[#allocation2 + $0x19c] sm:$0xff] }
 0x513   : > { %v4029_v2 = vld [vmem:[#allocation2 + $0x198] sm:$0xff] }
 0x514   : > { %v3729_v9 = vpop.permute.xlu0 %3728  ;;  %v3731_v14 = vpop.permute.xlu1 %3730 }
 0x515   : > { %3801 = vst.msk [vmem:[#allocation3 + $0xc0] sm:$0xff] %vm3776_vm3, %v3729_v9  ;;  %3802 = vst.msk [vmem:[#allocation3 + $0xc8] sm:$0xff] %vm3776_vm3, %v3731_v14  ;;  %v4222_v9 = vld [vmem:[#allocation2 + $0x199] sm:$0xff] }
 0x516   : > { %4093 = vrot.lane.b32.xlu0 %v4016_v46, %s5526_s26  ;;  %4318 = vrot.lane.b32.xlu1 %v6850_v34, %s5527_s27 }
 0x518   : > { %v3733_v38 = vpop.permute.xlu0 %3732  ;;  %v3735_v41 = vpop.permute.xlu1 %3734 }
 0x519   : > { %3803 = vst.msk [vmem:[#allocation3 + $0xd0] sm:$0xff] %vm3776_vm3, %v3733_v38  ;;  %3804 = vst.msk [vmem:[#allocation3 + $0xd8] sm:$0xff] %vm3776_vm3, %v3735_v41 }
 0x51a   : > { %4867 = vrot.lane.b32.xlu0 %v7101_v17, %s5530_s30  ;;  %4286 = vrot.lane.b32.xlu1 %v4209_v37, %s5527_s27  ;;  %v4031_v17 = vld [vmem:[#allocation2 + $0x1b0] sm:$0xff] }
 0x51c   : > { %v3737_v42 = vpop.permute.xlu0 %3736  ;;  %v3739_v45 = vpop.permute.xlu1 %3738 }
 0x51d   : > { %3805 = vst.msk [vmem:[#allocation3 + $0xe0] sm:$0xff] %vm3776_vm3, %v3737_v42  ;;  %3806 = vst.msk [vmem:[#allocation3 + $0xe8] sm:$0xff] %vm3776_vm3, %v3739_v45  ;;  %v4028_v45 = vld [vmem:[#allocation2 + $0x188] sm:$0xff] }
 0x51e   : > { %4511 = vrot.lane.b32.xlu0 %v6937_v35, %s5528_s28  ;;  %3929 = vrot.lane.b32.xlu1 %v7213_v56, %s5525_s25  ;;  %v4015_v35 = vld [vmem:[#allocation2 + $0xf0] sm:$0xff] }
 0x520   : > { %v3741_v34 = vpop.permute.xlu0 %3740  ;;  %v3743_v32 = vpop.permute.xlu1 %3742 }
 0x521   : > { %3807 = vst.msk [vmem:[#allocation3 + $0xf0] sm:$0xff] %vm3776_vm3, %v3741_v34  ;;  %3808 = vst.msk [vmem:[#allocation3 + $0xf8] sm:$0xff] %vm3776_vm3, %v3743_v32 }
 0x522   : > { %4479 = vrot.lane.b32.xlu0 %v6887_v28, %s5528_s28  ;;  %4704 = vrot.lane.b32.xlu1 %v7040_v44, %s5529_s29  ;;  %v4224_v28 = vld [vmem:[#allocation2 + $0x1b1] sm:$0xff] }
 0x524   : > { %v3874_v47 = vpop.permute.xlu0 %3873  ;;  %v3876_v51 = vpop.permute.xlu1 %3875 }
 0x525   : > { %3970 = vst.msk [vmem:[#allocation3] sm:$0xff] %vm3969_vm4, %v3874_v47  ;;  %3971 = vst.msk [vmem:[#allocation3 + $0x8] sm:$0xff] %vm3969_vm4, %v3876_v51  ;;  %v4221_v47 = vld [vmem:[#allocation2 + $0x189] sm:$0xff] }
 0x526   : > { %4123 = vrot.lane.b32.xlu0 %v4031_v17, %s5526_s26  ;;  %4672 = vrot.lane.b32.xlu1 %v6984_v53, %s5529_s29  ;;  %v4208_v53 = vld [vmem:[#allocation2 + $0xf1] sm:$0xff] }
 0x528   : > { %v3878_v52 = vpop.permute.xlu0 %3877  ;;  %v3880_v59 = vpop.permute.xlu1 %3879 }
 0x529   : > { %3972 = vst.msk [vmem:[#allocation3 + $0x10] sm:$0xff] %vm3969_vm4, %v3878_v52  ;;  %3973 = vst.msk [vmem:[#allocation3 + $0x18] sm:$0xff] %vm3969_vm4, %v3880_v59 }
 0x52a   : > { %4897 = vrot.lane.b32.xlu0 %v7138_v49, %s5530_s30  ;;  %4091 = vrot.lane.b32.xlu1 %v4015_v35, %s5526_s26  ;;  %v7247_v49 = vld [vmem:[#allocation2 + $0x18c] sm:$0xff] }
 0x52b   : > { %v4205_v35 = vld [vmem:[#allocation2 + $0xc9] sm:$0xff] }
 0x52c   : > { %v3882_v44 = vpop.permute.xlu0 %3881  ;;  %v3884_v60 = vpop.permute.xlu1 %3883 }
 0x52d   : > { %3974 = vst.msk [vmem:[#allocation3 + $0x20] sm:$0xff] %vm3969_vm4, %v3882_v44  ;;  %3975 = vst.msk [vmem:[#allocation3 + $0x28] sm:$0xff] %vm3969_vm4, %v3884_v60  ;;  %v4027_v60 = vld [vmem:[#allocation2 + $0x180] sm:$0xff] }
 0x52e   : > { %4316 = vrot.lane.b32.xlu0 %v4224_v28, %s5527_s27  ;;  %4865 = vrot.lane.b32.xlu1 %v7093_v13, %s5530_s30  ;;  %v4030_v13 = vld [vmem:[#allocation2 + $0x1a0] sm:$0xff] }
 0x530   : > { %v3886_v3 = vpop.permute.xlu0 %3885  ;;  %v3888_v48 = vpop.permute.xlu1 %3887 }
 0x531   : > { %3976 = vst.msk [vmem:[#allocation3 + $0x30] sm:$0xff] %vm3969_vm4, %v3886_v3  ;;  %3977 = vst.msk [vmem:[#allocation3 + $0x38] sm:$0xff] %vm3969_vm4, %v3888_v48 }
 0x532   : > { %4284 = vrot.lane.b32.xlu0 %v4208_v53, %s5527_s27  ;;  %4509 = vrot.lane.b32.xlu1 %v6935_v18, %s5528_s28 }
 0x534   : > { %v3890_v11 = vpop.permute.xlu0 %3889  ;;  %v3892_v12 = vpop.permute.xlu1 %3891 }
 0x535   : > { %3978 = vst.msk [vmem:[#allocation3 + $0x40] sm:$0xff] %vm3969_vm4, %v3890_v11  ;;  %3979 = vst.msk [vmem:[#allocation3 + $0x48] sm:$0xff] %vm3969_vm4, %v3892_v12  ;;  %v4220_v12 = vld [vmem:[#allocation2 + $0x181] sm:$0xff] }
 0x536   : > { %3927 = vrot.lane.b32.xlu0 %v7247_v49, %s5525_s25  ;;  %4477 = vrot.lane.b32.xlu1 %v6885_v27, %s5528_s28  ;;  %v4014_v27 = vld [vmem:[#allocation2 + $0xe0] sm:$0xff]  ;;  %s5531_s25 = smov [#allocation4]  }
 0x538   : > { %v3894_v57 = vpop.permute.xlu0 %3893  ;;  %v3896_v24 = vpop.permute.xlu1 %3895 }
 0x539   : > { %3980 = vst.msk [vmem:[#allocation3 + $0x50] sm:$0xff] %vm3969_vm4, %v3894_v57  ;;  %3981 = vst.msk [vmem:[#allocation3 + $0x58] sm:$0xff] %vm3969_vm4, %v3896_v24 }
 0x53a   : > { %4702 = vrot.lane.b32.xlu0 %v7038_v43, %s5529_s29  ;;  %4121 = vrot.lane.b32.xlu1 %v4030_v13, %s5526_s26  ;;  %v4207_v43 = vld [vmem:[#allocation2 + $0xe1] sm:$0xff] }
 0x53c   : > { %v3898_v18 = vpop.permute.xlu0 %3897  ;;  %v3900_v25 = vpop.permute.xlu1 %3899 }
 0x53d   : > { %3982 = vst.msk [vmem:[#allocation3 + $0x60] sm:$0xff] %vm3969_vm4, %v3898_v18  ;;  %3983 = vst.msk [vmem:[#allocation3 + $0x68] sm:$0xff] %vm3969_vm4, %v3900_v25  ;;  %v4413_v25 = vld [vmem:[#allocation2 + $0x182] sm:$0xff] }
 0x53e   : > { %4670 = vrot.lane.b32.xlu0 %v6982_v50, %s5529_s29  ;;  %4895 = vrot.lane.b32.xlu1 %v7155_v33, %s5530_s30  ;;  %v4400_v50 = vld [vmem:[#allocation2 + $0xe2] sm:$0xff] }
 0x540   : > { %v3902_v58 = vpop.permute.xlu0 %3901  ;;  %v3904_v36 = vpop.permute.xlu1 %3903 }
 0x541   : > { %3984 = vst.msk [vmem:[#allocation3 + $0x70] sm:$0xff] %vm3969_vm4, %v3902_v58  ;;  %3985 = vst.msk [vmem:[#allocation3 + $0x78] sm:$0xff] %vm3969_vm4, %v3904_v36  ;;  %v4026_v36 = vld [vmem:[#allocation2 + $0x170] sm:$0xff] }
 0x542   : > { %4089 = vrot.lane.b32.xlu0 %v4014_v27, %s5526_s26  ;;  %4314 = vrot.lane.b32.xlu1 %v4223_v55, %s5527_s27  ;;  %v4397_v27 = vld [vmem:[#allocation2 + $0xc2] sm:$0xff] }
 0x544   : > { %v3906_v62 = vpop.permute.xlu0 %3905  ;;  %v3908_v63 = vpop.permute.xlu1 %3907 }
 0x545   : > { %3986 = vst.msk [vmem:[#allocation3 + $0x80] sm:$0xff] %vm3969_vm4, %v3906_v62  ;;  %3987 = vst.msk [vmem:[#allocation3 + $0x88] sm:$0xff] %vm3969_vm4, %v3908_v63 }
 0x546   : > { %4863 = vrot.lane.b32.xlu0 %v7091_v10, %s5530_s30  ;;  %4282 = vrot.lane.b32.xlu1 %v4207_v43, %s5527_s27 }
 0x548   : > { %v3910_v33 = vpop.permute.xlu0 %3909  ;;  %v3912_v31 = vpop.permute.xlu1 %3911 }
 0x549   : > { %3988 = vst.msk [vmem:[#allocation3 + $0x90] sm:$0xff] %vm3969_vm4, %v3910_v33  ;;  %3989 = vst.msk [vmem:[#allocation3 + $0x98] sm:$0xff] %vm3969_vm4, %v3912_v31  ;;  %v4219_v31 = vld [vmem:[#allocation2 + $0x171] sm:$0xff] }
 0x54a   : > { %4507 = vrot.lane.b32.xlu0 %v6927_v16, %s5528_s28  ;;  %4475 = vrot.lane.b32.xlu1 %v4400_v50, %s5528_s28  ;;  %v4013_v16 = vld [vmem:[#allocation2 + $0xd8] sm:$0xff] }
 0x54c   : > { %v3914_v5 = vpop.permute.xlu0 %3913  ;;  %v3916_v8 = vpop.permute.xlu1 %3915 }
 0x54d   : > { %3990 = vst.msk [vmem:[#allocation3 + $0xa0] sm:$0xff] %vm3969_vm4, %v3914_v5  ;;  %3991 = vst.msk [vmem:[#allocation3 + $0xa8] sm:$0xff] %vm3969_vm4, %v3916_v8  ;;  %v4203_v8 = vld [vmem:[#allocation2 + $0xb1] sm:$0xff] }
 0x54e   : > { %4700 = vrot.lane.b32.xlu0 %v7030_v40, %s5529_s29  ;;  %4119 = vrot.lane.b32.xlu1 %v4029_v2, %s5526_s26  ;;  %v4206_v40 = vld [vmem:[#allocation2 + $0xd9] sm:$0xff] }
 0x550   : > { %v3918_v10 = vpop.permute.xlu0 %3917  ;;  %v3920_v46 = vpop.permute.xlu1 %3919 }
 0x551   : > { %3992 = vst.msk [vmem:[#allocation3 + $0xb0] sm:$0xff] %vm3969_vm4, %v3918_v10  ;;  %3993 = vst.msk [vmem:[#allocation3 + $0xb8] sm:$0xff] %vm3969_vm4, %v3920_v46 }
 0x552   : > { %4668 = vrot.lane.b32.xlu0 %v6974_v29, %s5529_s29  ;;  %4893 = vrot.lane.b32.xlu1 %v7186_v54, %s5530_s30  ;;  %v4399_v29 = vld [vmem:[#allocation2 + $0xda] sm:$0xff] }
 0x554   : > { %v3922_v14 = vpop.permute.xlu0 %3921  ;;  %v3924_v37 = vpop.permute.xlu1 %3923 }
 0x555   : > { %3994 = vst.msk [vmem:[#allocation3 + $0xc0] sm:$0xff] %vm3969_vm4, %v3922_v14  ;;  %3995 = vst.msk [vmem:[#allocation3 + $0xc8] sm:$0xff] %vm3969_vm4, %v3924_v37 }
 0x556   : > { %4087 = vrot.lane.b32.xlu0 %v4013_v16, %s5526_s26  ;;  %4312 = vrot.lane.b32.xlu1 %v4222_v9, %s5527_s27  ;;  %v4396_v9 = vld [vmem:[#allocation2 + $0xb2] sm:$0xff] }
 0x558   : > { %v3926_v38 = vpop.permute.xlu0 %3925  ;;  %v3936_v41 = vpop.permute.xlu1 %3935 }
 0x559   : > { %3996 = vst.msk [vmem:[#allocation3 + $0xd0] sm:$0xff] %vm3969_vm4, %v3926_v38  ;;  %4001 = vst.msk [vmem:[#allocation3 + $0xf8] sm:$0xff] %vm3969_vm4, %v3936_v41  ;;  %v4025_v38 = vld [vmem:[#allocation2 + $0x168] sm:$0xff] }
 0x55a   : > { %4861 = vrot.lane.b32.xlu0 %v7083_v7, %s5530_s30  ;;  %4280 = vrot.lane.b32.xlu1 %v4206_v40, %s5527_s27  ;;  %v4605_v40 = vld [vmem:[#allocation2 + $0x173] sm:$0xff] }
 0x55c   : > { %v4130_v54 = vpop.permute.xlu0 %4129  ;;  %v4098_v42 = vpop.permute.xlu1 %4097 }
 0x55d   : > { %4195 = vst.msk [vmem:[#allocation3 + $0xf8] sm:$0xff] %vm4163_vm5, %v4130_v54  ;;  %4179 = vst.msk [vmem:[#allocation3 + $0x78] sm:$0xff] %vm4163_vm5, %v4098_v42 }
 0x55e   : > { %4505 = vrot.lane.b32.xlu0 %v6925_v15, %s5528_s28  ;;  %4473 = vrot.lane.b32.xlu1 %v4399_v29, %s5528_s28  ;;  %v4012_v15 = vld [vmem:[#allocation2 + $0xc8] sm:$0xff] }
 0x560   : > { %v4323_v34 = vpop.permute.xlu0 %4322  ;;  %v4291_v32 = vpop.permute.xlu1 %4290 }
 0x561   : > { %4388 = vst.msk [vmem:[#allocation3 + $0xf8] sm:$0xff] %vm4356_vm6, %v4323_v34  ;;  %4372 = vst.msk [vmem:[#allocation3 + $0x78] sm:$0xff] %vm4356_vm6, %v4291_v32  ;;  %v4218_v34 = vld [vmem:[#allocation2 + $0x169] sm:$0xff] }
 0x562   : > { %4698 = vrot.lane.b32.xlu0 %v7028_v39, %s5529_s29  ;;  %4117 = vrot.lane.b32.xlu1 %v4028_v45, %s5526_s26  ;;  %v4009_v45 = vld [vmem:[#allocation2 + $0xa8] sm:$0xff] }
 0x564   : > { %v4516_v7 = vpop.permute.xlu0 %4515  ;;  %v3934_v17 = vpop.permute.xlu1 %3933 }
 0x565   : > { %4581 = vst.msk [vmem:[#allocation3 + $0xf8] sm:$0xff] %vm4549_vm7, %v4516_v7 }
 0x566   : > { %4000 = vst.msk [vmem:[#allocation3 + $0xf0] sm:$0xff] %vm3969_vm4, %v3934_v17  ;;  %4666 = vrot.lane.b32.xlu0 %v6972_v26, %s5529_s29  ;;  %4891 = vrot.lane.b32.xlu1 %v7213_v56, %s5530_s30  ;;  %v4414_v26 = vld [vmem:[#allocation2 + $0x18a] sm:$0xff] }
 0x567   : > { %v4398_v56 = vld [vmem:[#allocation2 + $0xca] sm:$0xff] }
 0x568   : > { %v4484_v51 = vpop.permute.xlu0 %4483  ;;  %v4709_v39 = vpop.permute.xlu1 %4708 }
 0x569   : > { %4565 = vst.msk [vmem:[#allocation3 + $0x78] sm:$0xff] %vm4549_vm7, %v4484_v51 }
 0x56a   : > { %4774 = vst.msk [vmem:[#allocation3 + $0xf8] sm:$0xff] %vm4742_vm8, %v4709_v39  ;;  %4085 = vrot.lane.b32.xlu0 %v4012_v15, %s5526_s26  ;;  %4310 = vrot.lane.b32.xlu1 %v4221_v47, %s5527_s27  ;;  %v4202_v15 = vld [vmem:[#allocation2 + $0xa9] sm:$0xff] }
 0x56b   : > { %v4411_v39 = vld [vmem:[#allocation2 + $0x16a] sm:$0xff] }
 0x56c   : > { %v4128_v52 = vpop.permute.xlu0 %4127  ;;  %v4677_v59 = vpop.permute.xlu1 %4676 }
 0x56d   : > { %4194 = vst.msk [vmem:[#allocation3 + $0xf0] sm:$0xff] %vm4163_vm5, %v4128_v52 }
 0x56e   : > { %4758 = vst.msk [vmem:[#allocation3 + $0x78] sm:$0xff] %vm4742_vm8, %v4677_v59  ;;  %4859 = vrot.lane.b32.xlu0 %v7081_v6, %s5530_s30  ;;  %4278 = vrot.lane.b32.xlu1 %v4205_v35, %s5527_s27  ;;  %v4395_v35 = vld [vmem:[#allocation2 + $0xaa] sm:$0xff] }
 0x570   : > { %v4902_v28 = vpop.permute.xlu0 %4901  ;;  %v4096_v44 = vpop.permute.xlu1 %4095 }
 0x571   : > { %4967 = vst.msk [vmem:[#allocation3 + $0xf8] sm:$0xff] %vm4935_vm9, %v4902_v28 }
 0x572   : > { %4178 = vst.msk [vmem:[#allocation3 + $0x70] sm:$0xff] %vm4163_vm5, %v4096_v44  ;;  %4503 = vrot.lane.b32.xlu0 %v4414_v26, %s5528_s28  ;;  %4471 = vrot.lane.b32.xlu1 %v4398_v56, %s5528_s28  ;;  %v4604_v26 = vld [vmem:[#allocation2 + $0x16b] sm:$0xff]  ;;  %v4024_v56 = vld [vmem:[#allocation2 + $0x158] sm:$0xff] }
 0x574   : > { %v4321_v53 = vpop.permute.xlu0 %4320  ;;  %v4870_v3 = vpop.permute.xlu1 %4869 }
 0x575   : > { %4387 = vst.msk [vmem:[#allocation3 + $0xf0] sm:$0xff] %vm4356_vm6, %v4321_v53 }
 0x576   : > { %4951 = vst.msk [vmem:[#allocation3 + $0x78] sm:$0xff] %vm4935_vm9, %v4870_v3  ;;  %4696 = vrot.lane.b32.xlu0 %v7020_v22, %s5529_s29  ;;  %4115 = vrot.lane.b32.xlu1 %v4027_v60, %s5526_s26  ;;  %v4011_v22 = vld [vmem:[#allocation2 + $0xc0] sm:$0xff]  ;;  %v4008_v3 = vld [vmem:[#allocation2 + $0x98] sm:$0xff] }
 0x578   : > { %v4289_v6 = vpop.permute.xlu0 %4288  ;;  %v4514_v48 = vpop.permute.xlu1 %4513  ;;  %v4999_v11 = vld [vmem:[#allocation3 + $0xf8] sm:$0xff] }
 0x579   : > { %4371 = vst.msk [vmem:[#allocation3 + $0x70] sm:$0xff] %vm4356_vm6, %v4289_v6  ;;  %5310 = vmatprep.subr.msk.mxu0 %vm5002_vm10, %v4999_v11  ;;  %5346 = vmatprep.subr.msk.mxu1 %vm5002_vm10, %v4999_v11  ;;  %v4217_v6 = vld [vmem:[#allocation2 + $0x159] sm:$0xff] }
 0x57a   : > { %4580 = vst.msk [vmem:[#allocation3 + $0xf0] sm:$0xff] %vm4549_vm7, %v4514_v48  ;;  %4664 = vrot.lane.b32.xlu0 %v6965_v23, %s5529_s29  ;;  %4889 = vrot.lane.b32.xlu1 %v7247_v49, %s5530_s30  ;;  %v4204_v23 = vld [vmem:[#allocation2 + $0xc1] sm:$0xff] }
 0x57c   : > { %v3932_v13 = vpop.permute.xlu0 %3931  ;;  %v4482_v57 = vpop.permute.xlu1 %4481 }
 0x57d   : > { %v4983_v24 = vld [vmem:[#allocation3 + $0x78] sm:$0xff]  ;;  %3999 = vst.msk [vmem:[#allocation3 + $0xe8] sm:$0xff] %vm3969_vm4, %v3932_v13 }
 0x57e   : > { %4564 = vst.msk [vmem:[#allocation3 + $0x70] sm:$0xff] %vm4549_vm7, %v4482_v57  ;;  %5311 = vmatpush3.xpose.msk.msra.mxu0 %vm5002_vm10, %v4983_v24  ;;  %5362 = vmatpush3.xpose.msk.msra.mxu1 %vm5002_vm10, %v4983_v24  ;;  %v4201_v13 = vld [vmem:[#allocation2 + $0x99] sm:$0xff] }
 0x57f   : > { %4083 = vrot.lane.b32.xlu0 %v4011_v22, %s5526_s26  ;;  %4308 = vrot.lane.b32.xlu1 %v4220_v12, %s5527_s27  ;;  %v4781_v12 = vld [vmem:[#allocation2 + $0xac] sm:$0xff]  ;;  %v4410_v24 = vld [vmem:[#allocation2 + $0x15a] sm:$0xff] }
 0x580   : > { %v4707_v18 = vpop.permute.xlu0 %4706  ;;  %v4126_v49 = vpop.permute.xlu1 %4125 }
 0x581   : > { %4773 = vst.msk [vmem:[#allocation3 + $0xf0] sm:$0xff] %vm4742_vm8, %v4707_v18 }
 0x582   : > { %4193 = vst.msk [vmem:[#allocation3 + $0xe8] sm:$0xff] %vm4163_vm5, %v4126_v49 }
 0x583   : > { %4857 = vrot.lane.b32.xlu0 %v7073_v1, %s5530_s30  ;;  %4276 = vrot.lane.b32.xlu1 %v4204_v23, %s5527_s27  ;;  %v4590_v1 = vld [vmem:[#allocation2 + $0xc3] sm:$0xff]  ;;  %v4394_v23 = vld [vmem:[#allocation2 + $0x9a] sm:$0xff] }
 0x584   : > { %v4675_v55 = vpop.permute.xlu0 %4674  ;;  %v4900_v58 = vpop.permute.xlu1 %4899 }
 0x585   : > { %4757 = vst.msk [vmem:[#allocation3 + $0x70] sm:$0xff] %vm4742_vm8, %v4675_v55  ;;  %v4023_v55 = vld [vmem:[#allocation2 + $0x150] sm:$0xff] }
 0x586   : > { %4966 = vst.msk [vmem:[#allocation3 + $0xf0] sm:$0xff] %vm4935_vm9, %v4900_v58 }
 0x587   : > { %4501 = vrot.lane.b32.xlu0 %v4413_v25, %s5528_s28  ;;  %4469 = vrot.lane.b32.xlu1 %v4397_v27, %s5528_s28  ;;  %v4603_v27 = vld [vmem:[#allocation2 + $0x15b] sm:$0xff] }
 0x588   : > { %v4094_v43 = vpop.permute.xlu0 %4093  ;;  %v4319_v62 = vpop.permute.xlu1 %4318 }
 0x589   : > { %4177 = vst.msk [vmem:[#allocation3 + $0x68] sm:$0xff] %vm4163_vm5, %v4094_v43  ;;  %v4587_v43 = vld [vmem:[#allocation2 + $0x9b] sm:$0xff] }
 0x58a   : > { %4386 = vst.msk [vmem:[#allocation3 + $0xe8] sm:$0xff] %vm4356_vm6, %v4319_v62 }
 0x58b   : > { %4694 = vrot.lane.b32.xlu0 %v7018_v21, %s5529_s29  ;;  %4113 = vrot.lane.b32.xlu1 %v4026_v36, %s5526_s26  ;;  %v4010_v21 = vld [vmem:[#allocation2 + $0xb0] sm:$0xff] }
 0x58c   : > { %v4868_v63 = vpop.permute.xlu0 %4867  ;;  %v4287_v50 = vpop.permute.xlu1 %4286 }
 0x58d   : > { %v4998_v33 = vld [vmem:[#allocation3 + $0xf0] sm:$0xff]  ;;  %4950 = vst.msk [vmem:[#allocation3 + $0x70] sm:$0xff] %vm4935_vm9, %v4868_v63 }
 0x58e   : > { %4370 = vst.msk [vmem:[#allocation3 + $0x68] sm:$0xff] %vm4356_vm6, %v4287_v50  ;;  %5312 = vmatprep.subr.msk.mxu0 %vm5002_vm10, %v4998_v33  ;;  %5347 = vmatprep.subr.msk.mxu1 %vm5002_vm10, %v4998_v33  ;;  %v4007_v63 = vld [vmem:[#allocation2 + $0x90] sm:$0xff] }
 0x58f   : > { %4662 = vrot.lane.b32.xlu0 %v4590_v1, %s5529_s29  ;;  %4887 = vrot.lane.b32.xlu1 %v7136_v30, %s5530_s30  ;;  %v4412_v30 = vld [vmem:[#allocation2 + $0x172] sm:$0xff] }
 0x590   : > { %v4512_v2 = vpop.permute.xlu0 %4511  ;;  %v3930_v5 = vpop.permute.xlu1 %3929  ;;  %v4216_v50 = vld [vmem:[#allocation2 + $0x151] sm:$0xff] }
 0x591   : > { %4579 = vst.msk [vmem:[#allocation3 + $0xe8] sm:$0xff] %vm4549_vm7, %v4512_v2  ;;  %v4780_v2 = vld [vmem:[#allocation2 + $0x9c] sm:$0xff] }
 0x592   : > { %3998 = vst.msk [vmem:[#allocation3 + $0xe0] sm:$0xff] %vm3969_vm4, %v3930_v5  ;;  %v4200_v5 = vld [vmem:[#allocation2 + $0x91] sm:$0xff] }
 0x593   : > { %4081 = vrot.lane.b32.xlu0 %v4010_v21, %s5526_s26  ;;  %4306 = vrot.lane.b32.xlu1 %v4219_v31, %s5527_s27 }
 0x594   : > { %v4480_v10 = vpop.permute.xlu0 %4479  ;;  %v4705_v46 = vpop.permute.xlu1 %4704  ;;  %v4982_v16 = vld [vmem:[#allocation3 + $0x70] sm:$0xff] }
 0x595   : > { %4563 = vst.msk [vmem:[#allocation3 + $0x68] sm:$0xff] %vm4549_vm7, %v4480_v10  ;;  %5313 = vmatpush3.xpose.msk.msra.mxu0 %vm5002_vm10, %v4982_v16  ;;  %5363 = vmatpush3.xpose.msk.msra.mxu1 %vm5002_vm10, %v4982_v16  ;;  %v4409_v10 = vld [vmem:[#allocation2 + $0x152] sm:$0xff] }
 0x596   : > { %4772 = vst.msk [vmem:[#allocation3 + $0xe8] sm:$0xff] %vm4742_vm8, %v4705_v46  ;;  %v4393_v46 = vld [vmem:[#allocation2 + $0x92] sm:$0xff] }
 0x597   : > { %4855 = vrot.lane.b32.xlu0 %v7071_v0, %s5530_s30  ;;  %4274 = vrot.lane.b32.xlu1 %v4203_v8, %s5527_s27  ;;  %v4589_v0 = vld [vmem:[#allocation2 + $0xb3] sm:$0xff] }
 0x598   : > { %v4124_v14 = vpop.permute.xlu0 %4123  ;;  %v4673_v37 = vpop.permute.xlu1 %4672 }
 0x599   : > { %4192 = vst.msk [vmem:[#allocation3 + $0xe0] sm:$0xff] %vm4163_vm5, %v4124_v14  ;;  %v4602_v14 = vld [vmem:[#allocation2 + $0x153] sm:$0xff] }
 0x59a   : > { %4756 = vst.msk [vmem:[#allocation3 + $0x68] sm:$0xff] %vm4742_vm8, %v4673_v37  ;;  %v4022_v37 = vld [vmem:[#allocation2 + $0x140] sm:$0xff] }
 0x59b   : > { %4499 = vrot.lane.b32.xlu0 %v4412_v30, %s5528_s28  ;;  %4467 = vrot.lane.b32.xlu1 %v4396_v9, %s5528_s28 }
 0x59c   : > { %v4898_v41 = vpop.permute.xlu0 %4897  ;;  %v4092_v29 = vpop.permute.xlu1 %4091 }
 0x59d   : > { %4965 = vst.msk [vmem:[#allocation3 + $0xe8] sm:$0xff] %vm4935_vm9, %v4898_v41  ;;  %v4586_v41 = vld [vmem:[#allocation2 + $0x93] sm:$0xff] }
 0x59e   : > { %4176 = vst.msk [vmem:[#allocation3 + $0x60] sm:$0xff] %vm4163_vm5, %v4092_v29  ;;  %v4795_v29 = vld [vmem:[#allocation2 + $0x154] sm:$0xff] }
 0x59f   : > { %4692 = vrot.lane.b32.xlu0 %v4605_v40, %s5529_s29  ;;  %4111 = vrot.lane.b32.xlu1 %v4025_v38, %s5526_s26 }
 0x5a0   : > { %v4317_v54 = vpop.permute.xlu0 %4316  ;;  %v4866_v42 = vpop.permute.xlu1 %4865 }
 0x5a1   : > { %4385 = vst.msk [vmem:[#allocation3 + $0xe0] sm:$0xff] %vm4356_vm6, %v4317_v54 }
 0x5a2   : > { %4949 = vst.msk [vmem:[#allocation3 + $0x68] sm:$0xff] %vm4935_vm9, %v4866_v42  ;;  %v4006_v42 = vld [vmem:[#allocation2 + $0x80] sm:$0xff] }
 0x5a3   : > { %4660 = vrot.lane.b32.xlu0 %v4589_v0, %s5529_s29  ;;  %4885 = vrot.lane.b32.xlu1 %v7128_v20, %s5530_s30 }
 0x5a4   : > { %v4285_v32 = vpop.permute.xlu0 %4284  ;;  %v4510_v7 = vpop.permute.xlu1 %4509  ;;  %v4997_v17 = vld [vmem:[#allocation3 + $0xe8] sm:$0xff] }
 0x5a5   : > { %4369 = vst.msk [vmem:[#allocation3 + $0x60] sm:$0xff] %vm4356_vm6, %v4285_v32  ;;  %5314 = vmatprep.subr.msk.mxu0 %vm5002_vm10, %v4997_v17  ;;  %5348 = vmatprep.subr.msk.mxu1 %vm5002_vm10, %v4997_v17  ;;  %v4779_v17 = vld [vmem:[#allocation2 + $0x94] sm:$0xff] }
 0x5a6   : > { %4578 = vst.msk [vmem:[#allocation3 + $0xe0] sm:$0xff] %vm4549_vm7, %v4510_v7 }
 0x5a7   : > { %4079 = vrot.lane.b32.xlu0 %v4009_v45, %s5526_s26  ;;  %4304 = vrot.lane.b32.xlu1 %v4218_v34, %s5527_s27  ;;  %v4215_v45 = vld [vmem:[#allocation2 + $0x141] sm:$0xff] }
 0x5a8   : > { %v3928_v47 = vpop.permute.xlu0 %3927  ;;  %v4478_v20 = vpop.permute.xlu1 %4477 }
 0x5a9   : > { %v4981_v51 = vld [vmem:[#allocation3 + $0x68] sm:$0xff]  ;;  %3997 = vst.msk [vmem:[#allocation3 + $0xd8] sm:$0xff] %vm3969_vm4, %v3928_v47 }
 0x5aa   : > { %4562 = vst.msk [vmem:[#allocation3 + $0x60] sm:$0xff] %vm4549_vm7, %v4478_v20  ;;  %5315 = vmatpush3.xpose.msk.msra.mxu0 %vm5002_vm10, %v4981_v51  ;;  %5364 = vmatpush3.xpose.msk.msra.mxu1 %vm5002_vm10, %v4981_v51  ;;  %v4408_v51 = vld [vmem:[#allocation2 + $0x142] sm:$0xff] }
 0x5ab   : > { %4853 = vrot.lane.b32.xlu0 %v7064_v61, %s5530_s30  ;;  %4272 = vrot.lane.b32.xlu1 %v4202_v15, %s5527_s27  ;;  %v4588_v61 = vld [vmem:[#allocation2 + $0xab] sm:$0xff]  ;;  %v4199_v15 = vld [vmem:[#allocation2 + $0x81] sm:$0xff] }
 0x5ac   : > { %v4703_v52 = vpop.permute.xlu0 %4702  ;;  %v4122_v59 = vpop.permute.xlu1 %4121 }
 0x5ad   : > { %4771 = vst.msk [vmem:[#allocation3 + $0xe0] sm:$0xff] %vm4742_vm8, %v4703_v52 }
 0x5ae   : > { %4191 = vst.msk [vmem:[#allocation3 + $0xd8] sm:$0xff] %vm4163_vm5, %v4122_v59 }
 0x5af   : > { %4497 = vrot.lane.b32.xlu0 %v4411_v39, %s5528_s28  ;;  %4465 = vrot.lane.b32.xlu1 %v4395_v35, %s5528_s28  ;;  %v4392_v39 = vld [vmem:[#allocation2 + $0x82] sm:$0xff] }
 0x5b0   : > { %v4671_v28 = vpop.permute.xlu0 %4670  ;;  %v4896_v44 = vpop.permute.xlu1 %4895 }
 0x5b1   : > { %4755 = vst.msk [vmem:[#allocation3 + $0x60] sm:$0xff] %vm4742_vm8, %v4671_v28 }
 0x5b2   : > { %4964 = vst.msk [vmem:[#allocation3 + $0xe0] sm:$0xff] %vm4935_vm9, %v4896_v44 }
 0x5b3   : > { %4690 = vrot.lane.b32.xlu0 %v4604_v26, %s5529_s29  ;;  %4109 = vrot.lane.b32.xlu1 %v4024_v56, %s5526_s26  ;;  %v4601_v26 = vld [vmem:[#allocation2 + $0x143] sm:$0xff]  ;;  %v4021_v56 = vld [vmem:[#allocation2 + $0x138] sm:$0xff] }
 0x5b4   : > { %v4090_v60 = vpop.permute.xlu0 %4089  ;;  %v4315_v53 = vpop.permute.xlu1 %4314 }
 0x5b5   : > { %4175 = vst.msk [vmem:[#allocation3 + $0x58] sm:$0xff] %vm4163_vm5, %v4090_v60  ;;  %v4794_v60 = vld [vmem:[#allocation2 + $0x144] sm:$0xff] }
 0x5b6   : > { %4384 = vst.msk [vmem:[#allocation3 + $0xd8] sm:$0xff] %vm4356_vm6, %v4315_v53 }
 0x5b7   : > { %4658 = vrot.lane.b32.xlu0 %v4588_v61, %s5529_s29  ;;  %4883 = vrot.lane.b32.xlu1 %v7126_v19, %s5530_s30  ;;  %v4585_v61 = vld [vmem:[#allocation2 + $0x83] sm:$0xff] }
 0x5b8   : > { %v4864_v48 = vpop.permute.xlu0 %4863  ;;  %v4283_v11 = vpop.permute.xlu1 %4282 }
 0x5b9   : > { %v4996_v22 = vld [vmem:[#allocation3 + $0xe0] sm:$0xff]  ;;  %4948 = vst.msk [vmem:[#allocation3 + $0x60] sm:$0xff] %vm4935_vm9, %v4864_v48 }
 0x5ba   : > { %4368 = vst.msk [vmem:[#allocation3 + $0x58] sm:$0xff] %vm4356_vm6, %v4283_v11  ;;  %5316 = vmatprep.subr.msk.mxu0 %vm5002_vm10, %v4996_v22  ;;  %5349 = vmatprep.subr.msk.mxu1 %vm5002_vm10, %v4996_v22  ;;  %v4214_v48 = vld [vmem:[#allocation2 + $0x139] sm:$0xff] }
 0x5bb   : > { %4077 = vrot.lane.b32.xlu0 %v4008_v3, %s5526_s26  ;;  %4302 = vrot.lane.b32.xlu1 %v4217_v6, %s5527_s27  ;;  %v4005_v6 = vld [vmem:[#allocation2 + $0x78] sm:$0xff] }
 0x5bc   : > { %v4508_v19 = vpop.permute.xlu0 %4507  ;;  %v4476_v57 = vpop.permute.xlu1 %4475 }
 0x5bd   : > { %4577 = vst.msk [vmem:[#allocation3 + $0xd8] sm:$0xff] %vm4549_vm7, %v4508_v19  ;;  %4561 = vst.msk [vmem:[#allocation3 + $0x58] sm:$0xff] %vm4549_vm7, %v4476_v57  ;;  %v4198_v19 = vld [vmem:[#allocation2 + $0x79] sm:$0xff] }
 0x5bf   : > { %4851 = vrot.lane.b32.xlu0 %v4781_v12, %s5530_s30  ;;  %4270 = vrot.lane.b32.xlu1 %v4201_v13, %s5527_s27  ;;  %v4778_v13 = vld [vmem:[#allocation2 + $0x84] sm:$0xff] }
 0x5c0   : > { %v4701_v18 = vpop.permute.xlu0 %4700  ;;  %v4120_v49 = vpop.permute.xlu1 %4119  ;;  %v4980_v25 = vld [vmem:[#allocation3 + $0x60] sm:$0xff] }
 0x5c1   : > { %4770 = vst.msk [vmem:[#allocation3 + $0xd8] sm:$0xff] %vm4742_vm8, %v4701_v18  ;;  %5317 = vmatpush3.xpose.msk.msra.mxu0 %vm5002_vm10, %v4980_v25  ;;  %5365 = vmatpush3.xpose.msk.msra.mxu1 %vm5002_vm10, %v4980_v25  ;;  %v4391_v18 = vld [vmem:[#allocation2 + $0x7a] sm:$0xff] }
 0x5c2   : > { %4190 = vst.msk [vmem:[#allocation3 + $0xd0] sm:$0xff] %vm4163_vm5, %v4120_v49 }
 0x5c3   : > { %4495 = vrot.lane.b32.xlu0 %v4410_v24, %s5528_s28  ;;  %4463 = vrot.lane.b32.xlu1 %v4394_v23, %s5528_s28  ;;  %v4407_v23 = vld [vmem:[#allocation2 + $0x13a] sm:$0xff] }
 0x5c4   : > { %v4669_v58 = vpop.permute.xlu0 %4668  ;;  %v4894_v36 = vpop.permute.xlu1 %4893 }
 0x5c5   : > { %4754 = vst.msk [vmem:[#allocation3 + $0x58] sm:$0xff] %vm4742_vm8, %v4669_v58  ;;  %v4020_v58 = vld [vmem:[#allocation2 + $0x128] sm:$0xff] }
 0x5c6   : > { %4963 = vst.msk [vmem:[#allocation3 + $0xd8] sm:$0xff] %vm4935_vm9, %v4894_v36 }
 0x5c7   : > { %4688 = vrot.lane.b32.xlu0 %v4603_v27, %s5529_s29  ;;  %4107 = vrot.lane.b32.xlu1 %v4023_v55, %s5526_s26  ;;  %v4600_v55 = vld [vmem:[#allocation2 + $0x13b] sm:$0xff] }
 0x5c8   : > { %v4088_v62 = vpop.permute.xlu0 %4087  ;;  %v4313_v1 = vpop.permute.xlu1 %4312 }
 0x5c9   : > { %4174 = vst.msk [vmem:[#allocation3 + $0x50] sm:$0xff] %vm4163_vm5, %v4088_v62  ;;  %v4584_v62 = vld [vmem:[#allocation2 + $0x7b] sm:$0xff] }
 0x5ca   : > { %4383 = vst.msk [vmem:[#allocation3 + $0xd0] sm:$0xff] %vm4356_vm6, %v4313_v1  ;;  %v4793_v1 = vld [vmem:[#allocation2 + $0x13c] sm:$0xff] }
 0x5cb   : > { %4656 = vrot.lane.b32.xlu0 %v4587_v43, %s5529_s29  ;;  %4881 = vrot.lane.b32.xlu1 %v7119_v4, %s5530_s30 }
 0x5cc   : > { %v4862_v33 = vpop.permute.xlu0 %4861  ;;  %v4281_v21 = vpop.permute.xlu1 %4280 }
 0x5cd   : > { %v4995_v31 = vld [vmem:[#allocation3 + $0xd8] sm:$0xff]  ;;  %4947 = vst.msk [vmem:[#allocation3 + $0x58] sm:$0xff] %vm4935_vm9, %v4862_v33  ;;  %v4004_v33 = vld [vmem:[#allocation2 + $0x68] sm:$0xff] }
 0x5ce   : > { %4367 = vst.msk [vmem:[#allocation3 + $0x50] sm:$0xff] %vm4356_vm6, %v4281_v21  ;;  %5318 = vmatprep.subr.msk.mxu0 %vm5002_vm10, %v4995_v31  ;;  %5350 = vmatprep.subr.msk.mxu1 %vm5002_vm10, %v4995_v31  ;;  %v4213_v21 = vld [vmem:[#allocation2 + $0x129] sm:$0xff] }
 0x5cf   : > { %4075 = vrot.lane.b32.xlu0 %v4007_v63, %s5526_s26  ;;  %4300 = vrot.lane.b32.xlu1 %v4216_v50, %s5527_s27 }
 0x5d0   : > { %v4506_v4 = vpop.permute.xlu0 %4505  ;;  %v4474_v8 = vpop.permute.xlu1 %4473 }
 0x5d1   : > { %4576 = vst.msk [vmem:[#allocation3 + $0xd0] sm:$0xff] %vm4549_vm7, %v4506_v4  ;;  %4560 = vst.msk [vmem:[#allocation3 + $0x50] sm:$0xff] %vm4549_vm7, %v4474_v8  ;;  %v4777_v4 = vld [vmem:[#allocation2 + $0x7c] sm:$0xff]  ;;  %v4197_v8 = vld [vmem:[#allocation2 + $0x69] sm:$0xff] }
 0x5d3   : > { %4849 = vrot.lane.b32.xlu0 %v4780_v2, %s5530_s30  ;;  %4268 = vrot.lane.b32.xlu1 %v4200_v5, %s5527_s27 }
 0x5d4   : > { %v4699_v16 = vpop.permute.xlu0 %4698  ;;  %v4118_v30 = vpop.permute.xlu1 %4117  ;;  %v4979_v9 = vld [vmem:[#allocation3 + $0x58] sm:$0xff] }
 0x5d5   : > { %4769 = vst.msk [vmem:[#allocation3 + $0xd0] sm:$0xff] %vm4742_vm8, %v4699_v16  ;;  %5319 = vmatpush3.xpose.msk.msra.mxu0 %vm5002_vm10, %v4979_v9  ;;  %5366 = vmatpush3.xpose.msk.msra.mxu1 %vm5002_vm10, %v4979_v9  ;;  %v4406_v16 = vld [vmem:[#allocation2 + $0x12a] sm:$0xff] }
 0x5d6   : > { %4189 = vst.msk [vmem:[#allocation3 + $0xc8] sm:$0xff] %vm4163_vm5, %v4118_v30  ;;  %v4390_v30 = vld [vmem:[#allocation2 + $0x6a] sm:$0xff] }
 0x5d7   : > { %4493 = vrot.lane.b32.xlu0 %v4409_v10, %s5528_s28  ;;  %4461 = vrot.lane.b32.xlu1 %v4393_v46, %s5528_s28 }
 0x5d8   : > { %v4667_v40 = vpop.permute.xlu0 %4666  ;;  %v4892_v38 = vpop.permute.xlu1 %4891 }
 0x5d9   : > { %4753 = vst.msk [vmem:[#allocation3 + $0x50] sm:$0xff] %vm4742_vm8, %v4667_v40  ;;  %v4599_v40 = vld [vmem:[#allocation2 + $0x12b] sm:$0xff] }
 0x5da   : > { %4962 = vst.msk [vmem:[#allocation3 + $0xd0] sm:$0xff] %vm4935_vm9, %v4892_v38  ;;  %v4019_v38 = vld [vmem:[#allocation2 + $0x120] sm:$0xff] }
 0x5db   : > { %4686 = vrot.lane.b32.xlu0 %v4602_v14, %s5529_s29  ;;  %4105 = vrot.lane.b32.xlu1 %v4022_v37, %s5526_s26 }
 0x5dc   : > { %v4086_v0 = vpop.permute.xlu0 %4085  ;;  %v4311_v54 = vpop.permute.xlu1 %4310 }
 0x5dd   : > { %4173 = vst.msk [vmem:[#allocation3 + $0x48] sm:$0xff] %vm4163_vm5, %v4086_v0  ;;  %v4583_v0 = vld [vmem:[#allocation2 + $0x6b] sm:$0xff] }
 0x5de   : > { %4382 = vst.msk [vmem:[#allocation3 + $0xc8] sm:$0xff] %vm4356_vm6, %v4311_v54  ;;  %v4792_v54 = vld [vmem:[#allocation2 + $0x12c] sm:$0xff] }
 0x5df   : > { %4654 = vrot.lane.b32.xlu0 %v4586_v41, %s5529_s29  ;;  %4879 = vrot.lane.b32.xlu1 %v4795_v29, %s5530_s30 }
 0x5e0   : > { %v4860_v34 = vpop.permute.xlu0 %4859  ;;  %v4279_v32 = vpop.permute.xlu1 %4278 }
 0x5e1   : > { %v4994_v7 = vld [vmem:[#allocation3 + $0xd0] sm:$0xff]  ;;  %4946 = vst.msk [vmem:[#allocation3 + $0x50] sm:$0xff] %vm4935_vm9, %v4860_v34  ;;  %v4003_v34 = vld [vmem:[#allocation2 + $0x60] sm:$0xff] }
 0x5e2   : > { %4366 = vst.msk [vmem:[#allocation3 + $0x48] sm:$0xff] %vm4356_vm6, %v4279_v32  ;;  %5320 = vmatprep.subr.msk.mxu0 %vm5002_vm10, %v4994_v7  ;;  %5351 = vmatprep.subr.msk.mxu1 %vm5002_vm10, %v4994_v7  ;;  %v4212_v32 = vld [vmem:[#allocation2 + $0x121] sm:$0xff] }
 0x5e3   : > { %4073 = vrot.lane.b32.xlu0 %v4006_v42, %s5526_s26  ;;  %4298 = vrot.lane.b32.xlu1 %v4215_v45, %s5527_s27 }
 0x5e4   : > { %v4504_v47 = vpop.permute.xlu0 %4503  ;;  %v4472_v20 = vpop.permute.xlu1 %4471 }
 0x5e5   : > { %4575 = vst.msk [vmem:[#allocation3 + $0xc8] sm:$0xff] %vm4549_vm7, %v4504_v47  ;;  %4559 = vst.msk [vmem:[#allocation3 + $0x48] sm:$0xff] %vm4549_vm7, %v4472_v20  ;;  %v4776_v47 = vld [vmem:[#allocation2 + $0x6c] sm:$0xff]  ;;  %v4196_v20 = vld [vmem:[#allocation2 + $0x61] sm:$0xff] }
 0x5e7   : > { %4847 = vrot.lane.b32.xlu0 %v4779_v17, %s5530_s30  ;;  %4266 = vrot.lane.b32.xlu1 %v4199_v15, %s5527_s27 }
 0x5e8   : > { %v4697_v35 = vpop.permute.xlu0 %4696  ;;  %v4116_v52 = vpop.permute.xlu1 %4115  ;;  %v4978_v59 = vld [vmem:[#allocation3 + $0x50] sm:$0xff] }
 0x5e9   : > { %4768 = vst.msk [vmem:[#allocation3 + $0xc8] sm:$0xff] %vm4742_vm8, %v4697_v35  ;;  %5321 = vmatpush3.xpose.msk.msra.mxu0 %vm5002_vm10, %v4978_v59  ;;  %5367 = vmatpush3.xpose.msk.msra.mxu1 %vm5002_vm10, %v4978_v59  ;;  %v4405_v35 = vld [vmem:[#allocation2 + $0x122] sm:$0xff] }
 0x5ea   : > { %4188 = vst.msk [vmem:[#allocation3 + $0xc0] sm:$0xff] %vm4163_vm5, %v4116_v52  ;;  %v4389_v52 = vld [vmem:[#allocation2 + $0x62] sm:$0xff] }
 0x5eb   : > { %4491 = vrot.lane.b32.xlu0 %v4408_v51, %s5528_s28  ;;  %4459 = vrot.lane.b32.xlu1 %v4392_v39, %s5528_s28 }
 0x5ec   : > { %v4665_v28 = vpop.permute.xlu0 %4664  ;;  %v4890_v44 = vpop.permute.xlu1 %4889 }
 0x5ed   : > { %4752 = vst.msk [vmem:[#allocation3 + $0x48] sm:$0xff] %vm4742_vm8, %v4665_v28  ;;  %v4598_v28 = vld [vmem:[#allocation2 + $0x123] sm:$0xff] }
 0x5ee   : > { %4961 = vst.msk [vmem:[#allocation3 + $0xc8] sm:$0xff] %vm4935_vm9, %v4890_v44  ;;  %v4582_v44 = vld [vmem:[#allocation2 + $0x63] sm:$0xff] }
 0x5ef   : > { %4684 = vrot.lane.b32.xlu0 %v4601_v26, %s5529_s29  ;;  %4103 = vrot.lane.b32.xlu1 %v4021_v56, %s5526_s26 }
 0x5f1   : > { %v4084_v53 = vpop.permute.xlu0 %4083  ;;  %v4309_v3 = vpop.permute.xlu1 %4308 }
 0x5f2   : > { %4172 = vst.msk [vmem:[#allocation3 + $0x40] sm:$0xff] %vm4163_vm5, %v4084_v53  ;;  %v7563_v53 = vld [vmem:[%s7718_s1] sm:$0xff] }
 0x5f3   : > { %4381 = vst.msk [vmem:[#allocation3 + $0xc0] sm:$0xff] %vm4356_vm6, %v4309_v3  ;;  %4652 = vrot.lane.b32.xlu0 %v4585_v61, %s5529_s29  ;;  %4877 = vrot.lane.b32.xlu1 %v4794_v60, %s5530_s30  ;;  %v7568_v3 = vld [vmem:[%s7718_s1 + $0x8] sm:$0xff] }
 0x5f4   : > { %5342 = vmatprep.mubr.msk.f32.mxu0 %vm5002_vm10, %v7563_v53  ;;  %5344 = vmatprep.mubr.msk.f32.mxu1 %vm5002_vm10, %v7568_v3 }
 0x5f5   : > { %v4858_v11 = vpop.permute.xlu0 %4857  ;;  %v4277_v22 = vpop.permute.xlu1 %4276  ;;  %v4993_v12 = vld [vmem:[#allocation3 + $0xc8] sm:$0xff] }
 0x5f6   : > { %4945 = vst.msk [vmem:[#allocation3 + $0x48] sm:$0xff] %vm4935_vm9, %v4858_v11  ;;  %5322 = vmatprep.subr.msk.mxu0 %vm5002_vm10, %v4993_v12  ;;  %5352 = vmatprep.subr.msk.mxu1 %vm5002_vm10, %v4993_v12 }
 0x5f7   : > { %4365 = vst.msk [vmem:[#allocation3 + $0x40] sm:$0xff] %vm4356_vm6, %v4277_v22  ;;  %4071 = vrot.lane.b32.xlu0 %v4005_v6, %s5526_s26  ;;  %4296 = vrot.lane.b32.xlu1 %v4214_v48, %s5527_s27  ;;  %v4791_v6 = vld [vmem:[#allocation2 + $0x124] sm:$0xff] }
 0x5f8   : > { %v4775_v48 = vld [vmem:[#allocation2 + $0x64] sm:$0xff] }
 0x5f9   : > { %v4502_v57 = vpop.permute.xlu0 %4501  ;;  %v4470_v24 = vpop.permute.xlu1 %4469 }
 0x5fa   : > { %4574 = vst.msk [vmem:[#allocation3 + $0xc0] sm:$0xff] %vm4549_vm7, %v4502_v57  ;;  %4558 = vst.msk [vmem:[#allocation3 + $0x40] sm:$0xff] %vm4549_vm7, %v4470_v24 }
 0x5fb   : > { %4845 = vrot.lane.b32.xlu0 %v4778_v13, %s5530_s30  ;;  %4264 = vrot.lane.b32.xlu1 %v4198_v19, %s5527_s27 }
 0x5fd   : > { %v4695_v49 = vpop.permute.xlu0 %4694  ;;  %v4114_v25 = vpop.permute.xlu1 %4113  ;;  %v4977_v27 = vld [vmem:[#allocation3 + $0x48] sm:$0xff] }
 0x5fe   : > { %4767 = vst.msk [vmem:[#allocation3 + $0xc0] sm:$0xff] %vm4742_vm8, %v4695_v49  ;;  %5323 = vmatpush3.xpose.msk.msra.mxu0 %vm5002_vm10, %v4977_v27  ;;  %5368 = vmatpush3.xpose.msk.msra.mxu1 %vm5002_vm10, %v4977_v27 }
 0x5ff   : > { %4187 = vst.msk [vmem:[#allocation3 + $0xb8] sm:$0xff] %vm4163_vm5, %v4114_v25  ;;  %4489 = vrot.lane.b32.xlu0 %v4407_v23, %s5528_s28  ;;  %4457 = vrot.lane.b32.xlu1 %v4391_v18, %s5528_s28 }
 0x601   : > { %v4663_v36 = vpop.permute.xlu0 %4662  ;;  %v4888_v43 = vpop.permute.xlu1 %4887 }
 0x602   : > { %4751 = vst.msk [vmem:[#allocation3 + $0x40] sm:$0xff] %vm4742_vm8, %v4663_v36 }
 0x603   : > { %4960 = vst.msk [vmem:[#allocation3 + $0xc0] sm:$0xff] %vm4935_vm9, %v4888_v43  ;;  %4682 = vrot.lane.b32.xlu0 %v4600_v55, %s5529_s29  ;;  %4101 = vrot.lane.b32.xlu1 %v4020_v58, %s5526_s26 }
 0x605   : > { %v4082_v63 = vpop.permute.xlu0 %4081  ;;  %v4307_v50 = vpop.permute.xlu1 %4306 }
 0x606   : > { %4171 = vst.msk [vmem:[#allocation3 + $0x38] sm:$0xff] %vm4163_vm5, %v4082_v63 }
 0x607   : > { %4380 = vst.msk [vmem:[#allocation3 + $0xb8] sm:$0xff] %vm4356_vm6, %v4307_v50  ;;  %4650 = vrot.lane.b32.xlu0 %v4584_v62, %s5529_s29  ;;  %4875 = vrot.lane.b32.xlu1 %v4793_v1, %s5530_s30 }
 0x609   : > { %v4856_v31 = vpop.permute.xlu0 %4855  ;;  %v4275_v2 = vpop.permute.xlu1 %4274 }
 0x60a   : > { %v4992_v5 = vld [vmem:[#allocation3 + $0xc0] sm:$0xff]  ;;  %4944 = vst.msk [vmem:[#allocation3 + $0x40] sm:$0xff] %vm4935_vm9, %v4856_v31 }
 0x60b   : > { %4364 = vst.msk [vmem:[#allocation3 + $0x38] sm:$0xff] %vm4356_vm6, %v4275_v2  ;;  %5324 = vmatprep.subr.msk.mxu0 %vm5002_vm10, %v4992_v5  ;;  %5353 = vmatprep.subr.msk.mxu1 %vm5002_vm10, %v4992_v5 }
 0x60c   : > { %4069 = vrot.lane.b32.xlu0 %v4004_v33, %s5526_s26  ;;  %4294 = vrot.lane.b32.xlu1 %v4213_v21, %s5527_s27 }
 0x60d   : > { %v4500_v10 = vpop.permute.xlu0 %4499  ;;  %v4468_v46 = vpop.permute.xlu1 %4467 }
 0x60e   : > { %4573 = vst.msk [vmem:[#allocation3 + $0xb8] sm:$0xff] %vm4549_vm7, %v4500_v10  ;;  %4557 = vst.msk [vmem:[#allocation3 + $0x38] sm:$0xff] %vm4549_vm7, %v4468_v46 }
 0x610   : > { %4843 = vrot.lane.b32.xlu0 %v4777_v4, %s5530_s30  ;;  %4262 = vrot.lane.b32.xlu1 %v4197_v8, %s5527_s27 }
 0x611   : > { %v4693_v9 = vpop.permute.xlu0 %4692  ;;  %v4112_v14 = vpop.permute.xlu1 %4111  ;;  %v4976_v37 = vld [vmem:[#allocation3 + $0x40] sm:$0xff] }
 0x612   : > { %4766 = vst.msk [vmem:[#allocation3 + $0xb8] sm:$0xff] %vm4742_vm8, %v4693_v9  ;;  %5325 = vmatpush3.xpose.msk.msra.mxu0 %vm5002_vm10, %v4976_v37  ;;  %5369 = vmatpush3.xpose.msk.msra.mxu1 %vm5002_vm10, %v4976_v37 }
 0x613   : > { %4186 = vst.msk [vmem:[#allocation3 + $0xb0] sm:$0xff] %vm4163_vm5, %v4112_v14 }
 0x614   : > { %4487 = vrot.lane.b32.xlu0 %v4406_v16, %s5528_s28  ;;  %4455 = vrot.lane.b32.xlu1 %v4390_v30, %s5528_s28 }
 0x615   : > { %v4661_v41 = vpop.permute.xlu0 %4660  ;;  %v4886_v29 = vpop.permute.xlu1 %4885 }
 0x616   : > { %4750 = vst.msk [vmem:[#allocation3 + $0x38] sm:$0xff] %vm4742_vm8, %v4661_v41 }
 0x617   : > { %4959 = vst.msk [vmem:[#allocation3 + $0xb8] sm:$0xff] %vm4935_vm9, %v4886_v29 }
 0x618   : > { %4680 = vrot.lane.b32.xlu0 %v4599_v40, %s5529_s29  ;;  %4099 = vrot.lane.b32.xlu1 %v4019_v38, %s5526_s26 }
 0x619   : > { %v4080_v42 = vpop.permute.xlu0 %4079  ;;  %v4305_v45 = vpop.permute.xlu1 %4304 }
 0x61a   : > { %4170 = vst.msk [vmem:[#allocation3 + $0x30] sm:$0xff] %vm4163_vm5, %v4080_v42 }
 0x61b   : > { %4379 = vst.msk [vmem:[#allocation3 + $0xb0] sm:$0xff] %vm4356_vm6, %v4305_v45 }
 0x61c   : > { %4648 = vrot.lane.b32.xlu0 %v4583_v0, %s5529_s29  ;;  %4873 = vrot.lane.b32.xlu1 %v4792_v54, %s5530_s30 }
 0x61d   : > { %v4854_v7 = vpop.permute.xlu0 %4853  ;;  %v4273_v17 = vpop.permute.xlu1 %4272 }
 0x61e   : > { %v4991_v15 = vld [vmem:[#allocation3 + $0xb8] sm:$0xff]  ;;  %4943 = vst.msk [vmem:[#allocation3 + $0x38] sm:$0xff] %vm4935_vm9, %v4854_v7 }
 0x61f   : > { %4363 = vst.msk [vmem:[#allocation3 + $0x30] sm:$0xff] %vm4356_vm6, %v4273_v17  ;;  %5326 = vmatprep.subr.msk.mxu0 %vm5002_vm10, %v4991_v15  ;;  %5354 = vmatprep.subr.msk.mxu1 %vm5002_vm10, %v4991_v15 }
 0x620   : > { %4067 = vrot.lane.b32.xlu0 %v4003_v34, %s5526_s26  ;;  %4292 = vrot.lane.b32.xlu1 %v4212_v32, %s5527_s27  ;;  %s5448_s26 = sshll.u32 %s5531_s25, 4  ;;  %s5449_s26 = int_to_ptr.vmem [resolvable:$false] %s5448_s26 }
 0x621   : > { %v4498_v51 = vpop.permute.xlu0 %4497  ;;  %v4466_v39 = vpop.permute.xlu1 %4465  ;;  %p5451_p0 = scmp.lt.s32.totalorder %s7670_s16, %s5449_s26 }
 0x622   : > { %4572 = vst.msk [vmem:[#allocation3 + $0xb0] sm:$0xff] %vm4549_vm7, %v4498_v51  ;;  %4556 = vst.msk [vmem:[#allocation3 + $0x30] sm:$0xff] %vm4549_vm7, %v4466_v39 }
 0x624   : > { %4841 = vrot.lane.b32.xlu0 %v4776_v47, %s5530_s30  ;;  %4260 = vrot.lane.b32.xlu1 %v4196_v20, %s5527_s27  ;;  %s5450_s27 = scalar_lea.vmem %s5449_s26, 1024 }
 0x625   : > { %v4691_v59 = vpop.permute.xlu0 %4690  ;;  %v4110_v26 = vpop.permute.xlu1 %4109  ;;  %v4975_v56 = vld [vmem:[#allocation3 + $0x38] sm:$0xff]  ;;  %p5452_p1 = scmp.lt.s32.totalorder %s5450_s27, %s5444_s13 }
 0x626   : > { %4765 = vst.msk [vmem:[#allocation3 + $0xb0] sm:$0xff] %vm4742_vm8, %v4691_v59  ;;  %5327 = vmatpush3.xpose.msk.msra.mxu0 %vm5002_vm10, %v4975_v56  ;;  %5370 = vmatpush3.xpose.msk.msra.mxu1 %vm5002_vm10, %v4975_v56 }
 0x627   : > { %4185 = vst.msk [vmem:[#allocation3 + $0xa8] sm:$0xff] %vm4163_vm5, %v4110_v26  ;;  %p5453_p2 = por %p5452_p1, %p5451_p0 }
 0x628   : > { %4485 = vrot.lane.b32.xlu0 %v4405_v35, %s5528_s28  ;;  %4453 = vrot.lane.b32.xlu1 %v4389_v52, %s5528_s28 }
 0x629   : > { %v4659_v61 = vpop.permute.xlu0 %4658  ;;  %v4884_v60 = vpop.permute.xlu1 %4883  ;;  %p5454_p3 = pnand %p5453_p2, %p5447_p13 }
 0x62a   : > { %4749 = vst.msk [vmem:[#allocation3 + $0x30] sm:$0xff] %vm4742_vm8, %v4659_v61 }
 0x62b   : > { %4958 = vst.msk [vmem:[#allocation3 + $0xb0] sm:$0xff] %vm4935_vm9, %v4884_v60 }
 0x62c   : > { %4678 = vrot.lane.b32.xlu0 %v4598_v28, %s5529_s29  ;;  %4646 = vrot.lane.b32.xlu1 %v4582_v44, %s5529_s29 }
 0x62d   : > { %v4078_v11 = vpop.permute.xlu0 %4077  ;;  %v4303_v22 = vpop.permute.xlu1 %4302 }
 0x62e   : > { %4169 = vst.msk [vmem:[#allocation3 + $0x28] sm:$0xff] %vm4163_vm5, %v4078_v11 }
 0x62f   : > { %4378 = vst.msk [vmem:[#allocation3 + $0xa8] sm:$0xff] %vm4356_vm6, %v4303_v22 }
 0x630   : > { %4871 = vrot.lane.b32.xlu0 %v4791_v6, %s5530_s30  ;;  %4839 = vrot.lane.b32.xlu1 %v4775_v48, %s5530_s30 }
 0x631   : > { %v4852_v12 = vpop.permute.xlu0 %4851  ;;  %v4271_v13 = vpop.permute.xlu1 %4270 }
 0x632   : > { %v4990_v19 = vld [vmem:[#allocation3 + $0xb0] sm:$0xff]  ;;  %4942 = vst.msk [vmem:[#allocation3 + $0x30] sm:$0xff] %vm4935_vm9, %v4852_v12 }
 0x633   : > { %4362 = vst.msk [vmem:[#allocation3 + $0x28] sm:$0xff] %vm4356_vm6, %v4271_v13  ;;  %5328 = vmatprep.subr.msk.mxu0 %vm5002_vm10, %v4990_v19  ;;  %5355 = vmatprep.subr.msk.mxu1 %vm5002_vm10, %v4990_v19 }
 0x635   : > { %v4496_v57 = vpop.permute.xlu0 %4495  ;;  %v4464_v24 = vpop.permute.xlu1 %4463 }
 0x636   : > { %4571 = vst.msk [vmem:[#allocation3 + $0xa8] sm:$0xff] %vm4549_vm7, %v4496_v57  ;;  %4555 = vst.msk [vmem:[#allocation3 + $0x28] sm:$0xff] %vm4549_vm7, %v4464_v24 }
 0x639   : > { %v4689_v23 = vpop.permute.xlu0 %4688  ;;  %v4108_v18 = vpop.permute.xlu1 %4107  ;;  %v4974_v49 = vld [vmem:[#allocation3 + $0x30] sm:$0xff] }
 0x63a   : > { %4764 = vst.msk [vmem:[#allocation3 + $0xa8] sm:$0xff] %vm4742_vm8, %v4689_v23  ;;  %5329 = vmatpush3.xpose.msk.msra.mxu0 %vm5002_vm10, %v4974_v49  ;;  %5371 = vmatpush3.xpose.msk.msra.mxu1 %vm5002_vm10, %v4974_v49 }
 0x63b   : > { %4184 = vst.msk [vmem:[#allocation3 + $0xa0] sm:$0xff] %vm4163_vm5, %v4108_v18 }
 0x63d   : > { %v4657_v25 = vpop.permute.xlu0 %4656  ;;  %v4882_v27 = vpop.permute.xlu1 %4881 }
 0x63e   : > { %4748 = vst.msk [vmem:[#allocation3 + $0x28] sm:$0xff] %vm4742_vm8, %v4657_v25 }
 0x63f   : > { %4957 = vst.msk [vmem:[#allocation3 + $0xa8] sm:$0xff] %vm4935_vm9, %v4882_v27 }
 0x641   : > { %v4076_v55 = vpop.permute.xlu0 %4075  ;;  %v4301_v58 = vpop.permute.xlu1 %4300 }
 0x642   : > { %4168 = vst.msk [vmem:[#allocation3 + $0x20] sm:$0xff] %vm4163_vm5, %v4076_v55 }
 0x643   : > { %4377 = vst.msk [vmem:[#allocation3 + $0xa0] sm:$0xff] %vm4356_vm6, %v4301_v58 }
 0x645   : > { %v4850_v36 = vpop.permute.xlu0 %4849  ;;  %v4269_v43 = vpop.permute.xlu1 %4268 }
 0x646   : > { %v4989_v62 = vld [vmem:[#allocation3 + $0xa8] sm:$0xff]  ;;  %4941 = vst.msk [vmem:[#allocation3 + $0x28] sm:$0xff] %vm4935_vm9, %v4850_v36 }
 0x647   : > { %4361 = vst.msk [vmem:[#allocation3 + $0x20] sm:$0xff] %vm4356_vm6, %v4269_v43  ;;  %5330 = vmatprep.subr.msk.mxu0 %vm5002_vm10, %v4989_v62  ;;  %5356 = vmatprep.subr.msk.mxu1 %vm5002_vm10, %v4989_v62 }
 0x649   : > { %v4494_v1 = vpop.permute.xlu0 %4493  ;;  %v4462_v63 = vpop.permute.xlu1 %4461 }
 0x64a   : > { %4570 = vst.msk [vmem:[#allocation3 + $0xa0] sm:$0xff] %vm4549_vm7, %v4494_v1  ;;  %4554 = vst.msk [vmem:[#allocation3 + $0x20] sm:$0xff] %vm4549_vm7, %v4462_v63 }
 0x64d   : > { %v4687_v50 = vpop.permute.xlu0 %4686  ;;  %v4106_v33 = vpop.permute.xlu1 %4105  ;;  %v4973_v21 = vld [vmem:[#allocation3 + $0x28] sm:$0xff] }
 0x64e   : > { %4763 = vst.msk [vmem:[#allocation3 + $0xa0] sm:$0xff] %vm4742_vm8, %v4687_v50  ;;  %5331 = vmatpush3.xpose.msk.msra.mxu0 %vm5002_vm10, %v4973_v21  ;;  %5372 = vmatpush3.xpose.msk.msra.mxu1 %vm5002_vm10, %v4973_v21 }
 0x64f   : > { %4183 = vst.msk [vmem:[#allocation3 + $0x98] sm:$0xff] %vm4163_vm5, %v4106_v33 }
 0x651   : > { %v4655_v31 = vpop.permute.xlu0 %4654  ;;  %v4880_v2 = vpop.permute.xlu1 %4879 }
 0x652   : > { %4747 = vst.msk [vmem:[#allocation3 + $0x20] sm:$0xff] %vm4742_vm8, %v4655_v31 }
 0x653   : > { %4956 = vst.msk [vmem:[#allocation3 + $0xa0] sm:$0xff] %vm4935_vm9, %v4880_v2 }
 0x655   : > { %v4074_v5 = vpop.permute.xlu0 %4073  ;;  %v4299_v4 = vpop.permute.xlu1 %4298 }
 0x656   : > { %4167 = vst.msk [vmem:[#allocation3 + $0x18] sm:$0xff] %vm4163_vm5, %v4074_v5 }
 0x657   : > { %4376 = vst.msk [vmem:[#allocation3 + $0x98] sm:$0xff] %vm4356_vm6, %v4299_v4 }
 0x659   : > { %v4848_v8 = vpop.permute.xlu0 %4847  ;;  %v4267_v10 = vpop.permute.xlu1 %4266 }
 0x65a   : > { %v4988_v46 = vld [vmem:[#allocation3 + $0xa0] sm:$0xff]  ;;  %4940 = vst.msk [vmem:[#allocation3 + $0x20] sm:$0xff] %vm4935_vm9, %v4848_v8 }
 0x65b   : > { %4360 = vst.msk [vmem:[#allocation3 + $0x18] sm:$0xff] %vm4356_vm6, %v4267_v10  ;;  %5332 = vmatprep.subr.msk.mxu0 %vm5002_vm10, %v4988_v46  ;;  %5357 = vmatprep.subr.msk.mxu1 %vm5002_vm10, %v4988_v46 }
 0x65d   : > { %v4492_v16 = vpop.permute.xlu0 %4491  ;;  %v4460_v30 = vpop.permute.xlu1 %4459 }
 0x65e   : > { %4569 = vst.msk [vmem:[#allocation3 + $0x98] sm:$0xff] %vm4549_vm7, %v4492_v16  ;;  %4553 = vst.msk [vmem:[#allocation3 + $0x18] sm:$0xff] %vm4549_vm7, %v4460_v30 }
 0x661   : > { %v4685_v9 = vpop.permute.xlu0 %4684  ;;  %v4104_v14 = vpop.permute.xlu1 %4103  ;;  %v4972_v37 = vld [vmem:[#allocation3 + $0x20] sm:$0xff] }
 0x662   : > { %4762 = vst.msk [vmem:[#allocation3 + $0x98] sm:$0xff] %vm4742_vm8, %v4685_v9  ;;  %5333 = vmatpush3.xpose.msk.msra.mxu0 %vm5002_vm10, %v4972_v37  ;;  %5373 = vmatpush3.xpose.msk.msra.mxu1 %vm5002_vm10, %v4972_v37 }
 0x663   : > { %4182 = vst.msk [vmem:[#allocation3 + $0x90] sm:$0xff] %vm4163_vm5, %v4104_v14 }
 0x665   : > { %v4653_v40 = vpop.permute.xlu0 %4652  ;;  %v4878_v38 = vpop.permute.xlu1 %4877 }
 0x666   : > { %4746 = vst.msk [vmem:[#allocation3 + $0x18] sm:$0xff] %vm4742_vm8, %v4653_v40 }
 0x667   : > { %4955 = vst.msk [vmem:[#allocation3 + $0x98] sm:$0xff] %vm4935_vm9, %v4878_v38 }
 0x669   : > { %v4072_v41 = vpop.permute.xlu0 %4071  ;;  %v4297_v29 = vpop.permute.xlu1 %4296 }
 0x66a   : > { %4166 = vst.msk [vmem:[#allocation3 + $0x10] sm:$0xff] %vm4163_vm5, %v4072_v41 }
 0x66b   : > { %4375 = vst.msk [vmem:[#allocation3 + $0x90] sm:$0xff] %vm4356_vm6, %v4297_v29 }
 0x66d   : > { %v4846_v0 = vpop.permute.xlu0 %4845  ;;  %v4265_v54 = vpop.permute.xlu1 %4264 }
 0x66e   : > { %v4987_v42 = vld [vmem:[#allocation3 + $0x98] sm:$0xff]  ;;  %4939 = vst.msk [vmem:[#allocation3 + $0x18] sm:$0xff] %vm4935_vm9, %v4846_v0 }
 0x66f   : > { %4359 = vst.msk [vmem:[#allocation3 + $0x10] sm:$0xff] %vm4356_vm6, %v4265_v54  ;;  %5334 = vmatprep.subr.msk.mxu0 %vm5002_vm10, %v4987_v42  ;;  %5358 = vmatprep.subr.msk.mxu1 %vm5002_vm10, %v4987_v42 }
 0x671   : > { %v4490_v45 = vpop.permute.xlu0 %4489  ;;  %v4458_v34 = vpop.permute.xlu1 %4457 }
 0x672   : > { %4568 = vst.msk [vmem:[#allocation3 + $0x90] sm:$0xff] %vm4549_vm7, %v4490_v45  ;;  %4552 = vst.msk [vmem:[#allocation3 + $0x10] sm:$0xff] %vm4549_vm7, %v4458_v34 }
 0x675   : > { %v4683_v32 = vpop.permute.xlu0 %4682  ;;  %v4102_v7 = vpop.permute.xlu1 %4101  ;;  %v4971_v17 = vld [vmem:[#allocation3 + $0x18] sm:$0xff] }
 0x676   : > { %4761 = vst.msk [vmem:[#allocation3 + $0x90] sm:$0xff] %vm4742_vm8, %v4683_v32  ;;  %5335 = vmatpush3.xpose.msk.msra.mxu0 %vm5002_vm10, %v4971_v17  ;;  %5374 = vmatpush3.xpose.msk.msra.mxu1 %vm5002_vm10, %v4971_v17 }
 0x677   : > { %4181 = vst.msk [vmem:[#allocation3 + $0x88] sm:$0xff] %vm4163_vm5, %v4102_v7 }
 0x679   : > { %v4651_v15 = vpop.permute.xlu0 %4650  ;;  %v4876_v47 = vpop.permute.xlu1 %4875 }
 0x67a   : > { %4745 = vst.msk [vmem:[#allocation3 + $0x10] sm:$0xff] %vm4742_vm8, %v4651_v15 }
 0x67b   : > { %4954 = vst.msk [vmem:[#allocation3 + $0x90] sm:$0xff] %vm4935_vm9, %v4876_v47 }
 0x67e   : > { %v4070_v20 = vpop.permute.xlu0 %4069  ;;  %v4295_v51 = vpop.permute.xlu1 %4294 }
 0x67f   : > { %4165 = vst.msk [vmem:[#allocation3 + $0x8] sm:$0xff] %vm4163_vm5, %v4070_v20 }
 0x680   : > { %4374 = vst.msk [vmem:[#allocation3 + $0x88] sm:$0xff] %vm4356_vm6, %v4295_v51 }
 0x682   : > { %v4844_v39 = vpop.permute.xlu0 %4843  ;;  %v4263_v35 = vpop.permute.xlu1 %4262  ;;  %v4986_v52 = vld [vmem:[#allocation3 + $0x90] sm:$0xff] }
 0x683   : > { %4938 = vst.msk [vmem:[#allocation3 + $0x10] sm:$0xff] %vm4935_vm9, %v4844_v39  ;;  %5336 = vmatprep.subr.msk.mxu0 %vm5002_vm10, %v4986_v52  ;;  %5359 = vmatprep.subr.msk.mxu1 %vm5002_vm10, %v4986_v52 }
 0x684   : > { %4358 = vst.msk [vmem:[#allocation3 + $0x8] sm:$0xff] %vm4356_vm6, %v4263_v35 }
 0x686   : > { %v4488_v59 = vpop.permute.xlu0 %4487  ;;  %v4456_v26 = vpop.permute.xlu1 %4455 }
 0x687   : > { %4567 = vst.msk [vmem:[#allocation3 + $0x88] sm:$0xff] %vm4549_vm7, %v4488_v59  ;;  %4551 = vst.msk [vmem:[#allocation3 + $0x8] sm:$0xff] %vm4549_vm7, %v4456_v26 }
 0x68a   : > { %v4681_v56 = vpop.permute.xlu0 %4680  ;;  %v4100_v28 = vpop.permute.xlu1 %4099  ;;  %v4970_v44 = vld [vmem:[#allocation3 + $0x10] sm:$0xff] }
 0x68b   : > { %4760 = vst.msk [vmem:[#allocation3 + $0x88] sm:$0xff] %vm4742_vm8, %v4681_v56  ;;  %5337 = vmatpush3.xpose.msk.msra.mxu0 %vm5002_vm10, %v4970_v44  ;;  %5375 = vmatpush3.xpose.msk.msra.mxu1 %vm5002_vm10, %v4970_v44 }
 0x68c   : > { %4180 = vst.msk [vmem:[#allocation3 + $0x80] sm:$0xff] %vm4163_vm5, %v4100_v28 }
 0x68e   : > { %v4649_v61 = vpop.permute.xlu0 %4648  ;;  %v4874_v60 = vpop.permute.xlu1 %4873 }
 0x68f   : > { %4744 = vst.msk [vmem:[#allocation3 + $0x8] sm:$0xff] %vm4742_vm8, %v4649_v61 }
 0x690   : > { %4953 = vst.msk [vmem:[#allocation3 + $0x88] sm:$0xff] %vm4935_vm9, %v4874_v60 }
 0x692   : > { %v4068_v6 = vpop.permute.xlu0 %4067  ;;  %v4293_v48 = vpop.permute.xlu1 %4292 }
 0x693   : > { %4164 = vst.msk [vmem:[#allocation3] sm:$0xff] %vm4163_vm5, %v4068_v6 }
 0x694   : > { %4373 = vst.msk [vmem:[#allocation3 + $0x80] sm:$0xff] %vm4356_vm6, %v4293_v48 }
 0x696   : > { %v4842_v11 = vpop.permute.xlu0 %4841  ;;  %v4261_v22 = vpop.permute.xlu1 %4260 }
 0x697   : > { %v4985_v12 = vld [vmem:[#allocation3 + $0x88] sm:$0xff]  ;;  %4937 = vst.msk [vmem:[#allocation3 + $0x8] sm:$0xff] %vm4935_vm9, %v4842_v11 }
 0x698   : > { %4357 = vst.msk [vmem:[#allocation3] sm:$0xff] %vm4356_vm6, %v4261_v22  ;;  %5338 = vmatprep.subr.msk.mxu0 %vm5002_vm10, %v4985_v12  ;;  %5360 = vmatprep.subr.msk.mxu1 %vm5002_vm10, %v4985_v12 }
 0x69a   : > { %v4486_v13 = vpop.permute.xlu0 %4485  ;;  %v4454_v19 = vpop.permute.xlu1 %4453 }
 0x69b   : > { %4566 = vst.msk [vmem:[#allocation3 + $0x80] sm:$0xff] %vm4549_vm7, %v4486_v13  ;;  %4550 = vst.msk [vmem:[#allocation3] sm:$0xff] %vm4549_vm7, %v4454_v19 }
 0x69e   : > { %v4679_v57 = vpop.permute.xlu0 %4678  ;;  %v4647_v24 = vpop.permute.xlu1 %4646  ;;  %v4969_v23 = vld [vmem:[#allocation3 + $0x8] sm:$0xff] }
 0x69f   : > { %4759 = vst.msk [vmem:[#allocation3 + $0x80] sm:$0xff] %vm4742_vm8, %v4679_v57  ;;  %4743 = vst.msk [vmem:[#allocation3] sm:$0xff] %vm4742_vm8, %v4647_v24  ;;  %5339 = vmatpush3.xpose.msk.msra.mxu0 %vm5002_vm10, %v4969_v23  ;;  %5376 = vmatpush3.xpose.msk.msra.mxu1 %vm5002_vm10, %v4969_v23 }
 0x6a2   : > { %v4872_v18 = vpop.permute.xlu0 %4871  ;;  %v4840_v49 = vpop.permute.xlu1 %4839 }
 0x6a3   : > { %4952 = vst.msk [vmem:[#allocation3 + $0x80] sm:$0xff] %vm4935_vm9, %v4872_v18  ;;  %4936 = vst.msk [vmem:[#allocation3] sm:$0xff] %vm4935_vm9, %v4840_v49 }
 0x6aa   : > { %v4984_v25 = vld [vmem:[#allocation3 + $0x80] sm:$0xff] }
 0x6ab   : > { %v4968_v27 = vld [vmem:[#allocation3] sm:$0xff]  ;;  %5340 = vmatprep.subr.msk.mxu0 %vm5002_vm10, %v4984_v25  ;;  %5361 = vmatprep.subr.msk.mxu1 %vm5002_vm10, %v4984_v25 }
 0x6ac   : > { %5341 = vmatpush3.xpose.msk.msra.mxu0 %vm5002_vm10, %v4968_v27  ;;  %5377 = vmatpush3.xpose.msk.msra.mxu1 %vm5002_vm10, %v4968_v27 }
 0x6af   : > { %5343 = vmatmul.mubr.msk.f32.vlgmr.msra.gmra.mxu0 %vm5002_vm10, %v7563_v53  ;;  %5345 = vmatmul.mubr.msk.f32.vlgmr.msra.gmra.mxu1 %vm5002_vm10, %v7568_v3 }
 0x76f   : > { %v5171_v55 = vpop.f32.mrf.mxu0  ;;  %v5177_v58 = vpop.f32.mrf.mxu1 }
 0x770   : > { %5182 = vst [vmem:[%s136_s14] sm:$0xff] %v5171_v55  ;;  %5184 = vst [vmem:[%s136_s14 + $0x10] sm:$0xff] %v5177_v58 }
 0x771   : > { %v5173_v53 = vpop.f32.mrf.mxu0  ;;  %v5179_v3 = vpop.f32.mrf.mxu1 }
 0x772   : > { %5183 = vst [vmem:[%s136_s14 + $0x8] sm:$0xff] %v5173_v53  ;;  %5185 = vst [vmem:[%s136_s14 + $0x18] sm:$0xff] %v5179_v3 }
 0x773   : > { %5457 = shalt.err (!%p5454_p3)
}
 0x774   : > { %s5458_s28 = scalar_lea.hbm %s7675_s23, 512  ;;  %s5462_s3 = scalar_lea.hbm %s7719_s2, 1024 }
 0x775   : > { %p5459_p4 = scmp.ne.s32.totalorder %s7675_s23, %s5458_s28  ;;  %p5463_p9 = scmp.lt.s32.totalorder %s7675_s23, %s7719_s2 }
 0x776   : > { %p5464_p10 = scmp.lt.s32.totalorder %s5462_s3, %s5458_s28 }
 0x777   : > { %p5460_p7 = pnand %p5459_p4, %p5587_p5 }
 0x778   : > { %p5465_p11 = por %p5464_p10, %p5463_p9 }
 0x779   : > { %p5461_p8 = pneg %p5460_p7 }
 0x77b   : > { %p5466_p12 = pnand %p5465_p11, %p5461_p8 }
 0x77d   : > { %5469 = shalt.err (!%p5466_p12)
}
 0x77e   : > { %s5532_s6 = smov 256   ;;  %s5533_s7 = smov 16  }
 0x77f   : > { %5378 = dma.vmem_to_hbm [thread:$0]  (%p5587_p5), %s7670_s16, 512, %s7675_s23, %s7677_s24, %s5532_s6, %s5532_s6, %s5533_s7  }
 0x780 PF: > { %p5384_p13 = scmp.ge.s32.totalorder %s5504_s12, 2  ;;  %s5215_s8 = sand.u32 1, %s5492_s9  }
 0x781   : > { %s5216_s14 = scalar_lea.sflag [#allocation5], %s5215_s8 }
 0x782   : > { %p5381_p0 = pnand %p5384_p13, %p5591_p6 }
 0x784   : > { %p5382_p1 = pneg %p5381_p0 }
 0x786   : > { %5487 = dma.done.wait (%p5382_p1), %s5216_s14, 512  }
 0x787   : > { %5489 = vsyncadd (%p5382_p1), %s5216_s14, 4294966784  ;;  %p12_p2 = scmp.ge.s32.totalorder %s5574_s15, 4   ;;  %s7722_s9 = smov %s5496_s10 }
 0x788   : > { %s7723_s10 = smov %s5500_s11  ;;  %s7724_s11 = smov %s5585_s18 }
 0x789   : > { %s7725_s12 = smov %s5574_s15  ;;  %14 = sbr.rel (!%p12_p2) target bundleno = 3 (0x3), region = 67 }
 0x78e   :  { %5221 = vsyncpa [#allocation5], 1 }
 0x78f   :  { %5223 = vsyncpa [#allocation5 + $0x1], 1 }

</bundles_post_ra>
